<compile_context>
chip_gen: v5e
topology: v5e:2x2
jax: 0.10.0
libtpu: 0.0.40
codegen_flags: <defaults>
</compile_context>

<pallas_src>
import functools
import math

import jax
import jax.numpy as jnp
from jax.experimental import pallas as pl
from jax.experimental.pallas import tpu as pltpu

EPS = 1e-5                           # BatchNorm2d default eps
CPAD = 128                           # lane-dense channel width carried end-to-end
MAX_SINGLE_TILE = 1024               # largest single-tile M (rows = N*Ho*Wo)
RAW_VMEM_BUDGET = 12 * 1024 * 1024   # resident raw-activation budget (safe on v7x 64 MiB VMEM)
VMEM_LIMIT = 32 * 1024 * 1024        # scoped VMEM limit (ok on v5e/v6e/v7x)


def _round_up(x, m):
    return (x + m - 1) // m * m


# ---------------------------------------------------------------------------
# Fused conv (+ downsample conv) + train-mode BatchNorm + ReLU (+ residual) kernel
# ---------------------------------------------------------------------------
def _fused_conv_bn_kernel(*refs, tm, m_real, inv_m, variant):
    """grid = (2, n_m): phase 0 = matmul + stats, phase 1 = BN/ReLU/residual epilogue.

    variant 0 (plain):      refs = p, w, o, raw, stats
    variant 1 (identity):   refs = p, w, r, o, raw, stats
    variant 2 (downsample): refs = p, w, rp, rw, o, raw, stats, rraw, rstats
    """
    if variant == 2:
        (p_ref, w_ref, rp_ref, rw_ref, o_ref,
         raw_scr, stats_scr, rraw_scr, rstats_scr) = refs
        r_ref = None
    elif variant == 1:
        p_ref, w_ref, r_ref, o_ref, raw_scr, stats_scr = refs
        rp_ref = rw_ref = rraw_scr = rstats_scr = None
    else:
        p_ref, w_ref, o_ref, raw_scr, stats_scr = refs
        r_ref = rp_ref = rw_ref = rraw_scr = rstats_scr = None

    ph = pl.program_id(0)
    i = pl.program_id(1)
    row0 = pl.multiple_of(i * tm, 8)

    # ---- phase 0: conv-as-matmul (bf16 MXU, f32 acc), raw stays resident in VMEM ----
    @pl.when(ph == 0)
    def _phase0():
        @pl.when(i == 0)
        def _init():
            stats_scr[...] = jnp.zeros_like(stats_scr)
            if variant == 2:
                rstats_scr[...] = jnp.zeros_like(rstats_scr)

        acc = jnp.dot(p_ref[...], w_ref[...], preferred_element_type=jnp.float32)
        raw_scr[pl.ds(row0, tm), :] = acc
        stats_scr[...] = stats_scr[...] + jnp.concatenate(
            [jnp.sum(acc, axis=0, keepdims=True),
             jnp.sum(acc * acc, axis=0, keepdims=True)], axis=0)

        if variant == 2:
            racc = jnp.dot(rp_ref[...], rw_ref[...], preferred_element_type=jnp.float32)
            rraw_scr[pl.ds(row0, tm), :] = racc
            rstats_scr[...] = rstats_scr[...] + jnp.concatenate(
                [jnp.sum(racc, axis=0, keepdims=True),
                 jnp.sum(racc * racc, axis=0, keepdims=True)], axis=0)

    # ---- phase 1: BN (exact batch stats) + ReLU (+ residual merge), masked store ----
    @pl.when(ph == 1)
    def _phase1():
        raw = raw_scr[pl.ds(row0, tm), :]
        mean = stats_scr[0:1, :] * inv_m
        var = jnp.maximum(stats_scr[1:2, :] * inv_m - mean * mean, 0.0)  # clamp: no NaN
        y = (raw - mean) * jax.lax.rsqrt(var + EPS)      # gamma=1, beta=0
        y = jnp.maximum(y, 0.0)                          # ReLU on the main branch

        if variant == 1:                                 # identity residual
            y = jnp.maximum(y + r_ref[...].astype(jnp.float32), 0.0)
        elif variant == 2:                               # downsample: conv + BN, no ReLU
            rraw = rraw_scr[pl.ds(row0, tm), :]
            rmean = rstats_scr[0:1, :] * inv_m
            rvar = jnp.maximum(rstats_scr[1:2, :] * inv_m - rmean * rmean, 0.0)
            res = (rraw - rmean) * jax.lax.rsqrt(rvar + EPS)
            y = jnp.maximum(y + res, 0.0)

        rows = row0 + jax.lax.broadcasted_iota(jnp.int32, (tm, 1), 0)
        y = jnp.where(rows < m_real, y, 0.0)             # padded rows stay exactly zero
        o_ref[...] = y.astype(o_ref.dtype)


def _fused_conv_bn(patches, w, *, m_real, tm, variant=0,
                   residual=None, patches_down=None, w_down=None,
                   out_dtype=jnp.bfloat16):
    m_pad, k = patches.shape
    n_m = m_pad // tm

    n_raw = 2 if variant == 2 else 1
    # TODO(synk): for very large M (raw > budget) spill the raw activation to HBM as
    #             bf16 and run a two-pass (matmul+stats / bn-apply) pipeline instead.
    assert m_pad * CPAD * 4 * n_raw <= RAW_VMEM_BUDGET, "raw activation exceeds VMEM budget"

    kern = functools.partial(_fused_conv_bn_kernel, tm=tm, m_real=m_real,
                             inv_m=1.0 / float(m_real), variant=variant)

    phase0_map = lambda ph, i: (i * (1 - ph), 0)   # tiled in phase 0, parked at 0 in phase 1
    phase1_map = lambda ph, i: (i * ph, 0)         # parked at 0 in phase 0, tiled in phase 1
    const_map = lambda ph, i: (0, 0)               # resident (weights)

    in_specs = [pl.BlockSpec((tm, k), phase0_map),
                pl.BlockSpec(w.shape, const_map)]
    args = [patches, w]
    scratch = [pltpu.VMEM((m_pad, CPAD), jnp.float32),   # raw conv output, resident
               pltpu.VMEM((2, CPAD), jnp.float32)]       # [sum; sumsq]
    flops = 2 * m_pad * k * CPAD
    if variant == 1:
        in_specs.append(pl.BlockSpec((tm, CPAD), phase1_map))
        args.append(residual)
    elif variant == 2:
        kd = patches_down.shape[1]
        in_specs += [pl.BlockSpec((tm, kd), phase0_map),
                     pl.BlockSpec(w_down.shape, const_map)]
        args += [patches_down, w_down]
        scratch += [pltpu.VMEM((m_pad, CPAD), jnp.float32),
                    pltpu.VMEM((2, CPAD), jnp.float32)]
        flops += 2 * m_pad * kd * CPAD

    bytes_accessed = sum(int(a.size) * a.dtype.itemsize for a in args) + m_pad * CPAD * 2
    cost = pl.CostEstimate(flops=int(flops), transcendentals=0,
                           bytes_accessed=int(bytes_accessed))

    return pl.pallas_call(
        kern,
        out_shape=jax.ShapeDtypeStruct((m_pad, CPAD), out_dtype),
        grid=(2, n_m),
        in_specs=in_specs,
        out_specs=pl.BlockSpec((tm, CPAD), phase1_map),
        scratch_shapes=scratch,
        compiler_params=pltpu.CompilerParams(
            # TODO(synk): on v7x, emit per-core partial stats (parallel M axis across the
            #             2 TensorCores) and combine the partials in phase 1.
            dimension_semantics=("arbitrary", "arbitrary"),
            vmem_limit_bytes=VMEM_LIMIT),
        cost_estimate=cost,
    )(*args)


# ---------------------------------------------------------------------------
# Plain-JAX glue: im2col over REAL channels + minimal M/K padding
# ---------------------------------------------------------------------------
def im2col(x_nhwc, p):
    """NHWC -> ((M, K) patches, (N, Ho, Wo)); K = k*k*cin_real for k>1 convs."""
    k, stride, pad, cin_real = p["k"], p["stride"], p["pad"], p["cin_real"]
    n, h, w, c = x_nhwc.shape
    if k == 1 and pad == 0:
        # 1x1 conv: patches are the lane-dense 128-channel activation itself (no slice).
        xs = x_nhwc[:, ::stride, ::stride, :] if stride > 1 else x_nhwc
        n, ho, wo, c = xs.shape
        return xs.reshape(n * ho * wo, c), (n, ho, wo)
    # TODO(synk): form 3x3/7x7 patches inside the kernel from a VMEM-resident NHWC tile
    #             + halo (shifted slices / pltpu.roll) to avoid the k*k HBM blowup.
    xr = x_nhwc[..., :cin_real] if cin_real < c else x_nhwc
    xp = jnp.pad(xr, ((0, 0), (pad, pad), (pad, pad), (0, 0)))
    ho = (h + 2 * pad - k) // stride + 1
    wo = (w + 2 * pad - k) // stride + 1
    cols = [xp[:, di:di + stride * (ho - 1) + 1:stride,
               dj:dj + stride * (wo - 1) + 1:stride, :]
            for di in range(k) for dj in range(k)]
    patches = jnp.concatenate(cols, axis=-1)              # (N,Ho,Wo,k*k*cin_real)
    return patches.reshape(n * ho * wo, k * k * cin_real), (n, ho, wo)


def _choose_tile(m_real):
    m8 = _round_up(max(m_real, 8), 8)
    if m8 <= MAX_SINGLE_TILE:
        return m8, m8                      # single tile, minimal (multiple-of-8) padding
    m_pad = _round_up(m_real, 128)         # fine-grained padding when tiled
    for t in (1024, 896, 768, 640, 512, 384, 256, 128):
        if m_pad % t == 0:
            return m_pad, t
    return m_pad, 128


def _pad_2d(x, rows, cols):
    r, c = x.shape
    if rows == r and cols == c:
        return x
    return jnp.pad(x, ((0, rows - r), (0, cols - c)))      # zero rows/cols: BN-neutral


def conv_bn_relu(x_nhwc, p):
    patches, (n, ho, wo) = im2col(x_nhwc, p)
    m_real = patches.shape[0]
    m_pad, tm = _choose_tile(m_real)
    patches = _pad_2d(patches, m_pad, p["w"].shape[0])
    y = _fused_conv_bn(patches, p["w"], m_real=m_real, tm=tm, variant=0)
    if m_pad != m_real:
        y = y[:m_real]
    return y.reshape(n, ho, wo, CPAD)


# ---------------------------------------------------------------------------
# Module structure
# ---------------------------------------------------------------------------
def bottleneck_block_forward(x, p):
    # y = relu(bn(conv1(x))); y = relu(bn(conv2(y)))
    y = conv_bn_relu(x, p["conv1"])
    y = conv_bn_relu(y, p["conv2"])
    # conv3 (+ downsample conv) + BN + ReLU + residual merge: ONE fused pallas_call.
    patches3, (n, ho, wo) = im2col(y, p["conv3"])
    m_real = patches3.shape[0]
    m_pad, tm = _choose_tile(m_real)
    patches3 = _pad_2d(patches3, m_pad, p["conv3"]["w"].shape[0])
    if "down" in p:
        pdn, _ = im2col(x, p["down"])
        pdn = _pad_2d(pdn, m_pad, p["down"]["w"].shape[0])
        out = _fused_conv_bn(patches3, p["conv3"]["w"], m_real=m_real, tm=tm,
                             variant=2, patches_down=pdn, w_down=p["down"]["w"])
    else:
        res = _pad_2d(x.reshape(-1, CPAD), m_pad, CPAD)    # identity residual
        out = _fused_conv_bn(patches3, p["conv3"]["w"], m_real=m_real, tm=tm,
                             variant=1, residual=res)
    if m_pad != m_real:
        out = out[:m_real]
    return out.reshape(n, ho, wo, CPAD)


def bottleneck_encoder_forward(x_nchw, params):
    x = jnp.transpose(x_nchw, (0, 2, 3, 1)).astype(jnp.bfloat16)   # NCHW -> NHWC
    # stem: Conv2d(3, 32, k=7, s=2, p=3) -> BatchNorm2d -> ReLU
    x = conv_bn_relu(x, params["stem"])
    for layer in params["layers"]:
        for bp in layer:
            x = bottleneck_block_forward(x, bp)
    # dropout: p_dropout=0.0 -> nn.Identity()
    x = x[..., :params["out_channels"]].astype(jnp.float32)        # strip lane padding
    return jnp.transpose(x, (0, 3, 1, 2))                          # back to NCHW


# ---------------------------------------------------------------------------
# Deterministic parameter init (kaiming_normal_ fan_out / relu).
# ---------------------------------------------------------------------------
def init_conv(key, k, cin_real, cout_real, stride, pad, k_rows):
    """Weights laid out as a (k_rows, CPAD) bf16 matmul RHS.

    Conv biases are omitted: every conv here is followed by train-mode BatchNorm,
    whose mean subtraction cancels a constant bias exactly.
    """
    assert cout_real <= CPAD and k_rows >= k * k * cin_real and k_rows % 8 == 0
    fan_out = cout_real * k * k
    std = math.sqrt(2.0 / fan_out)
    w = jax.random.normal(key, (k, k, cin_real, cout_real), jnp.float32) * std
    wp = jnp.zeros((k_rows, CPAD), jnp.float32)
    wp = wp.at[: k * k * cin_real, :cout_real].set(w.reshape(k * k * cin_real, cout_real))
    return {"w": wp.astype(jnp.bfloat16), "k": k, "stride": stride, "pad": pad,
            "cin_real": cin_real}


def init_bottleneck(key, cin, cout, stride):
    # TODO(synk): on v6e/v7x, pack pairs of 1x1 matmuls sharing an input to N=256 output
    #             lanes to fill the 256-wide MXU (keep N=128 on v5e).
    ks = jax.random.split(key, 4)
    mid = cout // 4
    p = {
        "conv1": init_conv(ks[0], 1, cin, mid, 1, 0, k_rows=CPAD),
        "conv2": init_conv(ks[1], 3, mid, mid, stride, 1, k_rows=9 * mid),
        "conv3": init_conv(ks[2], 1, mid, cout, 1, 0, k_rows=CPAD),
    }
    if stride != 1:
        p["down"] = init_conv(ks[3], 1, cin, cout, stride, 0, k_rows=CPAD)
    return p


def init_encoder(key, in_channels=3, layer_config=(32, 64, 96), num_res=(2, 2, 2)):
    keys = jax.random.split(key, 1 + len(layer_config))
    params = {
        "stem": init_conv(keys[0], 7, in_channels, layer_config[0], 2, 3,
                          k_rows=_round_up(7 * 7 * in_channels, 8)),
        "out_channels": layer_config[-1],
    }
    layers = []
    start = layer_config[0]
    for i, cout in enumerate(layer_config):
        stride = 1 if i == 0 else 2
        bkeys = jax.random.split(keys[1 + i], num_res[i])
        blocks = [init_bottleneck(bkeys[0], start, cout, stride)]
        for j in range(1, num_res[i]):
            blocks.append(init_bottleneck(bkeys[j], cout, cout, 1))
        layers.append(blocks)
        start = cout
    params["layers"] = layers
    return params


# ---------------------------------------------------------------------------
if __name__ == "__main__":
    key = jax.random.PRNGKey(0)
    kp, kx = jax.random.split(key)
    params = init_encoder(kp)

    # NCHW like PyTorch: batch=2, in_channels=3, spatial=16x16
    x = jax.random.normal(kx, (2, 3, 16, 16), jnp.float32)

    fwd = jax.jit(lambda inp: bottleneck_encoder_forward(inp, params))
    out = fwd(x)
    jax.block_until_ready(out)

    # Expected: [2, 96, 2, 2]  (stride-2 stem, then layer strides 1, 2, 2)
    assert out.shape == (2, 96, 2, 2), out.shape
    assert bool(jnp.all(jnp.isfinite(out)))
    print("KERNEL_OK")
</pallas_src>

<mosaic_0001>
module attributes {stable_mosaic.version = 11 : i64} {
  func.func @_fused_conv_bn_kernel(%arg0: i32, %arg1: i32, %arg2: memref<128x128xbf16, #tpu.memory_space<vmem>>, %arg3: memref<128x128xbf16, #tpu.memory_space<vmem>>, %arg4: memref<128x128xbf16, #tpu.memory_space<vmem>>, %arg5: memref<128x128xf32, #tpu.memory_space<vmem>>, %arg6: memref<2x128xf32, #tpu.memory_space<vmem>>) attributes {dimension_semantics = [#tpu.dimension_semantics<arbitrary>, #tpu.dimension_semantics<arbitrary>], iteration_bounds = array<i64: 2, 1>, scalar_prefetch = 0 : i64, scratch_operands = 2 : i64, tpu.core_type = #tpu.core_type<tc>, window_params = [{transform_indices = @transform_0, window_bounds = array<i64: 128, 128>}, {pipeline_mode = #tpu.pipeline_mode<synchronous>, transform_indices = @transform_1, window_bounds = array<i64: 128, 128>}, {transform_indices = @transform_2, window_bounds = array<i64: 128, 128>}]} {
    %c128_i32 = arith.constant 128 : i32
    %0 = arith.muli %arg1, %c128_i32 : i32
    %1 = tpu.assume_multiple %0, 8 : i32
    %c0_i32 = arith.constant 0 : i32
    %2 = arith.cmpi eq, %arg0, %c0_i32 : i32
    %3 = arith.extui %2 : i1 to i32
    %c0_i32_0 = arith.constant 0 : i32
    %4 = arith.cmpi ne, %3, %c0_i32_0 : i32
    scf.if %4 {
      %c0_i32_2 = arith.constant 0 : i32
      %8 = arith.cmpi eq, %arg1, %c0_i32_2 : i32
      %9 = arith.extui %8 : i1 to i32
      %c0_i32_3 = arith.constant 0 : i32
      %10 = arith.cmpi ne, %9, %c0_i32_3 : i32
      scf.if %10 {
        %cst_14 = arith.constant 0.000000e+00 : f32
        %25 = vector.broadcast %cst_14 : f32 to vector<2x128xf32>
        %c0_15 = arith.constant 0 : index
        %c0_16 = arith.constant 0 : index
        %26 = vector.load %arg6[%c0_15, %c0_16] : memref<2x128xf32, #tpu.memory_space<vmem>>, vector<2x128xf32>
        tpu.vector_store %arg6[%c0_15, %c0_16], %25 {strides = array<i32>} : memref<2x128xf32, #tpu.memory_space<vmem>>, vector<2x128xf32>,
      } else {
      }
      %c0 = arith.constant 0 : index
      %c0_4 = arith.constant 0 : index
      %11 = vector.load %arg2[%c0, %c0_4] : memref<128x128xbf16, #tpu.memory_space<vmem>>, vector<128x128xbf16>
      %c0_5 = arith.constant 0 : index
      %c0_6 = arith.constant 0 : index
      %12 = vector.load %arg3[%c0_5, %c0_6] : memref<128x128xbf16, #tpu.memory_space<vmem>>, vector<128x128xbf16>
      %cst = arith.constant dense<0.000000e+00> : vector<128x128xf32>
      %13 = tpu.matmul %11, %12, %cst {dimension_numbers = #tpu.dot_dimension_numbers<[1], [0], [0], [1], [0, 0, 1, 1], [], []>} : vector<128x128xbf16>, vector<128x128xbf16>, vector<128x128xf32> -> vector<128x128xf32>
      %14 = arith.index_cast %1 : i32 to index
      %c0_7 = arith.constant 0 : index
      %15 = vector.load %arg5[%14, %c0_7] : memref<128x128xf32, #tpu.memory_space<vmem>>, vector<128x128xf32>
      tpu.vector_store %arg5[%14, %c0_7], %13 {strides = array<i32>} : memref<128x128xf32, #tpu.memory_space<vmem>>, vector<128x128xf32>,
      %c0_8 = arith.constant 0 : index
      %c0_9 = arith.constant 0 : index
      %16 = vector.load %arg6[%c0_8, %c0_9] : memref<2x128xf32, #tpu.memory_space<vmem>>, vector<2x128xf32>
      %cst_10 = arith.constant dense<0.000000e+00> : vector<128xf32>
      %17 = vector.multi_reduction <add>, %13, %cst_10 [0] : vector<128x128xf32> to vector<128xf32>
      %18 = vector.shape_cast %17 : vector<128xf32> to vector<1x128xf32>
      %19 = arith.mulf %13, %13 : vector<128x128xf32>
      %cst_11 = arith.constant dense<0.000000e+00> : vector<128xf32>
      %20 = vector.multi_reduction <add>, %19, %cst_11 [0] : vector<128x128xf32> to vector<128xf32>
      %21 = vector.shape_cast %20 : vector<128xf32> to vector<1x128xf32>
      %22 = tpu.concatenate %18, %21 in 0 : vector<1x128xf32>, vector<1x128xf32> -> vector<2x128xf32>
      %23 = arith.addf %16, %22 : vector<2x128xf32>
      %c0_12 = arith.constant 0 : index
      %c0_13 = arith.constant 0 : index
      %24 = vector.load %arg6[%c0_12, %c0_13] : memref<2x128xf32, #tpu.memory_space<vmem>>, vector<2x128xf32>
      tpu.vector_store %arg6[%c0_12, %c0_13], %23 {strides = array<i32>} : memref<2x128xf32, #tpu.memory_space<vmem>>, vector<2x128xf32>,
    } else {
    }
    %c1_i32 = arith.constant 1 : i32
    %5 = arith.cmpi eq, %arg0, %c1_i32 : i32
    %6 = arith.extui %5 : i1 to i32
    %c0_i32_1 = arith.constant 0 : i32
    %7 = arith.cmpi ne, %6, %c0_i32_1 : i32
    scf.if %7 {
      %8 = arith.index_cast %1 : i32 to index
      %c0 = arith.constant 0 : index
      %9 = vector.load %arg5[%8, %c0] : memref<128x128xf32, #tpu.memory_space<vmem>>, vector<128x128xf32>
      %c0_2 = arith.constant 0 : index
      %c0_3 = arith.constant 0 : index
      %10 = vector.load %arg6[%c0_2, %c0_3] : memref<2x128xf32, #tpu.memory_space<vmem>>, vector<1x128xf32>
      %cst = arith.constant 7.812500e-03 : f32
      %11 = vector.broadcast %cst : f32 to vector<1x128xf32>
      %12 = arith.mulf %10, %11 : vector<1x128xf32>
      %c1 = arith.constant 1 : index
      %c0_4 = arith.constant 0 : index
      %13 = vector.load %arg6[%c1, %c0_4] : memref<2x128xf32, #tpu.memory_space<vmem>>, vector<1x128xf32>
      %cst_5 = arith.constant 7.812500e-03 : f32
      %14 = vector.broadcast %cst_5 : f32 to vector<1x128xf32>
      %15 = arith.mulf %13, %14 : vector<1x128xf32>
      %16 = arith.mulf %12, %12 : vector<1x128xf32>
      %17 = arith.subf %15, %16 : vector<1x128xf32>
      %cst_6 = arith.constant 0.000000e+00 : f32
      %18 = vector.broadcast %cst_6 : f32 to vector<1x128xf32>
      %19 = arith.maximumf %17, %18 : vector<1x128xf32>
      %20 = vector.broadcast %12 : vector<1x128xf32> to vector<128x128xf32>
      %21 = arith.subf %9, %20 : vector<128x128xf32>
      %cst_7 = arith.constant 9.99999974E-6 : f32
      %22 = vector.broadcast %cst_7 : f32 to vector<1x128xf32>
      %23 = arith.addf %19, %22 : vector<1x128xf32>
      %24 = math.rsqrt %23 : vector<1x128xf32>
      %25 = vector.broadcast %24 : vector<1x128xf32> to vector<128x128xf32>
      %26 = arith.mulf %21, %25 : vector<128x128xf32>
      %cst_8 = arith.constant 0.000000e+00 : f32
      %27 = vector.broadcast %cst_8 : f32 to vector<128x128xf32>
      %28 = arith.maximumf %26, %27 : vector<128x128xf32>
      %29 = tpu.iota {dimensions = array<i32: 0>} : vector<128x1xi32>
      %30 = vector.broadcast %1 : i32 to vector<128x1xi32>
      %31 = arith.addi %30, %29 : vector<128x1xi32>
      %c128_i32_9 = arith.constant 128 : i32
      %32 = vector.broadcast %c128_i32_9 : i32 to vector<128x1xi32>
      %33 = arith.cmpi slt, %31, %32 : vector<128x1xi32>
      %cst_10 = arith.constant 0.000000e+00 : f32
      %34 = vector.shape_cast %33 : vector<128x1xi1> to vector<128x1xi1>
      %35 = vector.broadcast %34 : vector<128x1xi1> to vector<128x128xi1>
      %36 = vector.broadcast %cst_10 : f32 to vector<128x128xf32>
      %37 = arith.select %35, %28, %36 : vector<128x128xi1>, vector<128x128xf32>
      %38 = arith.truncf %37 : vector<128x128xf32> to vector<128x128xbf16>
      %c0_11 = arith.constant 0 : index
      %c0_12 = arith.constant 0 : index
      %39 = vector.load %arg4[%c0_11, %c0_12] : memref<128x128xbf16, #tpu.memory_space<vmem>>, vector<128x128xbf16>
      tpu.vector_store %arg4[%c0_11, %c0_12], %38 {strides = array<i32>} : memref<128x128xbf16, #tpu.memory_space<vmem>>, vector<128x128xbf16>,
    } else {
    }
    return
  }
  func.func @transform_0(%arg0: i32, %arg1: i32) -> (i32, i32) {
    %c1_i32 = arith.constant 1 : i32
    %0 = arith.subi %c1_i32, %arg0 : i32
    %1 = arith.muli %arg1, %0 : i32
    %c0_i32 = arith.constant 0 : i32
    %c0_i32_0 = arith.constant 0 : i32
    return %1, %c0_i32 : i32, i32
  }
  func.func @transform_1(%arg0: i32, %arg1: i32) -> (i32, i32) {
    %c0_i32 = arith.constant 0 : i32
    %c0_i32_0 = arith.constant 0 : i32
    %c0_i32_1 = arith.constant 0 : i32
    return %c0_i32, %c0_i32_0 : i32, i32
  }
  func.func @transform_2(%arg0: i32, %arg1: i32) -> (i32, i32) {
    %0 = arith.muli %arg1, %arg0 : i32
    %c0_i32 = arith.constant 0 : i32
    %c0_i32_0 = arith.constant 0 : i32
    return %0, %c0_i32 : i32, i32
  }
}

module attributes {stable_mosaic.version = 11 : i64} {
  func.func @_fused_conv_bn_kernel(%arg0: i32, %arg1: i32, %arg2: memref<128x152xbf16, #tpu.memory_space<vmem>>, %arg3: memref<152x128xbf16, #tpu.memory_space<vmem>>, %arg4: memref<128x128xbf16, #tpu.memory_space<vmem>>, %arg5: memref<128x128xf32, #tpu.memory_space<vmem>>, %arg6: memref<2x128xf32, #tpu.memory_space<vmem>>) attributes {dimension_semantics = [#tpu.dimension_semantics<arbitrary>, #tpu.dimension_semantics<arbitrary>], iteration_bounds = array<i64: 2, 1>, scalar_prefetch = 0 : i64, scratch_operands = 2 : i64, tpu.core_type = #tpu.core_type<tc>, window_params = [{transform_indices = @transform_0, window_bounds = array<i64: 128, 152>}, {pipeline_mode = #tpu.pipeline_mode<synchronous>, transform_indices = @transform_1, window_bounds = array<i64: 152, 128>}, {transform_indices = @transform_2, window_bounds = array<i64: 128, 128>}]} {
    %c128_i32 = arith.constant 128 : i32
    %0 = arith.muli %arg1, %c128_i32 : i32
    %1 = tpu.assume_multiple %0, 8 : i32
    %c0_i32 = arith.constant 0 : i32
    %2 = arith.cmpi eq, %arg0, %c0_i32 : i32
    %3 = arith.extui %2 : i1 to i32
    %c0_i32_0 = arith.constant 0 : i32
    %4 = arith.cmpi ne, %3, %c0_i32_0 : i32
    scf.if %4 {
      %c0_i32_2 = arith.constant 0 : i32
      %8 = arith.cmpi eq, %arg1, %c0_i32_2 : i32
      %9 = arith.extui %8 : i1 to i32
      %c0_i32_3 = arith.constant 0 : i32
      %10 = arith.cmpi ne, %9, %c0_i32_3 : i32
      scf.if %10 {
        %cst_14 = arith.constant 0.000000e+00 : f32
        %25 = vector.broadcast %cst_14 : f32 to vector<2x128xf32>
        %c0_15 = arith.constant 0 : index
        %c0_16 = arith.constant 0 : index
        %26 = vector.load %arg6[%c0_15, %c0_16] : memref<2x128xf32, #tpu.memory_space<vmem>>, vector<2x128xf32>
        tpu.vector_store %arg6[%c0_15, %c0_16], %25 {strides = array<i32>} : memref<2x128xf32, #tpu.memory_space<vmem>>, vector<2x128xf32>,
      } else {
      }
      %c0 = arith.constant 0 : index
      %c0_4 = arith.constant 0 : index
      %11 = vector.load %arg2[%c0, %c0_4] : memref<128x152xbf16, #tpu.memory_space<vmem>>, vector<128x152xbf16>
      %c0_5 = arith.constant 0 : index
      %c0_6 = arith.constant 0 : index
      %12 = vector.load %arg3[%c0_5, %c0_6] : memref<152x128xbf16, #tpu.memory_space<vmem>>, vector<152x128xbf16>
      %cst = arith.constant dense<0.000000e+00> : vector<128x128xf32>
      %13 = tpu.matmul %11, %12, %cst {dimension_numbers = #tpu.dot_dimension_numbers<[1], [0], [0], [1], [0, 0, 1, 1], [], []>} : vector<128x152xbf16>, vector<152x128xbf16>, vector<128x128xf32> -> vector<128x128xf32>
      %14 = arith.index_cast %1 : i32 to index
      %c0_7 = arith.constant 0 : index
      %15 = vector.load %arg5[%14, %c0_7] : memref<128x128xf32, #tpu.memory_space<vmem>>, vector<128x128xf32>
      tpu.vector_store %arg5[%14, %c0_7], %13 {strides = array<i32>} : memref<128x128xf32, #tpu.memory_space<vmem>>, vector<128x128xf32>,
      %c0_8 = arith.constant 0 : index
      %c0_9 = arith.constant 0 : index
      %16 = vector.load %arg6[%c0_8, %c0_9] : memref<2x128xf32, #tpu.memory_space<vmem>>, vector<2x128xf32>
      %cst_10 = arith.constant dense<0.000000e+00> : vector<128xf32>
      %17 = vector.multi_reduction <add>, %13, %cst_10 [0] : vector<128x128xf32> to vector<128xf32>
      %18 = vector.shape_cast %17 : vector<128xf32> to vector<1x128xf32>
      %19 = arith.mulf %13, %13 : vector<128x128xf32>
      %cst_11 = arith.constant dense<0.000000e+00> : vector<128xf32>
      %20 = vector.multi_reduction <add>, %19, %cst_11 [0] : vector<128x128xf32> to vector<128xf32>
      %21 = vector.shape_cast %20 : vector<128xf32> to vector<1x128xf32>
      %22 = tpu.concatenate %18, %21 in 0 : vector<1x128xf32>, vector<1x128xf32> -> vector<2x128xf32>
      %23 = arith.addf %16, %22 : vector<2x128xf32>
      %c0_12 = arith.constant 0 : index
      %c0_13 = arith.constant 0 : index
      %24 = vector.load %arg6[%c0_12, %c0_13] : memref<2x128xf32, #tpu.memory_space<vmem>>, vector<2x128xf32>
      tpu.vector_store %arg6[%c0_12, %c0_13], %23 {strides = array<i32>} : memref<2x128xf32, #tpu.memory_space<vmem>>, vector<2x128xf32>,
    } else {
    }
    %c1_i32 = arith.constant 1 : i32
    %5 = arith.cmpi eq, %arg0, %c1_i32 : i32
    %6 = arith.extui %5 : i1 to i32
    %c0_i32_1 = arith.constant 0 : i32
    %7 = arith.cmpi ne, %6, %c0_i32_1 : i32
    scf.if %7 {
      %8 = arith.index_cast %1 : i32 to index
      %c0 = arith.constant 0 : index
      %9 = vector.load %arg5[%8, %c0] : memref<128x128xf32, #tpu.memory_space<vmem>>, vector<128x128xf32>
      %c0_2 = arith.constant 0 : index
      %c0_3 = arith.constant 0 : index
      %10 = vector.load %arg6[%c0_2, %c0_3] : memref<2x128xf32, #tpu.memory_space<vmem>>, vector<1x128xf32>
      %cst = arith.constant 7.812500e-03 : f32
      %11 = vector.broadcast %cst : f32 to vector<1x128xf32>
      %12 = arith.mulf %10, %11 : vector<1x128xf32>
      %c1 = arith.constant 1 : index
      %c0_4 = arith.constant 0 : index
      %13 = vector.load %arg6[%c1, %c0_4] : memref<2x128xf32, #tpu.memory_space<vmem>>, vector<1x128xf32>
      %cst_5 = arith.constant 7.812500e-03 : f32
      %14 = vector.broadcast %cst_5 : f32 to vector<1x128xf32>
      %15 = arith.mulf %13, %14 : vector<1x128xf32>
      %16 = arith.mulf %12, %12 : vector<1x128xf32>
      %17 = arith.subf %15, %16 : vector<1x128xf32>
      %cst_6 = arith.constant 0.000000e+00 : f32
      %18 = vector.broadcast %cst_6 : f32 to vector<1x128xf32>
      %19 = arith.maximumf %17, %18 : vector<1x128xf32>
      %20 = vector.broadcast %12 : vector<1x128xf32> to vector<128x128xf32>
      %21 = arith.subf %9, %20 : vector<128x128xf32>
      %cst_7 = arith.constant 9.99999974E-6 : f32
      %22 = vector.broadcast %cst_7 : f32 to vector<1x128xf32>
      %23 = arith.addf %19, %22 : vector<1x128xf32>
      %24 = math.rsqrt %23 : vector<1x128xf32>
      %25 = vector.broadcast %24 : vector<1x128xf32> to vector<128x128xf32>
      %26 = arith.mulf %21, %25 : vector<128x128xf32>
      %cst_8 = arith.constant 0.000000e+00 : f32
      %27 = vector.broadcast %cst_8 : f32 to vector<128x128xf32>
      %28 = arith.maximumf %26, %27 : vector<128x128xf32>
      %29 = tpu.iota {dimensions = array<i32: 0>} : vector<128x1xi32>
      %30 = vector.broadcast %1 : i32 to vector<128x1xi32>
      %31 = arith.addi %30, %29 : vector<128x1xi32>
      %c128_i32_9 = arith.constant 128 : i32
      %32 = vector.broadcast %c128_i32_9 : i32 to vector<128x1xi32>
      %33 = arith.cmpi slt, %31, %32 : vector<128x1xi32>
      %cst_10 = arith.constant 0.000000e+00 : f32
      %34 = vector.shape_cast %33 : vector<128x1xi1> to vector<128x1xi1>
      %35 = vector.broadcast %34 : vector<128x1xi1> to vector<128x128xi1>
      %36 = vector.broadcast %cst_10 : f32 to vector<128x128xf32>
      %37 = arith.select %35, %28, %36 : vector<128x128xi1>, vector<128x128xf32>
      %38 = arith.truncf %37 : vector<128x128xf32> to vector<128x128xbf16>
      %c0_11 = arith.constant 0 : index
      %c0_12 = arith.constant 0 : index
      %39 = vector.load %arg4[%c0_11, %c0_12] : memref<128x128xbf16, #tpu.memory_space<vmem>>, vector<128x128xbf16>
      tpu.vector_store %arg4[%c0_11, %c0_12], %38 {strides = array<i32>} : memref<128x128xbf16, #tpu.memory_space<vmem>>, vector<128x128xbf16>,
    } else {
    }
    return
  }
  func.func @transform_0(%arg0: i32, %arg1: i32) -> (i32, i32) {
    %c1_i32 = arith.constant 1 : i32
    %0 = arith.subi %c1_i32, %arg0 : i32
    %1 = arith.muli %arg1, %0 : i32
    %c0_i32 = arith.constant 0 : i32
    %c0_i32_0 = arith.constant 0 : i32
    return %1, %c0_i32 : i32, i32
  }
  func.func @transform_1(%arg0: i32, %arg1: i32) -> (i32, i32) {
    %c0_i32 = arith.constant 0 : i32
    %c0_i32_0 = arith.constant 0 : i32
    %c0_i32_1 = arith.constant 0 : i32
    return %c0_i32, %c0_i32_0 : i32, i32
  }
  func.func @transform_2(%arg0: i32, %arg1: i32) -> (i32, i32) {
    %0 = arith.muli %arg1, %arg0 : i32
    %c0_i32 = arith.constant 0 : i32
    %c0_i32_0 = arith.constant 0 : i32
    return %0, %c0_i32 : i32, i32
  }
}

module attributes {stable_mosaic.version = 11 : i64} {
  func.func @_fused_conv_bn_kernel(%arg0: i32, %arg1: i32, %arg2: memref<128x72xbf16, #tpu.memory_space<vmem>>, %arg3: memref<72x128xbf16, #tpu.memory_space<vmem>>, %arg4: memref<128x128xbf16, #tpu.memory_space<vmem>>, %arg5: memref<128x128xf32, #tpu.memory_space<vmem>>, %arg6: memref<2x128xf32, #tpu.memory_space<vmem>>) attributes {dimension_semantics = [#tpu.dimension_semantics<arbitrary>, #tpu.dimension_semantics<arbitrary>], iteration_bounds = array<i64: 2, 1>, scalar_prefetch = 0 : i64, scratch_operands = 2 : i64, tpu.core_type = #tpu.core_type<tc>, window_params = [{transform_indices = @transform_0, window_bounds = array<i64: 128, 72>}, {pipeline_mode = #tpu.pipeline_mode<synchronous>, transform_indices = @transform_1, window_bounds = array<i64: 72, 128>}, {transform_indices = @transform_2, window_bounds = array<i64: 128, 128>}]} {
    %c128_i32 = arith.constant 128 : i32
    %0 = arith.muli %arg1, %c128_i32 : i32
    %1 = tpu.assume_multiple %0, 8 : i32
    %c0_i32 = arith.constant 0 : i32
    %2 = arith.cmpi eq, %arg0, %c0_i32 : i32
    %3 = arith.extui %2 : i1 to i32
    %c0_i32_0 = arith.constant 0 : i32
    %4 = arith.cmpi ne, %3, %c0_i32_0 : i32
    scf.if %4 {
      %c0_i32_2 = arith.constant 0 : i32
      %8 = arith.cmpi eq, %arg1, %c0_i32_2 : i32
      %9 = arith.extui %8 : i1 to i32
      %c0_i32_3 = arith.constant 0 : i32
      %10 = arith.cmpi ne, %9, %c0_i32_3 : i32
      scf.if %10 {
        %cst_14 = arith.constant 0.000000e+00 : f32
        %25 = vector.broadcast %cst_14 : f32 to vector<2x128xf32>
        %c0_15 = arith.constant 0 : index
        %c0_16 = arith.constant 0 : index
        %26 = vector.load %arg6[%c0_15, %c0_16] : memref<2x128xf32, #tpu.memory_space<vmem>>, vector<2x128xf32>
        tpu.vector_store %arg6[%c0_15, %c0_16], %25 {strides = array<i32>} : memref<2x128xf32, #tpu.memory_space<vmem>>, vector<2x128xf32>,
      } else {
      }
      %c0 = arith.constant 0 : index
      %c0_4 = arith.constant 0 : index
      %11 = vector.load %arg2[%c0, %c0_4] : memref<128x72xbf16, #tpu.memory_space<vmem>>, vector<128x72xbf16>
      %c0_5 = arith.constant 0 : index
      %c0_6 = arith.constant 0 : index
      %12 = vector.load %arg3[%c0_5, %c0_6] : memref<72x128xbf16, #tpu.memory_space<vmem>>, vector<72x128xbf16>
      %cst = arith.constant dense<0.000000e+00> : vector<128x128xf32>
      %13 = tpu.matmul %11, %12, %cst {dimension_numbers = #tpu.dot_dimension_numbers<[1], [0], [0], [1], [0, 0, 1, 1], [], []>} : vector<128x72xbf16>, vector<72x128xbf16>, vector<128x128xf32> -> vector<128x128xf32>
      %14 = arith.index_cast %1 : i32 to index
      %c0_7 = arith.constant 0 : index
      %15 = vector.load %arg5[%14, %c0_7] : memref<128x128xf32, #tpu.memory_space<vmem>>, vector<128x128xf32>
      tpu.vector_store %arg5[%14, %c0_7], %13 {strides = array<i32>} : memref<128x128xf32, #tpu.memory_space<vmem>>, vector<128x128xf32>,
      %c0_8 = arith.constant 0 : index
      %c0_9 = arith.constant 0 : index
      %16 = vector.load %arg6[%c0_8, %c0_9] : memref<2x128xf32, #tpu.memory_space<vmem>>, vector<2x128xf32>
      %cst_10 = arith.constant dense<0.000000e+00> : vector<128xf32>
      %17 = vector.multi_reduction <add>, %13, %cst_10 [0] : vector<128x128xf32> to vector<128xf32>
      %18 = vector.shape_cast %17 : vector<128xf32> to vector<1x128xf32>
      %19 = arith.mulf %13, %13 : vector<128x128xf32>
      %cst_11 = arith.constant dense<0.000000e+00> : vector<128xf32>
      %20 = vector.multi_reduction <add>, %19, %cst_11 [0] : vector<128x128xf32> to vector<128xf32>
      %21 = vector.shape_cast %20 : vector<128xf32> to vector<1x128xf32>
      %22 = tpu.concatenate %18, %21 in 0 : vector<1x128xf32>, vector<1x128xf32> -> vector<2x128xf32>
      %23 = arith.addf %16, %22 : vector<2x128xf32>
      %c0_12 = arith.constant 0 : index
      %c0_13 = arith.constant 0 : index
      %24 = vector.load %arg6[%c0_12, %c0_13] : memref<2x128xf32, #tpu.memory_space<vmem>>, vector<2x128xf32>
      tpu.vector_store %arg6[%c0_12, %c0_13], %23 {strides = array<i32>} : memref<2x128xf32, #tpu.memory_space<vmem>>, vector<2x128xf32>,
    } else {
    }
    %c1_i32 = arith.constant 1 : i32
    %5 = arith.cmpi eq, %arg0, %c1_i32 : i32
    %6 = arith.extui %5 : i1 to i32
    %c0_i32_1 = arith.constant 0 : i32
    %7 = arith.cmpi ne, %6, %c0_i32_1 : i32
    scf.if %7 {
      %8 = arith.index_cast %1 : i32 to index
      %c0 = arith.constant 0 : index
      %9 = vector.load %arg5[%8, %c0] : memref<128x128xf32, #tpu.memory_space<vmem>>, vector<128x128xf32>
      %c0_2 = arith.constant 0 : index
      %c0_3 = arith.constant 0 : index
      %10 = vector.load %arg6[%c0_2, %c0_3] : memref<2x128xf32, #tpu.memory_space<vmem>>, vector<1x128xf32>
      %cst = arith.constant 7.812500e-03 : f32
      %11 = vector.broadcast %cst : f32 to vector<1x128xf32>
      %12 = arith.mulf %10, %11 : vector<1x128xf32>
      %c1 = arith.constant 1 : index
      %c0_4 = arith.constant 0 : index
      %13 = vector.load %arg6[%c1, %c0_4] : memref<2x128xf32, #tpu.memory_space<vmem>>, vector<1x128xf32>
      %cst_5 = arith.constant 7.812500e-03 : f32
      %14 = vector.broadcast %cst_5 : f32 to vector<1x128xf32>
      %15 = arith.mulf %13, %14 : vector<1x128xf32>
      %16 = arith.mulf %12, %12 : vector<1x128xf32>
      %17 = arith.subf %15, %16 : vector<1x128xf32>
      %cst_6 = arith.constant 0.000000e+00 : f32
      %18 = vector.broadcast %cst_6 : f32 to vector<1x128xf32>
      %19 = arith.maximumf %17, %18 : vector<1x128xf32>
      %20 = vector.broadcast %12 : vector<1x128xf32> to vector<128x128xf32>
      %21 = arith.subf %9, %20 : vector<128x128xf32>
      %cst_7 = arith.constant 9.99999974E-6 : f32
      %22 = vector.broadcast %cst_7 : f32 to vector<1x128xf32>
      %23 = arith.addf %19, %22 : vector<1x128xf32>
      %24 = math.rsqrt %23 : vector<1x128xf32>
      %25 = vector.broadcast %24 : vector<1x128xf32> to vector<128x128xf32>
      %26 = arith.mulf %21, %25 : vector<128x128xf32>
      %cst_8 = arith.constant 0.000000e+00 : f32
      %27 = vector.broadcast %cst_8 : f32 to vector<128x128xf32>
      %28 = arith.maximumf %26, %27 : vector<128x128xf32>
      %29 = tpu.iota {dimensions = array<i32: 0>} : vector<128x1xi32>
      %30 = vector.broadcast %1 : i32 to vector<128x1xi32>
      %31 = arith.addi %30, %29 : vector<128x1xi32>
      %c128_i32_9 = arith.constant 128 : i32
      %32 = vector.broadcast %c128_i32_9 : i32 to vector<128x1xi32>
      %33 = arith.cmpi slt, %31, %32 : vector<128x1xi32>
      %cst_10 = arith.constant 0.000000e+00 : f32
      %34 = vector.shape_cast %33 : vector<128x1xi1> to vector<128x1xi1>
      %35 = vector.broadcast %34 : vector<128x1xi1> to vector<128x128xi1>
      %36 = vector.broadcast %cst_10 : f32 to vector<128x128xf32>
      %37 = arith.select %35, %28, %36 : vector<128x128xi1>, vector<128x128xf32>
      %38 = arith.truncf %37 : vector<128x128xf32> to vector<128x128xbf16>
      %c0_11 = arith.constant 0 : index
      %c0_12 = arith.constant 0 : index
      %39 = vector.load %arg4[%c0_11, %c0_12] : memref<128x128xbf16, #tpu.memory_space<vmem>>, vector<128x128xbf16>
      tpu.vector_store %arg4[%c0_11, %c0_12], %38 {strides = array<i32>} : memref<128x128xbf16, #tpu.memory_space<vmem>>, vector<128x128xbf16>,
    } else {
    }
    return
  }
  func.func @transform_0(%arg0: i32, %arg1: i32) -> (i32, i32) {
    %c1_i32 = arith.constant 1 : i32
    %0 = arith.subi %c1_i32, %arg0 : i32
    %1 = arith.muli %arg1, %0 : i32
    %c0_i32 = arith.constant 0 : i32
    %c0_i32_0 = arith.constant 0 : i32
    return %1, %c0_i32 : i32, i32
  }
  func.func @transform_1(%arg0: i32, %arg1: i32) -> (i32, i32) {
    %c0_i32 = arith.constant 0 : i32
    %c0_i32_0 = arith.constant 0 : i32
    %c0_i32_1 = arith.constant 0 : i32
    return %c0_i32, %c0_i32_0 : i32, i32
  }
  func.func @transform_2(%arg0: i32, %arg1: i32) -> (i32, i32) {
    %0 = arith.muli %arg1, %arg0 : i32
    %c0_i32 = arith.constant 0 : i32
    %c0_i32_0 = arith.constant 0 : i32
    return %0, %c0_i32 : i32, i32
  }
}

module attributes {stable_mosaic.version = 11 : i64} {
  func.func @_fused_conv_bn_kernel(%arg0: i32, %arg1: i32, %arg2: memref<128x128xbf16, #tpu.memory_space<vmem>>, %arg3: memref<128x128xbf16, #tpu.memory_space<vmem>>, %arg4: memref<128x128xbf16, #tpu.memory_space<vmem>>, %arg5: memref<128x128xbf16, #tpu.memory_space<vmem>>, %arg6: memref<128x128xf32, #tpu.memory_space<vmem>>, %arg7: memref<2x128xf32, #tpu.memory_space<vmem>>) attributes {dimension_semantics = [#tpu.dimension_semantics<arbitrary>, #tpu.dimension_semantics<arbitrary>], iteration_bounds = array<i64: 2, 1>, scalar_prefetch = 0 : i64, scratch_operands = 2 : i64, tpu.core_type = #tpu.core_type<tc>, window_params = [{transform_indices = @transform_0, window_bounds = array<i64: 128, 128>}, {pipeline_mode = #tpu.pipeline_mode<synchronous>, transform_indices = @transform_1, window_bounds = array<i64: 128, 128>}, {transform_indices = @transform_2, window_bounds = array<i64: 128, 128>}, {transform_indices = @transform_3, window_bounds = array<i64: 128, 128>}]} {
    %c128_i32 = arith.constant 128 : i32
    %0 = arith.muli %arg1, %c128_i32 : i32
    %1 = tpu.assume_multiple %0, 8 : i32
    %c0_i32 = arith.constant 0 : i32
    %2 = arith.cmpi eq, %arg0, %c0_i32 : i32
    %3 = arith.extui %2 : i1 to i32
    %c0_i32_0 = arith.constant 0 : i32
    %4 = arith.cmpi ne, %3, %c0_i32_0 : i32
    scf.if %4 {
      %c0_i32_2 = arith.constant 0 : i32
      %8 = arith.cmpi eq, %arg1, %c0_i32_2 : i32
      %9 = arith.extui %8 : i1 to i32
      %c0_i32_3 = arith.constant 0 : i32
      %10 = arith.cmpi ne, %9, %c0_i32_3 : i32
      scf.if %10 {
        %cst_14 = arith.constant 0.000000e+00 : f32
        %25 = vector.broadcast %cst_14 : f32 to vector<2x128xf32>
        %c0_15 = arith.constant 0 : index
        %c0_16 = arith.constant 0 : index
        %26 = vector.load %arg7[%c0_15, %c0_16] : memref<2x128xf32, #tpu.memory_space<vmem>>, vector<2x128xf32>
        tpu.vector_store %arg7[%c0_15, %c0_16], %25 {strides = array<i32>} : memref<2x128xf32, #tpu.memory_space<vmem>>, vector<2x128xf32>,
      } else {
      }
      %c0 = arith.constant 0 : index
      %c0_4 = arith.constant 0 : index
      %11 = vector.load %arg2[%c0, %c0_4] : memref<128x128xbf16, #tpu.memory_space<vmem>>, vector<128x128xbf16>
      %c0_5 = arith.constant 0 : index
      %c0_6 = arith.constant 0 : index
      %12 = vector.load %arg3[%c0_5, %c0_6] : memref<128x128xbf16, #tpu.memory_space<vmem>>, vector<128x128xbf16>
      %cst = arith.constant dense<0.000000e+00> : vector<128x128xf32>
      %13 = tpu.matmul %11, %12, %cst {dimension_numbers = #tpu.dot_dimension_numbers<[1], [0], [0], [1], [0, 0, 1, 1], [], []>} : vector<128x128xbf16>, vector<128x128xbf16>, vector<128x128xf32> -> vector<128x128xf32>
      %14 = arith.index_cast %1 : i32 to index
      %c0_7 = arith.constant 0 : index
      %15 = vector.load %arg6[%14, %c0_7] : memref<128x128xf32, #tpu.memory_space<vmem>>, vector<128x128xf32>
      tpu.vector_store %arg6[%14, %c0_7], %13 {strides = array<i32>} : memref<128x128xf32, #tpu.memory_space<vmem>>, vector<128x128xf32>,
      %c0_8 = arith.constant 0 : index
      %c0_9 = arith.constant 0 : index
      %16 = vector.load %arg7[%c0_8, %c0_9] : memref<2x128xf32, #tpu.memory_space<vmem>>, vector<2x128xf32>
      %cst_10 = arith.constant dense<0.000000e+00> : vector<128xf32>
      %17 = vector.multi_reduction <add>, %13, %cst_10 [0] : vector<128x128xf32> to vector<128xf32>
      %18 = vector.shape_cast %17 : vector<128xf32> to vector<1x128xf32>
      %19 = arith.mulf %13, %13 : vector<128x128xf32>
      %cst_11 = arith.constant dense<0.000000e+00> : vector<128xf32>
      %20 = vector.multi_reduction <add>, %19, %cst_11 [0] : vector<128x128xf32> to vector<128xf32>
      %21 = vector.shape_cast %20 : vector<128xf32> to vector<1x128xf32>
      %22 = tpu.concatenate %18, %21 in 0 : vector<1x128xf32>, vector<1x128xf32> -> vector<2x128xf32>
      %23 = arith.addf %16, %22 : vector<2x128xf32>
      %c0_12 = arith.constant 0 : index
      %c0_13 = arith.constant 0 : index
      %24 = vector.load %arg7[%c0_12, %c0_13] : memref<2x128xf32, #tpu.memory_space<vmem>>, vector<2x128xf32>
      tpu.vector_store %arg7[%c0_12, %c0_13], %23 {strides = array<i32>} : memref<2x128xf32, #tpu.memory_space<vmem>>, vector<2x128xf32>,
    } else {
    }
    %c1_i32 = arith.constant 1 : i32
    %5 = arith.cmpi eq, %arg0, %c1_i32 : i32
    %6 = arith.extui %5 : i1 to i32
    %c0_i32_1 = arith.constant 0 : i32
    %7 = arith.cmpi ne, %6, %c0_i32_1 : i32
    scf.if %7 {
      %8 = arith.index_cast %1 : i32 to index
      %c0 = arith.constant 0 : index
      %9 = vector.load %arg6[%8, %c0] : memref<128x128xf32, #tpu.memory_space<vmem>>, vector<128x128xf32>
      %c0_2 = arith.constant 0 : index
      %c0_3 = arith.constant 0 : index
      %10 = vector.load %arg7[%c0_2, %c0_3] : memref<2x128xf32, #tpu.memory_space<vmem>>, vector<1x128xf32>
      %cst = arith.constant 7.812500e-03 : f32
      %11 = vector.broadcast %cst : f32 to vector<1x128xf32>
      %12 = arith.mulf %10, %11 : vector<1x128xf32>
      %c1 = arith.constant 1 : index
      %c0_4 = arith.constant 0 : index
      %13 = vector.load %arg7[%c1, %c0_4] : memref<2x128xf32, #tpu.memory_space<vmem>>, vector<1x128xf32>
      %cst_5 = arith.constant 7.812500e-03 : f32
      %14 = vector.broadcast %cst_5 : f32 to vector<1x128xf32>
      %15 = arith.mulf %13, %14 : vector<1x128xf32>
      %16 = arith.mulf %12, %12 : vector<1x128xf32>
      %17 = arith.subf %15, %16 : vector<1x128xf32>
      %cst_6 = arith.constant 0.000000e+00 : f32
      %18 = vector.broadcast %cst_6 : f32 to vector<1x128xf32>
      %19 = arith.maximumf %17, %18 : vector<1x128xf32>
      %20 = vector.broadcast %12 : vector<1x128xf32> to vector<128x128xf32>
      %21 = arith.subf %9, %20 : vector<128x128xf32>
      %cst_7 = arith.constant 9.99999974E-6 : f32
      %22 = vector.broadcast %cst_7 : f32 to vector<1x128xf32>
      %23 = arith.addf %19, %22 : vector<1x128xf32>
      %24 = math.rsqrt %23 : vector<1x128xf32>
      %25 = vector.broadcast %24 : vector<1x128xf32> to vector<128x128xf32>
      %26 = arith.mulf %21, %25 : vector<128x128xf32>
      %cst_8 = arith.constant 0.000000e+00 : f32
      %27 = vector.broadcast %cst_8 : f32 to vector<128x128xf32>
      %28 = arith.maximumf %26, %27 : vector<128x128xf32>
      %c0_9 = arith.constant 0 : index
      %c0_10 = arith.constant 0 : index
      %29 = vector.load %arg4[%c0_9, %c0_10] : memref<128x128xbf16, #tpu.memory_space<vmem>>, vector<128x128xbf16>
      %30 = arith.extf %29 : vector<128x128xbf16> to vector<128x128xf32>
      %31 = arith.addf %28, %30 : vector<128x128xf32>
      %cst_11 = arith.constant 0.000000e+00 : f32
      %32 = vector.broadcast %cst_11 : f32 to vector<128x128xf32>
      %33 = arith.maximumf %31, %32 : vector<128x128xf32>
      %34 = tpu.iota {dimensions = array<i32: 0>} : vector<128x1xi32>
      %35 = vector.broadcast %1 : i32 to vector<128x1xi32>
      %36 = arith.addi %35, %34 : vector<128x1xi32>
      %c128_i32_12 = arith.constant 128 : i32
      %37 = vector.broadcast %c128_i32_12 : i32 to vector<128x1xi32>
      %38 = arith.cmpi slt, %36, %37 : vector<128x1xi32>
      %cst_13 = arith.constant 0.000000e+00 : f32
      %39 = vector.shape_cast %38 : vector<128x1xi1> to vector<128x1xi1>
      %40 = vector.broadcast %39 : vector<128x1xi1> to vector<128x128xi1>
      %41 = vector.broadcast %cst_13 : f32 to vector<128x128xf32>
      %42 = arith.select %40, %33, %41 : vector<128x128xi1>, vector<128x128xf32>
      %43 = arith.truncf %42 : vector<128x128xf32> to vector<128x128xbf16>
      %c0_14 = arith.constant 0 : index
      %c0_15 = arith.constant 0 : index
      %44 = vector.load %arg5[%c0_14, %c0_15] : memref<128x128xbf16, #tpu.memory_space<vmem>>, vector<128x128xbf16>
      tpu.vector_store %arg5[%c0_14, %c0_15], %43 {strides = array<i32>} : memref<128x128xbf16, #tpu.memory_space<vmem>>, vector<128x128xbf16>,
    } else {
    }
    return
  }
  func.func @transform_0(%arg0: i32, %arg1: i32) -> (i32, i32) {
    %c1_i32 = arith.constant 1 : i32
    %0 = arith.subi %c1_i32, %arg0 : i32
    %1 = arith.muli %arg1, %0 : i32
    %c0_i32 = arith.constant 0 : i32
    %c0_i32_0 = arith.constant 0 : i32
    return %1, %c0_i32 : i32, i32
  }
  func.func @transform_1(%arg0: i32, %arg1: i32) -> (i32, i32) {
    %c0_i32 = arith.constant 0 : i32
    %c0_i32_0 = arith.constant 0 : i32
    %c0_i32_1 = arith.constant 0 : i32
    return %c0_i32, %c0_i32_0 : i32, i32
  }
  func.func @transform_2(%arg0: i32, %arg1: i32) -> (i32, i32) {
    %0 = arith.muli %arg1, %arg0 : i32
    %c0_i32 = arith.constant 0 : i32
    %c0_i32_0 = arith.constant 0 : i32
    return %0, %c0_i32 : i32, i32
  }
  func.func @transform_3(%arg0: i32, %arg1: i32) -> (i32, i32) {
    %0 = arith.muli %arg1, %arg0 : i32
    %c0_i32 = arith.constant 0 : i32
    %c0_i32_0 = arith.constant 0 : i32
    return %0, %c0_i32 : i32, i32
  }
}

module attributes {stable_mosaic.version = 11 : i64} {
  func.func @_fused_conv_bn_kernel(%arg0: i32, %arg1: i32, %arg2: memref<32x128xbf16, #tpu.memory_space<vmem>>, %arg3: memref<128x128xbf16, #tpu.memory_space<vmem>>, %arg4: memref<32x128xbf16, #tpu.memory_space<vmem>>, %arg5: memref<128x128xbf16, #tpu.memory_space<vmem>>, %arg6: memref<32x128xbf16, #tpu.memory_space<vmem>>, %arg7: memref<32x128xf32, #tpu.memory_space<vmem>>, %arg8: memref<2x128xf32, #tpu.memory_space<vmem>>, %arg9: memref<32x128xf32, #tpu.memory_space<vmem>>, %arg10: memref<2x128xf32, #tpu.memory_space<vmem>>) attributes {dimension_semantics = [#tpu.dimension_semantics<arbitrary>, #tpu.dimension_semantics<arbitrary>], iteration_bounds = array<i64: 2, 1>, scalar_prefetch = 0 : i64, scratch_operands = 4 : i64, tpu.core_type = #tpu.core_type<tc>, window_params = [{transform_indices = @transform_0, window_bounds = array<i64: 32, 128>}, {pipeline_mode = #tpu.pipeline_mode<synchronous>, transform_indices = @transform_1, window_bounds = array<i64: 128, 128>}, {transform_indices = @transform_2, window_bounds = array<i64: 32, 128>}, {pipeline_mode = #tpu.pipeline_mode<synchronous>, transform_indices = @transform_3, window_bounds = array<i64: 128, 128>}, {transform_indices = @transform_4, window_bounds = array<i64: 32, 128>}]} {
    %c32_i32 = arith.constant 32 : i32
    %0 = arith.muli %arg1, %c32_i32 : i32
    %1 = tpu.assume_multiple %0, 8 : i32
    %c0_i32 = arith.constant 0 : i32
    %2 = arith.cmpi eq, %arg0, %c0_i32 : i32
    %3 = arith.extui %2 : i1 to i32
    %c0_i32_0 = arith.constant 0 : i32
    %4 = arith.cmpi ne, %3, %c0_i32_0 : i32
    scf.if %4 {
      %c0_i32_2 = arith.constant 0 : i32
      %8 = arith.cmpi eq, %arg1, %c0_i32_2 : i32
      %9 = arith.extui %8 : i1 to i32
      %c0_i32_3 = arith.constant 0 : i32
      %10 = arith.cmpi ne, %9, %c0_i32_3 : i32
      scf.if %10 {
        %cst_26 = arith.constant 0.000000e+00 : f32
        %39 = vector.broadcast %cst_26 : f32 to vector<2x128xf32>
        %c0_27 = arith.constant 0 : index
        %c0_28 = arith.constant 0 : index
        %40 = vector.load %arg8[%c0_27, %c0_28] : memref<2x128xf32, #tpu.memory_space<vmem>>, vector<2x128xf32>
        tpu.vector_store %arg8[%c0_27, %c0_28], %39 {strides = array<i32>} : memref<2x128xf32, #tpu.memory_space<vmem>>, vector<2x128xf32>,
        %cst_29 = arith.constant 0.000000e+00 : f32
        %41 = vector.broadcast %cst_29 : f32 to vector<2x128xf32>
        %c0_30 = arith.constant 0 : index
        %c0_31 = arith.constant 0 : index
        %42 = vector.load %arg10[%c0_30, %c0_31] : memref<2x128xf32, #tpu.memory_space<vmem>>, vector<2x128xf32>
        tpu.vector_store %arg10[%c0_30, %c0_31], %41 {strides = array<i32>} : memref<2x128xf32, #tpu.memory_space<vmem>>, vector<2x128xf32>,
      } else {
      }
      %c0 = arith.constant 0 : index
      %c0_4 = arith.constant 0 : index
      %11 = vector.load %arg2[%c0, %c0_4] : memref<32x128xbf16, #tpu.memory_space<vmem>>, vector<32x128xbf16>
      %c0_5 = arith.constant 0 : index
      %c0_6 = arith.constant 0 : index
      %12 = vector.load %arg3[%c0_5, %c0_6] : memref<128x128xbf16, #tpu.memory_space<vmem>>, vector<128x128xbf16>
      %cst = arith.constant dense<0.000000e+00> : vector<32x128xf32>
      %13 = tpu.matmul %11, %12, %cst {dimension_numbers = #tpu.dot_dimension_numbers<[1], [0], [0], [1], [0, 0, 1, 1], [], []>} : vector<32x128xbf16>, vector<128x128xbf16>, vector<32x128xf32> -> vector<32x128xf32>
      %14 = arith.index_cast %1 : i32 to index
      %c0_7 = arith.constant 0 : index
      %15 = vector.load %arg7[%14, %c0_7] : memref<32x128xf32, #tpu.memory_space<vmem>>, vector<32x128xf32>
      tpu.vector_store %arg7[%14, %c0_7], %13 {strides = array<i32>} : memref<32x128xf32, #tpu.memory_space<vmem>>, vector<32x128xf32>,
      %c0_8 = arith.constant 0 : index
      %c0_9 = arith.constant 0 : index
      %16 = vector.load %arg8[%c0_8, %c0_9] : memref<2x128xf32, #tpu.memory_space<vmem>>, vector<2x128xf32>
      %cst_10 = arith.constant dense<0.000000e+00> : vector<128xf32>
      %17 = vector.multi_reduction <add>, %13, %cst_10 [0] : vector<32x128xf32> to vector<128xf32>
      %18 = vector.shape_cast %17 : vector<128xf32> to vector<1x128xf32>
      %19 = arith.mulf %13, %13 : vector<32x128xf32>
      %cst_11 = arith.constant dense<0.000000e+00> : vector<128xf32>
      %20 = vector.multi_reduction <add>, %19, %cst_11 [0] : vector<32x128xf32> to vector<128xf32>
      %21 = vector.shape_cast %20 : vector<128xf32> to vector<1x128xf32>
      %22 = tpu.concatenate %18, %21 in 0 : vector<1x128xf32>, vector<1x128xf32> -> vector<2x128xf32>
      %23 = arith.addf %16, %22 : vector<2x128xf32>
      %c0_12 = arith.constant 0 : index
      %c0_13 = arith.constant 0 : index
      %24 = vector.load %arg8[%c0_12, %c0_13] : memref<2x128xf32, #tpu.memory_space<vmem>>, vector<2x128xf32>
      tpu.vector_store %arg8[%c0_12, %c0_13], %23 {strides = array<i32>} : memref<2x128xf32, #tpu.memory_space<vmem>>, vector<2x128xf32>,
      %c0_14 = arith.constant 0 : index
      %c0_15 = arith.constant 0 : index
      %25 = vector.load %arg4[%c0_14, %c0_15] : memref<32x128xbf16, #tpu.memory_space<vmem>>, vector<32x128xbf16>
      %c0_16 = arith.constant 0 : index
      %c0_17 = arith.constant 0 : index
      %26 = vector.load %arg5[%c0_16, %c0_17] : memref<128x128xbf16, #tpu.memory_space<vmem>>, vector<128x128xbf16>
      %cst_18 = arith.constant dense<0.000000e+00> : vector<32x128xf32>
      %27 = tpu.matmul %25, %26, %cst_18 {dimension_numbers = #tpu.dot_dimension_numbers<[1], [0], [0], [1], [0, 0, 1, 1], [], []>} : vector<32x128xbf16>, vector<128x128xbf16>, vector<32x128xf32> -> vector<32x128xf32>
      %28 = arith.index_cast %1 : i32 to index
      %c0_19 = arith.constant 0 : index
      %29 = vector.load %arg9[%28, %c0_19] : memref<32x128xf32, #tpu.memory_space<vmem>>, vector<32x128xf32>
      tpu.vector_store %arg9[%28, %c0_19], %27 {strides = array<i32>} : memref<32x128xf32, #tpu.memory_space<vmem>>, vector<32x128xf32>,
      %c0_20 = arith.constant 0 : index
      %c0_21 = arith.constant 0 : index
      %30 = vector.load %arg10[%c0_20, %c0_21] : memref<2x128xf32, #tpu.memory_space<vmem>>, vector<2x128xf32>
      %cst_22 = arith.constant dense<0.000000e+00> : vector<128xf32>
      %31 = vector.multi_reduction <add>, %27, %cst_22 [0] : vector<32x128xf32> to vector<128xf32>
      %32 = vector.shape_cast %31 : vector<128xf32> to vector<1x128xf32>
      %33 = arith.mulf %27, %27 : vector<32x128xf32>
      %cst_23 = arith.constant dense<0.000000e+00> : vector<128xf32>
      %34 = vector.multi_reduction <add>, %33, %cst_23 [0] : vector<32x128xf32> to vector<128xf32>
      %35 = vector.shape_cast %34 : vector<128xf32> to vector<1x128xf32>
      %36 = tpu.concatenate %32, %35 in 0 : vector<1x128xf32>, vector<1x128xf32> -> vector<2x128xf32>
      %37 = arith.addf %30, %36 : vector<2x128xf32>
      %c0_24 = arith.constant 0 : index
      %c0_25 = arith.constant 0 : index
      %38 = vector.load %arg10[%c0_24, %c0_25] : memref<2x128xf32, #tpu.memory_space<vmem>>, vector<2x128xf32>
      tpu.vector_store %arg10[%c0_24, %c0_25], %37 {strides = array<i32>} : memref<2x128xf32, #tpu.memory_space<vmem>>, vector<2x128xf32>,
    } else {
    }
    %c1_i32 = arith.constant 1 : i32
    %5 = arith.cmpi eq, %arg0, %c1_i32 : i32
    %6 = arith.extui %5 : i1 to i32
    %c0_i32_1 = arith.constant 0 : i32
    %7 = arith.cmpi ne, %6, %c0_i32_1 : i32
    scf.if %7 {
      %8 = arith.index_cast %1 : i32 to index
      %c0 = arith.constant 0 : index
      %9 = vector.load %arg7[%8, %c0] : memref<32x128xf32, #tpu.memory_space<vmem>>, vector<32x128xf32>
      %c0_2 = arith.constant 0 : index
      %c0_3 = arith.constant 0 : index
      %10 = vector.load %arg8[%c0_2, %c0_3] : memref<2x128xf32, #tpu.memory_space<vmem>>, vector<1x128xf32>
      %cst = arith.constant 3.125000e-02 : f32
      %11 = vector.broadcast %cst : f32 to vector<1x128xf32>
      %12 = arith.mulf %10, %11 : vector<1x128xf32>
      %c1 = arith.constant 1 : index
      %c0_4 = arith.constant 0 : index
      %13 = vector.load %arg8[%c1, %c0_4] : memref<2x128xf32, #tpu.memory_space<vmem>>, vector<1x128xf32>
      %cst_5 = arith.constant 3.125000e-02 : f32
      %14 = vector.broadcast %cst_5 : f32 to vector<1x128xf32>
      %15 = arith.mulf %13, %14 : vector<1x128xf32>
      %16 = arith.mulf %12, %12 : vector<1x128xf32>
      %17 = arith.subf %15, %16 : vector<1x128xf32>
      %cst_6 = arith.constant 0.000000e+00 : f32
      %18 = vector.broadcast %cst_6 : f32 to vector<1x128xf32>
      %19 = arith.maximumf %17, %18 : vector<1x128xf32>
      %20 = vector.broadcast %12 : vector<1x128xf32> to vector<32x128xf32>
      %21 = arith.subf %9, %20 : vector<32x128xf32>
      %cst_7 = arith.constant 9.99999974E-6 : f32
      %22 = vector.broadcast %cst_7 : f32 to vector<1x128xf32>
      %23 = arith.addf %19, %22 : vector<1x128xf32>
      %24 = math.rsqrt %23 : vector<1x128xf32>
      %25 = vector.broadcast %24 : vector<1x128xf32> to vector<32x128xf32>
      %26 = arith.mulf %21, %25 : vector<32x128xf32>
      %cst_8 = arith.constant 0.000000e+00 : f32
      %27 = vector.broadcast %cst_8 : f32 to vector<32x128xf32>
      %28 = arith.maximumf %26, %27 : vector<32x128xf32>
      %29 = arith.index_cast %1 : i32 to index
      %c0_9 = arith.constant 0 : index
      %30 = vector.load %arg9[%29, %c0_9] : memref<32x128xf32, #tpu.memory_space<vmem>>, vector<32x128xf32>
      %c0_10 = arith.constant 0 : index
      %c0_11 = arith.constant 0 : index
      %31 = vector.load %arg10[%c0_10, %c0_11] : memref<2x128xf32, #tpu.memory_space<vmem>>, vector<1x128xf32>
      %cst_12 = arith.constant 3.125000e-02 : f32
      %32 = vector.broadcast %cst_12 : f32 to vector<1x128xf32>
      %33 = arith.mulf %31, %32 : vector<1x128xf32>
      %c1_13 = arith.constant 1 : index
      %c0_14 = arith.constant 0 : index
      %34 = vector.load %arg10[%c1_13, %c0_14] : memref<2x128xf32, #tpu.memory_space<vmem>>, vector<1x128xf32>
      %cst_15 = arith.constant 3.125000e-02 : f32
      %35 = vector.broadcast %cst_15 : f32 to vector<1x128xf32>
      %36 = arith.mulf %34, %35 : vector<1x128xf32>
      %37 = arith.mulf %33, %33 : vector<1x128xf32>
      %38 = arith.subf %36, %37 : vector<1x128xf32>
      %cst_16 = arith.constant 0.000000e+00 : f32
      %39 = vector.broadcast %cst_16 : f32 to vector<1x128xf32>
      %40 = arith.maximumf %38, %39 : vector<1x128xf32>
      %41 = vector.broadcast %33 : vector<1x128xf32> to vector<32x128xf32>
      %42 = arith.subf %30, %41 : vector<32x128xf32>
      %cst_17 = arith.constant 9.99999974E-6 : f32
      %43 = vector.broadcast %cst_17 : f32 to vector<1x128xf32>
      %44 = arith.addf %40, %43 : vector<1x128xf32>
      %45 = math.rsqrt %44 : vector<1x128xf32>
      %46 = vector.broadcast %45 : vector<1x128xf32> to vector<32x128xf32>
      %47 = arith.mulf %42, %46 : vector<32x128xf32>
      %48 = arith.addf %28, %47 : vector<32x128xf32>
      %cst_18 = arith.constant 0.000000e+00 : f32
      %49 = vector.broadcast %cst_18 : f32 to vector<32x128xf32>
      %50 = arith.maximumf %48, %49 : vector<32x128xf32>
      %51 = tpu.iota {dimensions = array<i32: 0>} : vector<32x1xi32>
      %52 = vector.broadcast %1 : i32 to vector<32x1xi32>
      %53 = arith.addi %52, %51 : vector<32x1xi32>
      %c32_i32_19 = arith.constant 32 : i32
      %54 = vector.broadcast %c32_i32_19 : i32 to vector<32x1xi32>
      %55 = arith.cmpi slt, %53, %54 : vector<32x1xi32>
      %cst_20 = arith.constant 0.000000e+00 : f32
      %56 = vector.shape_cast %55 : vector<32x1xi1> to vector<32x1xi1>
      %57 = vector.broadcast %56 : vector<32x1xi1> to vector<32x128xi1>
      %58 = vector.broadcast %cst_20 : f32 to vector<32x128xf32>
      %59 = arith.select %57, %50, %58 : vector<32x128xi1>, vector<32x128xf32>
      %60 = arith.truncf %59 : vector<32x128xf32> to vector<32x128xbf16>
      %c0_21 = arith.constant 0 : index
      %c0_22 = arith.constant 0 : index
      %61 = vector.load %arg6[%c0_21, %c0_22] : memref<32x128xbf16, #tpu.memory_space<vmem>>, vector<32x128xbf16>
      tpu.vector_store %arg6[%c0_21, %c0_22], %60 {strides = array<i32>} : memref<32x128xbf16, #tpu.memory_space<vmem>>, vector<32x128xbf16>,
    } else {
    }
    return
  }
  func.func @transform_0(%arg0: i32, %arg1: i32) -> (i32, i32) {
    %c1_i32 = arith.constant 1 : i32
    %0 = arith.subi %c1_i32, %arg0 : i32
    %1 = arith.muli %arg1, %0 : i32
    %c0_i32 = arith.constant 0 : i32
    %c0_i32_0 = arith.constant 0 : i32
    return %1, %c0_i32 : i32, i32
  }
  func.func @transform_1(%arg0: i32, %arg1: i32) -> (i32, i32) {
    %c0_i32 = arith.constant 0 : i32
    %c0_i32_0 = arith.constant 0 : i32
    %c0_i32_1 = arith.constant 0 : i32
    return %c0_i32, %c0_i32_0 : i32, i32
  }
  func.func @transform_2(%arg0: i32, %arg1: i32) -> (i32, i32) {
    %c1_i32 = arith.constant 1 : i32
    %0 = arith.subi %c1_i32, %arg0 : i32
    %1 = arith.muli %arg1, %0 : i32
    %c0_i32 = arith.constant 0 : i32
    %c0_i32_0 = arith.constant 0 : i32
    return %1, %c0_i32 : i32, i32
  }
  func.func @transform_3(%arg0: i32, %arg1: i32) -> (i32, i32) {
    %c0_i32 = arith.constant 0 : i32
    %c0_i32_0 = arith.constant 0 : i32
    %c0_i32_1 = arith.constant 0 : i32
    return %c0_i32, %c0_i32_0 : i32, i32
  }
  func.func @transform_4(%arg0: i32, %arg1: i32) -> (i32, i32) {
    %0 = arith.muli %arg1, %arg0 : i32
    %c0_i32 = arith.constant 0 : i32
    %c0_i32_0 = arith.constant 0 : i32
    return %0, %c0_i32 : i32, i32
  }
}

module attributes {stable_mosaic.version = 11 : i64} {
  func.func @_fused_conv_bn_kernel(%arg0: i32, %arg1: i32, %arg2: memref<32x128xbf16, #tpu.memory_space<vmem>>, %arg3: memref<128x128xbf16, #tpu.memory_space<vmem>>, %arg4: memref<32x128xbf16, #tpu.memory_space<vmem>>, %arg5: memref<32x128xf32, #tpu.memory_space<vmem>>, %arg6: memref<2x128xf32, #tpu.memory_space<vmem>>) attributes {dimension_semantics = [#tpu.dimension_semantics<arbitrary>, #tpu.dimension_semantics<arbitrary>], iteration_bounds = array<i64: 2, 1>, scalar_prefetch = 0 : i64, scratch_operands = 2 : i64, tpu.core_type = #tpu.core_type<tc>, window_params = [{transform_indices = @transform_0, window_bounds = array<i64: 32, 128>}, {pipeline_mode = #tpu.pipeline_mode<synchronous>, transform_indices = @transform_1, window_bounds = array<i64: 128, 128>}, {transform_indices = @transform_2, window_bounds = array<i64: 32, 128>}]} {
    %c32_i32 = arith.constant 32 : i32
    %0 = arith.muli %arg1, %c32_i32 : i32
    %1 = tpu.assume_multiple %0, 8 : i32
    %c0_i32 = arith.constant 0 : i32
    %2 = arith.cmpi eq, %arg0, %c0_i32 : i32
    %3 = arith.extui %2 : i1 to i32
    %c0_i32_0 = arith.constant 0 : i32
    %4 = arith.cmpi ne, %3, %c0_i32_0 : i32
    scf.if %4 {
      %c0_i32_2 = arith.constant 0 : i32
      %8 = arith.cmpi eq, %arg1, %c0_i32_2 : i32
      %9 = arith.extui %8 : i1 to i32
      %c0_i32_3 = arith.constant 0 : i32
      %10 = arith.cmpi ne, %9, %c0_i32_3 : i32
      scf.if %10 {
        %cst_14 = arith.constant 0.000000e+00 : f32
        %25 = vector.broadcast %cst_14 : f32 to vector<2x128xf32>
        %c0_15 = arith.constant 0 : index
        %c0_16 = arith.constant 0 : index
        %26 = vector.load %arg6[%c0_15, %c0_16] : memref<2x128xf32, #tpu.memory_space<vmem>>, vector<2x128xf32>
        tpu.vector_store %arg6[%c0_15, %c0_16], %25 {strides = array<i32>} : memref<2x128xf32, #tpu.memory_space<vmem>>, vector<2x128xf32>,
      } else {
      }
      %c0 = arith.constant 0 : index
      %c0_4 = arith.constant 0 : index
      %11 = vector.load %arg2[%c0, %c0_4] : memref<32x128xbf16, #tpu.memory_space<vmem>>, vector<32x128xbf16>
      %c0_5 = arith.constant 0 : index
      %c0_6 = arith.constant 0 : index
      %12 = vector.load %arg3[%c0_5, %c0_6] : memref<128x128xbf16, #tpu.memory_space<vmem>>, vector<128x128xbf16>
      %cst = arith.constant dense<0.000000e+00> : vector<32x128xf32>
      %13 = tpu.matmul %11, %12, %cst {dimension_numbers = #tpu.dot_dimension_numbers<[1], [0], [0], [1], [0, 0, 1, 1], [], []>} : vector<32x128xbf16>, vector<128x128xbf16>, vector<32x128xf32> -> vector<32x128xf32>
      %14 = arith.index_cast %1 : i32 to index
      %c0_7 = arith.constant 0 : index
      %15 = vector.load %arg5[%14, %c0_7] : memref<32x128xf32, #tpu.memory_space<vmem>>, vector<32x128xf32>
      tpu.vector_store %arg5[%14, %c0_7], %13 {strides = array<i32>} : memref<32x128xf32, #tpu.memory_space<vmem>>, vector<32x128xf32>,
      %c0_8 = arith.constant 0 : index
      %c0_9 = arith.constant 0 : index
      %16 = vector.load %arg6[%c0_8, %c0_9] : memref<2x128xf32, #tpu.memory_space<vmem>>, vector<2x128xf32>
      %cst_10 = arith.constant dense<0.000000e+00> : vector<128xf32>
      %17 = vector.multi_reduction <add>, %13, %cst_10 [0] : vector<32x128xf32> to vector<128xf32>
      %18 = vector.shape_cast %17 : vector<128xf32> to vector<1x128xf32>
      %19 = arith.mulf %13, %13 : vector<32x128xf32>
      %cst_11 = arith.constant dense<0.000000e+00> : vector<128xf32>
      %20 = vector.multi_reduction <add>, %19, %cst_11 [0] : vector<32x128xf32> to vector<128xf32>
      %21 = vector.shape_cast %20 : vector<128xf32> to vector<1x128xf32>
      %22 = tpu.concatenate %18, %21 in 0 : vector<1x128xf32>, vector<1x128xf32> -> vector<2x128xf32>
      %23 = arith.addf %16, %22 : vector<2x128xf32>
      %c0_12 = arith.constant 0 : index
      %c0_13 = arith.constant 0 : index
      %24 = vector.load %arg6[%c0_12, %c0_13] : memref<2x128xf32, #tpu.memory_space<vmem>>, vector<2x128xf32>
      tpu.vector_store %arg6[%c0_12, %c0_13], %23 {strides = array<i32>} : memref<2x128xf32, #tpu.memory_space<vmem>>, vector<2x128xf32>,
    } else {
    }
    %c1_i32 = arith.constant 1 : i32
    %5 = arith.cmpi eq, %arg0, %c1_i32 : i32
    %6 = arith.extui %5 : i1 to i32
    %c0_i32_1 = arith.constant 0 : i32
    %7 = arith.cmpi ne, %6, %c0_i32_1 : i32
    scf.if %7 {
      %8 = arith.index_cast %1 : i32 to index
      %c0 = arith.constant 0 : index
      %9 = vector.load %arg5[%8, %c0] : memref<32x128xf32, #tpu.memory_space<vmem>>, vector<32x128xf32>
      %c0_2 = arith.constant 0 : index
      %c0_3 = arith.constant 0 : index
      %10 = vector.load %arg6[%c0_2, %c0_3] : memref<2x128xf32, #tpu.memory_space<vmem>>, vector<1x128xf32>
      %cst = arith.constant 3.125000e-02 : f32
      %11 = vector.broadcast %cst : f32 to vector<1x128xf32>
      %12 = arith.mulf %10, %11 : vector<1x128xf32>
      %c1 = arith.constant 1 : index
      %c0_4 = arith.constant 0 : index
      %13 = vector.load %arg6[%c1, %c0_4] : memref<2x128xf32, #tpu.memory_space<vmem>>, vector<1x128xf32>
      %cst_5 = arith.constant 3.125000e-02 : f32
      %14 = vector.broadcast %cst_5 : f32 to vector<1x128xf32>
      %15 = arith.mulf %13, %14 : vector<1x128xf32>
      %16 = arith.mulf %12, %12 : vector<1x128xf32>
      %17 = arith.subf %15, %16 : vector<1x128xf32>
      %cst_6 = arith.constant 0.000000e+00 : f32
      %18 = vector.broadcast %cst_6 : f32 to vector<1x128xf32>
      %19 = arith.maximumf %17, %18 : vector<1x128xf32>
      %20 = vector.broadcast %12 : vector<1x128xf32> to vector<32x128xf32>
      %21 = arith.subf %9, %20 : vector<32x128xf32>
      %cst_7 = arith.constant 9.99999974E-6 : f32
      %22 = vector.broadcast %cst_7 : f32 to vector<1x128xf32>
      %23 = arith.addf %19, %22 : vector<1x128xf32>
      %24 = math.rsqrt %23 : vector<1x128xf32>
      %25 = vector.broadcast %24 : vector<1x128xf32> to vector<32x128xf32>
      %26 = arith.mulf %21, %25 : vector<32x128xf32>
      %cst_8 = arith.constant 0.000000e+00 : f32
      %27 = vector.broadcast %cst_8 : f32 to vector<32x128xf32>
      %28 = arith.maximumf %26, %27 : vector<32x128xf32>
      %29 = tpu.iota {dimensions = array<i32: 0>} : vector<32x1xi32>
      %30 = vector.broadcast %1 : i32 to vector<32x1xi32>
      %31 = arith.addi %30, %29 : vector<32x1xi32>
      %c32_i32_9 = arith.constant 32 : i32
      %32 = vector.broadcast %c32_i32_9 : i32 to vector<32x1xi32>
      %33 = arith.cmpi slt, %31, %32 : vector<32x1xi32>
      %cst_10 = arith.constant 0.000000e+00 : f32
      %34 = vector.shape_cast %33 : vector<32x1xi1> to vector<32x1xi1>
      %35 = vector.broadcast %34 : vector<32x1xi1> to vector<32x128xi1>
      %36 = vector.broadcast %cst_10 : f32 to vector<32x128xf32>
      %37 = arith.select %35, %28, %36 : vector<32x128xi1>, vector<32x128xf32>
      %38 = arith.truncf %37 : vector<32x128xf32> to vector<32x128xbf16>
      %c0_11 = arith.constant 0 : index
      %c0_12 = arith.constant 0 : index
      %39 = vector.load %arg4[%c0_11, %c0_12] : memref<32x128xbf16, #tpu.memory_space<vmem>>, vector<32x128xbf16>
      tpu.vector_store %arg4[%c0_11, %c0_12], %38 {strides = array<i32>} : memref<32x128xbf16, #tpu.memory_space<vmem>>, vector<32x128xbf16>,
    } else {
    }
    return
  }
  func.func @transform_0(%arg0: i32, %arg1: i32) -> (i32, i32) {
    %c1_i32 = arith.constant 1 : i32
    %0 = arith.subi %c1_i32, %arg0 : i32
    %1 = arith.muli %arg1, %0 : i32
    %c0_i32 = arith.constant 0 : i32
    %c0_i32_0 = arith.constant 0 : i32
    return %1, %c0_i32 : i32, i32
  }
  func.func @transform_1(%arg0: i32, %arg1: i32) -> (i32, i32) {
    %c0_i32 = arith.constant 0 : i32
    %c0_i32_0 = arith.constant 0 : i32
    %c0_i32_1 = arith.constant 0 : i32
    return %c0_i32, %c0_i32_0 : i32, i32
  }
  func.func @transform_2(%arg0: i32, %arg1: i32) -> (i32, i32) {
    %0 = arith.muli %arg1, %arg0 : i32
    %c0_i32 = arith.constant 0 : i32
    %c0_i32_0 = arith.constant 0 : i32
    return %0, %c0_i32 : i32, i32
  }
}

module attributes {stable_mosaic.version = 11 : i64} {
  func.func @_fused_conv_bn_kernel(%arg0: i32, %arg1: i32, %arg2: memref<32x144xbf16, #tpu.memory_space<vmem>>, %arg3: memref<144x128xbf16, #tpu.memory_space<vmem>>, %arg4: memref<32x128xbf16, #tpu.memory_space<vmem>>, %arg5: memref<32x128xf32, #tpu.memory_space<vmem>>, %arg6: memref<2x128xf32, #tpu.memory_space<vmem>>) attributes {dimension_semantics = [#tpu.dimension_semantics<arbitrary>, #tpu.dimension_semantics<arbitrary>], iteration_bounds = array<i64: 2, 1>, scalar_prefetch = 0 : i64, scratch_operands = 2 : i64, tpu.core_type = #tpu.core_type<tc>, window_params = [{transform_indices = @transform_0, window_bounds = array<i64: 32, 144>}, {pipeline_mode = #tpu.pipeline_mode<synchronous>, transform_indices = @transform_1, window_bounds = array<i64: 144, 128>}, {transform_indices = @transform_2, window_bounds = array<i64: 32, 128>}]} {
    %c32_i32 = arith.constant 32 : i32
    %0 = arith.muli %arg1, %c32_i32 : i32
    %1 = tpu.assume_multiple %0, 8 : i32
    %c0_i32 = arith.constant 0 : i32
    %2 = arith.cmpi eq, %arg0, %c0_i32 : i32
    %3 = arith.extui %2 : i1 to i32
    %c0_i32_0 = arith.constant 0 : i32
    %4 = arith.cmpi ne, %3, %c0_i32_0 : i32
    scf.if %4 {
      %c0_i32_2 = arith.constant 0 : i32
      %8 = arith.cmpi eq, %arg1, %c0_i32_2 : i32
      %9 = arith.extui %8 : i1 to i32
      %c0_i32_3 = arith.constant 0 : i32
      %10 = arith.cmpi ne, %9, %c0_i32_3 : i32
      scf.if %10 {
        %cst_14 = arith.constant 0.000000e+00 : f32
        %25 = vector.broadcast %cst_14 : f32 to vector<2x128xf32>
        %c0_15 = arith.constant 0 : index
        %c0_16 = arith.constant 0 : index
        %26 = vector.load %arg6[%c0_15, %c0_16] : memref<2x128xf32, #tpu.memory_space<vmem>>, vector<2x128xf32>
        tpu.vector_store %arg6[%c0_15, %c0_16], %25 {strides = array<i32>} : memref<2x128xf32, #tpu.memory_space<vmem>>, vector<2x128xf32>,
      } else {
      }
      %c0 = arith.constant 0 : index
      %c0_4 = arith.constant 0 : index
      %11 = vector.load %arg2[%c0, %c0_4] : memref<32x144xbf16, #tpu.memory_space<vmem>>, vector<32x144xbf16>
      %c0_5 = arith.constant 0 : index
      %c0_6 = arith.constant 0 : index
      %12 = vector.load %arg3[%c0_5, %c0_6] : memref<144x128xbf16, #tpu.memory_space<vmem>>, vector<144x128xbf16>
      %cst = arith.constant dense<0.000000e+00> : vector<32x128xf32>
      %13 = tpu.matmul %11, %12, %cst {dimension_numbers = #tpu.dot_dimension_numbers<[1], [0], [0], [1], [0, 0, 1, 1], [], []>} : vector<32x144xbf16>, vector<144x128xbf16>, vector<32x128xf32> -> vector<32x128xf32>
      %14 = arith.index_cast %1 : i32 to index
      %c0_7 = arith.constant 0 : index
      %15 = vector.load %arg5[%14, %c0_7] : memref<32x128xf32, #tpu.memory_space<vmem>>, vector<32x128xf32>
      tpu.vector_store %arg5[%14, %c0_7], %13 {strides = array<i32>} : memref<32x128xf32, #tpu.memory_space<vmem>>, vector<32x128xf32>,
      %c0_8 = arith.constant 0 : index
      %c0_9 = arith.constant 0 : index
      %16 = vector.load %arg6[%c0_8, %c0_9] : memref<2x128xf32, #tpu.memory_space<vmem>>, vector<2x128xf32>
      %cst_10 = arith.constant dense<0.000000e+00> : vector<128xf32>
      %17 = vector.multi_reduction <add>, %13, %cst_10 [0] : vector<32x128xf32> to vector<128xf32>
      %18 = vector.shape_cast %17 : vector<128xf32> to vector<1x128xf32>
      %19 = arith.mulf %13, %13 : vector<32x128xf32>
      %cst_11 = arith.constant dense<0.000000e+00> : vector<128xf32>
      %20 = vector.multi_reduction <add>, %19, %cst_11 [0] : vector<32x128xf32> to vector<128xf32>
      %21 = vector.shape_cast %20 : vector<128xf32> to vector<1x128xf32>
      %22 = tpu.concatenate %18, %21 in 0 : vector<1x128xf32>, vector<1x128xf32> -> vector<2x128xf32>
      %23 = arith.addf %16, %22 : vector<2x128xf32>
      %c0_12 = arith.constant 0 : index
      %c0_13 = arith.constant 0 : index
      %24 = vector.load %arg6[%c0_12, %c0_13] : memref<2x128xf32, #tpu.memory_space<vmem>>, vector<2x128xf32>
      tpu.vector_store %arg6[%c0_12, %c0_13], %23 {strides = array<i32>} : memref<2x128xf32, #tpu.memory_space<vmem>>, vector<2x128xf32>,
    } else {
    }
    %c1_i32 = arith.constant 1 : i32
    %5 = arith.cmpi eq, %arg0, %c1_i32 : i32
    %6 = arith.extui %5 : i1 to i32
    %c0_i32_1 = arith.constant 0 : i32
    %7 = arith.cmpi ne, %6, %c0_i32_1 : i32
    scf.if %7 {
      %8 = arith.index_cast %1 : i32 to index
      %c0 = arith.constant 0 : index
      %9 = vector.load %arg5[%8, %c0] : memref<32x128xf32, #tpu.memory_space<vmem>>, vector<32x128xf32>
      %c0_2 = arith.constant 0 : index
      %c0_3 = arith.constant 0 : index
      %10 = vector.load %arg6[%c0_2, %c0_3] : memref<2x128xf32, #tpu.memory_space<vmem>>, vector<1x128xf32>
      %cst = arith.constant 3.125000e-02 : f32
      %11 = vector.broadcast %cst : f32 to vector<1x128xf32>
      %12 = arith.mulf %10, %11 : vector<1x128xf32>
      %c1 = arith.constant 1 : index
      %c0_4 = arith.constant 0 : index
      %13 = vector.load %arg6[%c1, %c0_4] : memref<2x128xf32, #tpu.memory_space<vmem>>, vector<1x128xf32>
      %cst_5 = arith.constant 3.125000e-02 : f32
      %14 = vector.broadcast %cst_5 : f32 to vector<1x128xf32>
      %15 = arith.mulf %13, %14 : vector<1x128xf32>
      %16 = arith.mulf %12, %12 : vector<1x128xf32>
      %17 = arith.subf %15, %16 : vector<1x128xf32>
      %cst_6 = arith.constant 0.000000e+00 : f32
      %18 = vector.broadcast %cst_6 : f32 to vector<1x128xf32>
      %19 = arith.maximumf %17, %18 : vector<1x128xf32>
      %20 = vector.broadcast %12 : vector<1x128xf32> to vector<32x128xf32>
      %21 = arith.subf %9, %20 : vector<32x128xf32>
      %cst_7 = arith.constant 9.99999974E-6 : f32
      %22 = vector.broadcast %cst_7 : f32 to vector<1x128xf32>
      %23 = arith.addf %19, %22 : vector<1x128xf32>
      %24 = math.rsqrt %23 : vector<1x128xf32>
      %25 = vector.broadcast %24 : vector<1x128xf32> to vector<32x128xf32>
      %26 = arith.mulf %21, %25 : vector<32x128xf32>
      %cst_8 = arith.constant 0.000000e+00 : f32
      %27 = vector.broadcast %cst_8 : f32 to vector<32x128xf32>
      %28 = arith.maximumf %26, %27 : vector<32x128xf32>
      %29 = tpu.iota {dimensions = array<i32: 0>} : vector<32x1xi32>
      %30 = vector.broadcast %1 : i32 to vector<32x1xi32>
      %31 = arith.addi %30, %29 : vector<32x1xi32>
      %c32_i32_9 = arith.constant 32 : i32
      %32 = vector.broadcast %c32_i32_9 : i32 to vector<32x1xi32>
      %33 = arith.cmpi slt, %31, %32 : vector<32x1xi32>
      %cst_10 = arith.constant 0.000000e+00 : f32
      %34 = vector.shape_cast %33 : vector<32x1xi1> to vector<32x1xi1>
      %35 = vector.broadcast %34 : vector<32x1xi1> to vector<32x128xi1>
      %36 = vector.broadcast %cst_10 : f32 to vector<32x128xf32>
      %37 = arith.select %35, %28, %36 : vector<32x128xi1>, vector<32x128xf32>
      %38 = arith.truncf %37 : vector<32x128xf32> to vector<32x128xbf16>
      %c0_11 = arith.constant 0 : index
      %c0_12 = arith.constant 0 : index
      %39 = vector.load %arg4[%c0_11, %c0_12] : memref<32x128xbf16, #tpu.memory_space<vmem>>, vector<32x128xbf16>
      tpu.vector_store %arg4[%c0_11, %c0_12], %38 {strides = array<i32>} : memref<32x128xbf16, #tpu.memory_space<vmem>>, vector<32x128xbf16>,
    } else {
    }
    return
  }
  func.func @transform_0(%arg0: i32, %arg1: i32) -> (i32, i32) {
    %c1_i32 = arith.constant 1 : i32
    %0 = arith.subi %c1_i32, %arg0 : i32
    %1 = arith.muli %arg1, %0 : i32
    %c0_i32 = arith.constant 0 : i32
    %c0_i32_0 = arith.constant 0 : i32
    return %1, %c0_i32 : i32, i32
  }
  func.func @transform_1(%arg0: i32, %arg1: i32) -> (i32, i32) {
    %c0_i32 = arith.constant 0 : i32
    %c0_i32_0 = arith.constant 0 : i32
    %c0_i32_1 = arith.constant 0 : i32
    return %c0_i32, %c0_i32_0 : i32, i32
  }
  func.func @transform_2(%arg0: i32, %arg1: i32) -> (i32, i32) {
    %0 = arith.muli %arg1, %arg0 : i32
    %c0_i32 = arith.constant 0 : i32
    %c0_i32_0 = arith.constant 0 : i32
    return %0, %c0_i32 : i32, i32
  }
}

module attributes {stable_mosaic.version = 11 : i64} {
  func.func @_fused_conv_bn_kernel(%arg0: i32, %arg1: i32, %arg2: memref<32x128xbf16, #tpu.memory_space<vmem>>, %arg3: memref<128x128xbf16, #tpu.memory_space<vmem>>, %arg4: memref<32x128xbf16, #tpu.memory_space<vmem>>, %arg5: memref<32x128xbf16, #tpu.memory_space<vmem>>, %arg6: memref<32x128xf32, #tpu.memory_space<vmem>>, %arg7: memref<2x128xf32, #tpu.memory_space<vmem>>) attributes {dimension_semantics = [#tpu.dimension_semantics<arbitrary>, #tpu.dimension_semantics<arbitrary>], iteration_bounds = array<i64: 2, 1>, scalar_prefetch = 0 : i64, scratch_operands = 2 : i64, tpu.core_type = #tpu.core_type<tc>, window_params = [{transform_indices = @transform_0, window_bounds = array<i64: 32, 128>}, {pipeline_mode = #tpu.pipeline_mode<synchronous>, transform_indices = @transform_1, window_bounds = array<i64: 128, 128>}, {transform_indices = @transform_2, window_bounds = array<i64: 32, 128>}, {transform_indices = @transform_3, window_bounds = array<i64: 32, 128>}]} {
    %c32_i32 = arith.constant 32 : i32
    %0 = arith.muli %arg1, %c32_i32 : i32
    %1 = tpu.assume_multiple %0, 8 : i32
    %c0_i32 = arith.constant 0 : i32
    %2 = arith.cmpi eq, %arg0, %c0_i32 : i32
    %3 = arith.extui %2 : i1 to i32
    %c0_i32_0 = arith.constant 0 : i32
    %4 = arith.cmpi ne, %3, %c0_i32_0 : i32
    scf.if %4 {
      %c0_i32_2 = arith.constant 0 : i32
      %8 = arith.cmpi eq, %arg1, %c0_i32_2 : i32
      %9 = arith.extui %8 : i1 to i32
      %c0_i32_3 = arith.constant 0 : i32
      %10 = arith.cmpi ne, %9, %c0_i32_3 : i32
      scf.if %10 {
        %cst_14 = arith.constant 0.000000e+00 : f32
        %25 = vector.broadcast %cst_14 : f32 to vector<2x128xf32>
        %c0_15 = arith.constant 0 : index
        %c0_16 = arith.constant 0 : index
        %26 = vector.load %arg7[%c0_15, %c0_16] : memref<2x128xf32, #tpu.memory_space<vmem>>, vector<2x128xf32>
        tpu.vector_store %arg7[%c0_15, %c0_16], %25 {strides = array<i32>} : memref<2x128xf32, #tpu.memory_space<vmem>>, vector<2x128xf32>,
      } else {
      }
      %c0 = arith.constant 0 : index
      %c0_4 = arith.constant 0 : index
      %11 = vector.load %arg2[%c0, %c0_4] : memref<32x128xbf16, #tpu.memory_space<vmem>>, vector<32x128xbf16>
      %c0_5 = arith.constant 0 : index
      %c0_6 = arith.constant 0 : index
      %12 = vector.load %arg3[%c0_5, %c0_6] : memref<128x128xbf16, #tpu.memory_space<vmem>>, vector<128x128xbf16>
      %cst = arith.constant dense<0.000000e+00> : vector<32x128xf32>
      %13 = tpu.matmul %11, %12, %cst {dimension_numbers = #tpu.dot_dimension_numbers<[1], [0], [0], [1], [0, 0, 1, 1], [], []>} : vector<32x128xbf16>, vector<128x128xbf16>, vector<32x128xf32> -> vector<32x128xf32>
      %14 = arith.index_cast %1 : i32 to index
      %c0_7 = arith.constant 0 : index
      %15 = vector.load %arg6[%14, %c0_7] : memref<32x128xf32, #tpu.memory_space<vmem>>, vector<32x128xf32>
      tpu.vector_store %arg6[%14, %c0_7], %13 {strides = array<i32>} : memref<32x128xf32, #tpu.memory_space<vmem>>, vector<32x128xf32>,
      %c0_8 = arith.constant 0 : index
      %c0_9 = arith.constant 0 : index
      %16 = vector.load %arg7[%c0_8, %c0_9] : memref<2x128xf32, #tpu.memory_space<vmem>>, vector<2x128xf32>
      %cst_10 = arith.constant dense<0.000000e+00> : vector<128xf32>
      %17 = vector.multi_reduction <add>, %13, %cst_10 [0] : vector<32x128xf32> to vector<128xf32>
      %18 = vector.shape_cast %17 : vector<128xf32> to vector<1x128xf32>
      %19 = arith.mulf %13, %13 : vector<32x128xf32>
      %cst_11 = arith.constant dense<0.000000e+00> : vector<128xf32>
      %20 = vector.multi_reduction <add>, %19, %cst_11 [0] : vector<32x128xf32> to vector<128xf32>
      %21 = vector.shape_cast %20 : vector<128xf32> to vector<1x128xf32>
      %22 = tpu.concatenate %18, %21 in 0 : vector<1x128xf32>, vector<1x128xf32> -> vector<2x128xf32>
      %23 = arith.addf %16, %22 : vector<2x128xf32>
      %c0_12 = arith.constant 0 : index
      %c0_13 = arith.constant 0 : index
      %24 = vector.load %arg7[%c0_12, %c0_13] : memref<2x128xf32, #tpu.memory_space<vmem>>, vector<2x128xf32>
      tpu.vector_store %arg7[%c0_12, %c0_13], %23 {strides = array<i32>} : memref<2x128xf32, #tpu.memory_space<vmem>>, vector<2x128xf32>,
    } else {
    }
    %c1_i32 = arith.constant 1 : i32
    %5 = arith.cmpi eq, %arg0, %c1_i32 : i32
    %6 = arith.extui %5 : i1 to i32
    %c0_i32_1 = arith.constant 0 : i32
    %7 = arith.cmpi ne, %6, %c0_i32_1 : i32
    scf.if %7 {
      %8 = arith.index_cast %1 : i32 to index
      %c0 = arith.constant 0 : index
      %9 = vector.load %arg6[%8, %c0] : memref<32x128xf32, #tpu.memory_space<vmem>>, vector<32x128xf32>
      %c0_2 = arith.constant 0 : index
      %c0_3 = arith.constant 0 : index
      %10 = vector.load %arg7[%c0_2, %c0_3] : memref<2x128xf32, #tpu.memory_space<vmem>>, vector<1x128xf32>
      %cst = arith.constant 3.125000e-02 : f32
      %11 = vector.broadcast %cst : f32 to vector<1x128xf32>
      %12 = arith.mulf %10, %11 : vector<1x128xf32>
      %c1 = arith.constant 1 : index
      %c0_4 = arith.constant 0 : index
      %13 = vector.load %arg7[%c1, %c0_4] : memref<2x128xf32, #tpu.memory_space<vmem>>, vector<1x128xf32>
      %cst_5 = arith.constant 3.125000e-02 : f32
      %14 = vector.broadcast %cst_5 : f32 to vector<1x128xf32>
      %15 = arith.mulf %13, %14 : vector<1x128xf32>
      %16 = arith.mulf %12, %12 : vector<1x128xf32>
      %17 = arith.subf %15, %16 : vector<1x128xf32>
      %cst_6 = arith.constant 0.000000e+00 : f32
      %18 = vector.broadcast %cst_6 : f32 to vector<1x128xf32>
      %19 = arith.maximumf %17, %18 : vector<1x128xf32>
      %20 = vector.broadcast %12 : vector<1x128xf32> to vector<32x128xf32>
      %21 = arith.subf %9, %20 : vector<32x128xf32>
      %cst_7 = arith.constant 9.99999974E-6 : f32
      %22 = vector.broadcast %cst_7 : f32 to vector<1x128xf32>
      %23 = arith.addf %19, %22 : vector<1x128xf32>
      %24 = math.rsqrt %23 : vector<1x128xf32>
      %25 = vector.broadcast %24 : vector<1x128xf32> to vector<32x128xf32>
      %26 = arith.mulf %21, %25 : vector<32x128xf32>
      %cst_8 = arith.constant 0.000000e+00 : f32
      %27 = vector.broadcast %cst_8 : f32 to vector<32x128xf32>
      %28 = arith.maximumf %26, %27 : vector<32x128xf32>
      %c0_9 = arith.constant 0 : index
      %c0_10 = arith.constant 0 : index
      %29 = vector.load %arg4[%c0_9, %c0_10] : memref<32x128xbf16, #tpu.memory_space<vmem>>, vector<32x128xbf16>
      %30 = arith.extf %29 : vector<32x128xbf16> to vector<32x128xf32>
      %31 = arith.addf %28, %30 : vector<32x128xf32>
      %cst_11 = arith.constant 0.000000e+00 : f32
      %32 = vector.broadcast %cst_11 : f32 to vector<32x128xf32>
      %33 = arith.maximumf %31, %32 : vector<32x128xf32>
      %34 = tpu.iota {dimensions = array<i32: 0>} : vector<32x1xi32>
      %35 = vector.broadcast %1 : i32 to vector<32x1xi32>
      %36 = arith.addi %35, %34 : vector<32x1xi32>
      %c32_i32_12 = arith.constant 32 : i32
      %37 = vector.broadcast %c32_i32_12 : i32 to vector<32x1xi32>
      %38 = arith.cmpi slt, %36, %37 : vector<32x1xi32>
      %cst_13 = arith.constant 0.000000e+00 : f32
      %39 = vector.shape_cast %38 : vector<32x1xi1> to vector<32x1xi1>
      %40 = vector.broadcast %39 : vector<32x1xi1> to vector<32x128xi1>
      %41 = vector.broadcast %cst_13 : f32 to vector<32x128xf32>
      %42 = arith.select %40, %33, %41 : vector<32x128xi1>, vector<32x128xf32>
      %43 = arith.truncf %42 : vector<32x128xf32> to vector<32x128xbf16>
      %c0_14 = arith.constant 0 : index
      %c0_15 = arith.constant 0 : index
      %44 = vector.load %arg5[%c0_14, %c0_15] : memref<32x128xbf16, #tpu.memory_space<vmem>>, vector<32x128xbf16>
      tpu.vector_store %arg5[%c0_14, %c0_15], %43 {strides = array<i32>} : memref<32x128xbf16, #tpu.memory_space<vmem>>, vector<32x128xbf16>,
    } else {
    }
    return
  }
  func.func @transform_0(%arg0: i32, %arg1: i32) -> (i32, i32) {
    %c1_i32 = arith.constant 1 : i32
    %0 = arith.subi %c1_i32, %arg0 : i32
    %1 = arith.muli %arg1, %0 : i32
    %c0_i32 = arith.constant 0 : i32
    %c0_i32_0 = arith.constant 0 : i32
    return %1, %c0_i32 : i32, i32
  }
  func.func @transform_1(%arg0: i32, %arg1: i32) -> (i32, i32) {
    %c0_i32 = arith.constant 0 : i32
    %c0_i32_0 = arith.constant 0 : i32
    %c0_i32_1 = arith.constant 0 : i32
    return %c0_i32, %c0_i32_0 : i32, i32
  }
  func.func @transform_2(%arg0: i32, %arg1: i32) -> (i32, i32) {
    %0 = arith.muli %arg1, %arg0 : i32
    %c0_i32 = arith.constant 0 : i32
    %c0_i32_0 = arith.constant 0 : i32
    return %0, %c0_i32 : i32, i32
  }
  func.func @transform_3(%arg0: i32, %arg1: i32) -> (i32, i32) {
    %0 = arith.muli %arg1, %arg0 : i32
    %c0_i32 = arith.constant 0 : i32
    %c0_i32_0 = arith.constant 0 : i32
    return %0, %c0_i32 : i32, i32
  }
}

module attributes {stable_mosaic.version = 11 : i64} {
  func.func @_fused_conv_bn_kernel(%arg0: i32, %arg1: i32, %arg2: memref<8x216xbf16, #tpu.memory_space<vmem>>, %arg3: memref<216x128xbf16, #tpu.memory_space<vmem>>, %arg4: memref<8x128xbf16, #tpu.memory_space<vmem>>, %arg5: memref<8x128xf32, #tpu.memory_space<vmem>>, %arg6: memref<2x128xf32, #tpu.memory_space<vmem>>) attributes {dimension_semantics = [#tpu.dimension_semantics<arbitrary>, #tpu.dimension_semantics<arbitrary>], iteration_bounds = array<i64: 2, 1>, scalar_prefetch = 0 : i64, scratch_operands = 2 : i64, tpu.core_type = #tpu.core_type<tc>, window_params = [{transform_indices = @transform_0, window_bounds = array<i64: 8, 216>}, {pipeline_mode = #tpu.pipeline_mode<synchronous>, transform_indices = @transform_1, window_bounds = array<i64: 216, 128>}, {transform_indices = @transform_2, window_bounds = array<i64: 8, 128>}]} {
    %c8_i32 = arith.constant 8 : i32
    %0 = arith.muli %arg1, %c8_i32 : i32
    %1 = tpu.assume_multiple %0, 8 : i32
    %c0_i32 = arith.constant 0 : i32
    %2 = arith.cmpi eq, %arg0, %c0_i32 : i32
    %3 = arith.extui %2 : i1 to i32
    %c0_i32_0 = arith.constant 0 : i32
    %4 = arith.cmpi ne, %3, %c0_i32_0 : i32
    scf.if %4 {
      %c0_i32_2 = arith.constant 0 : i32
      %8 = arith.cmpi eq, %arg1, %c0_i32_2 : i32
      %9 = arith.extui %8 : i1 to i32
      %c0_i32_3 = arith.constant 0 : i32
      %10 = arith.cmpi ne, %9, %c0_i32_3 : i32
      scf.if %10 {
        %cst_14 = arith.constant 0.000000e+00 : f32
        %25 = vector.broadcast %cst_14 : f32 to vector<2x128xf32>
        %c0_15 = arith.constant 0 : index
        %c0_16 = arith.constant 0 : index
        %26 = vector.load %arg6[%c0_15, %c0_16] : memref<2x128xf32, #tpu.memory_space<vmem>>, vector<2x128xf32>
        tpu.vector_store %arg6[%c0_15, %c0_16], %25 {strides = array<i32>} : memref<2x128xf32, #tpu.memory_space<vmem>>, vector<2x128xf32>,
      } else {
      }
      %c0 = arith.constant 0 : index
      %c0_4 = arith.constant 0 : index
      %11 = vector.load %arg2[%c0, %c0_4] : memref<8x216xbf16, #tpu.memory_space<vmem>>, vector<8x216xbf16>
      %c0_5 = arith.constant 0 : index
      %c0_6 = arith.constant 0 : index
      %12 = vector.load %arg3[%c0_5, %c0_6] : memref<216x128xbf16, #tpu.memory_space<vmem>>, vector<216x128xbf16>
      %cst = arith.constant dense<0.000000e+00> : vector<8x128xf32>
      %13 = tpu.matmul %11, %12, %cst {dimension_numbers = #tpu.dot_dimension_numbers<[1], [0], [0], [1], [0, 0, 1, 1], [], []>} : vector<8x216xbf16>, vector<216x128xbf16>, vector<8x128xf32> -> vector<8x128xf32>
      %14 = arith.index_cast %1 : i32 to index
      %c0_7 = arith.constant 0 : index
      %15 = vector.load %arg5[%14, %c0_7] : memref<8x128xf32, #tpu.memory_space<vmem>>, vector<8x128xf32>
      tpu.vector_store %arg5[%14, %c0_7], %13 {strides = array<i32>} : memref<8x128xf32, #tpu.memory_space<vmem>>, vector<8x128xf32>,
      %c0_8 = arith.constant 0 : index
      %c0_9 = arith.constant 0 : index
      %16 = vector.load %arg6[%c0_8, %c0_9] : memref<2x128xf32, #tpu.memory_space<vmem>>, vector<2x128xf32>
      %cst_10 = arith.constant dense<0.000000e+00> : vector<128xf32>
      %17 = vector.multi_reduction <add>, %13, %cst_10 [0] : vector<8x128xf32> to vector<128xf32>
      %18 = vector.shape_cast %17 : vector<128xf32> to vector<1x128xf32>
      %19 = arith.mulf %13, %13 : vector<8x128xf32>
      %cst_11 = arith.constant dense<0.000000e+00> : vector<128xf32>
      %20 = vector.multi_reduction <add>, %19, %cst_11 [0] : vector<8x128xf32> to vector<128xf32>
      %21 = vector.shape_cast %20 : vector<128xf32> to vector<1x128xf32>
      %22 = tpu.concatenate %18, %21 in 0 : vector<1x128xf32>, vector<1x128xf32> -> vector<2x128xf32>
      %23 = arith.addf %16, %22 : vector<2x128xf32>
      %c0_12 = arith.constant 0 : index
      %c0_13 = arith.constant 0 : index
      %24 = vector.load %arg6[%c0_12, %c0_13] : memref<2x128xf32, #tpu.memory_space<vmem>>, vector<2x128xf32>
      tpu.vector_store %arg6[%c0_12, %c0_13], %23 {strides = array<i32>} : memref<2x128xf32, #tpu.memory_space<vmem>>, vector<2x128xf32>,
    } else {
    }
    %c1_i32 = arith.constant 1 : i32
    %5 = arith.cmpi eq, %arg0, %c1_i32 : i32
    %6 = arith.extui %5 : i1 to i32
    %c0_i32_1 = arith.constant 0 : i32
    %7 = arith.cmpi ne, %6, %c0_i32_1 : i32
    scf.if %7 {
      %8 = arith.index_cast %1 : i32 to index
      %c0 = arith.constant 0 : index
      %9 = vector.load %arg5[%8, %c0] : memref<8x128xf32, #tpu.memory_space<vmem>>, vector<8x128xf32>
      %c0_2 = arith.constant 0 : index
      %c0_3 = arith.constant 0 : index
      %10 = vector.load %arg6[%c0_2, %c0_3] : memref<2x128xf32, #tpu.memory_space<vmem>>, vector<1x128xf32>
      %cst = arith.constant 1.250000e-01 : f32
      %11 = vector.broadcast %cst : f32 to vector<1x128xf32>
      %12 = arith.mulf %10, %11 : vector<1x128xf32>
      %c1 = arith.constant 1 : index
      %c0_4 = arith.constant 0 : index
      %13 = vector.load %arg6[%c1, %c0_4] : memref<2x128xf32, #tpu.memory_space<vmem>>, vector<1x128xf32>
      %cst_5 = arith.constant 1.250000e-01 : f32
      %14 = vector.broadcast %cst_5 : f32 to vector<1x128xf32>
      %15 = arith.mulf %13, %14 : vector<1x128xf32>
      %16 = arith.mulf %12, %12 : vector<1x128xf32>
      %17 = arith.subf %15, %16 : vector<1x128xf32>
      %cst_6 = arith.constant 0.000000e+00 : f32
      %18 = vector.broadcast %cst_6 : f32 to vector<1x128xf32>
      %19 = arith.maximumf %17, %18 : vector<1x128xf32>
      %20 = vector.broadcast %12 : vector<1x128xf32> to vector<8x128xf32>
      %21 = arith.subf %9, %20 : vector<8x128xf32>
      %cst_7 = arith.constant 9.99999974E-6 : f32
      %22 = vector.broadcast %cst_7 : f32 to vector<1x128xf32>
      %23 = arith.addf %19, %22 : vector<1x128xf32>
      %24 = math.rsqrt %23 : vector<1x128xf32>
      %25 = vector.broadcast %24 : vector<1x128xf32> to vector<8x128xf32>
      %26 = arith.mulf %21, %25 : vector<8x128xf32>
      %cst_8 = arith.constant 0.000000e+00 : f32
      %27 = vector.broadcast %cst_8 : f32 to vector<8x128xf32>
      %28 = arith.maximumf %26, %27 : vector<8x128xf32>
      %29 = tpu.iota {dimensions = array<i32: 0>} : vector<8x1xi32>
      %30 = vector.broadcast %1 : i32 to vector<8x1xi32>
      %31 = arith.addi %30, %29 : vector<8x1xi32>
      %c8_i32_9 = arith.constant 8 : i32
      %32 = vector.broadcast %c8_i32_9 : i32 to vector<8x1xi32>
      %33 = arith.cmpi slt, %31, %32 : vector<8x1xi32>
      %cst_10 = arith.constant 0.000000e+00 : f32
      %34 = vector.shape_cast %33 : vector<8x1xi1> to vector<8x1xi1>
      %35 = vector.broadcast %34 : vector<8x1xi1> to vector<8x128xi1>
      %36 = vector.broadcast %cst_10 : f32 to vector<8x128xf32>
      %37 = arith.select %35, %28, %36 : vector<8x128xi1>, vector<8x128xf32>
      %38 = arith.truncf %37 : vector<8x128xf32> to vector<8x128xbf16>
      %c0_11 = arith.constant 0 : index
      %c0_12 = arith.constant 0 : index
      %39 = vector.load %arg4[%c0_11, %c0_12] : memref<8x128xbf16, #tpu.memory_space<vmem>>, vector<8x128xbf16>
      tpu.vector_store %arg4[%c0_11, %c0_12], %38 {strides = array<i32>} : memref<8x128xbf16, #tpu.memory_space<vmem>>, vector<8x128xbf16>,
    } else {
    }
    return
  }
  func.func @transform_0(%arg0: i32, %arg1: i32) -> (i32, i32) {
    %c1_i32 = arith.constant 1 : i32
    %0 = arith.subi %c1_i32, %arg0 : i32
    %1 = arith.muli %arg1, %0 : i32
    %c0_i32 = arith.constant 0 : i32
    %c0_i32_0 = arith.constant 0 : i32
    return %1, %c0_i32 : i32, i32
  }
  func.func @transform_1(%arg0: i32, %arg1: i32) -> (i32, i32) {
    %c0_i32 = arith.constant 0 : i32
    %c0_i32_0 = arith.constant 0 : i32
    %c0_i32_1 = arith.constant 0 : i32
    return %c0_i32, %c0_i32_0 : i32, i32
  }
  func.func @transform_2(%arg0: i32, %arg1: i32) -> (i32, i32) {
    %0 = arith.muli %arg1, %arg0 : i32
    %c0_i32 = arith.constant 0 : i32
    %c0_i32_0 = arith.constant 0 : i32
    return %0, %c0_i32 : i32, i32
  }
}

module attributes {stable_mosaic.version = 11 : i64} {
  func.func @_fused_conv_bn_kernel(%arg0: i32, %arg1: i32, %arg2: memref<8x128xbf16, #tpu.memory_space<vmem>>, %arg3: memref<128x128xbf16, #tpu.memory_space<vmem>>, %arg4: memref<8x128xbf16, #tpu.memory_space<vmem>>, %arg5: memref<128x128xbf16, #tpu.memory_space<vmem>>, %arg6: memref<8x128xbf16, #tpu.memory_space<vmem>>, %arg7: memref<8x128xf32, #tpu.memory_space<vmem>>, %arg8: memref<2x128xf32, #tpu.memory_space<vmem>>, %arg9: memref<8x128xf32, #tpu.memory_space<vmem>>, %arg10: memref<2x128xf32, #tpu.memory_space<vmem>>) attributes {dimension_semantics = [#tpu.dimension_semantics<arbitrary>, #tpu.dimension_semantics<arbitrary>], iteration_bounds = array<i64: 2, 1>, scalar_prefetch = 0 : i64, scratch_operands = 4 : i64, tpu.core_type = #tpu.core_type<tc>, window_params = [{transform_indices = @transform_0, window_bounds = array<i64: 8, 128>}, {pipeline_mode = #tpu.pipeline_mode<synchronous>, transform_indices = @transform_1, window_bounds = array<i64: 128, 128>}, {transform_indices = @transform_2, window_bounds = array<i64: 8, 128>}, {pipeline_mode = #tpu.pipeline_mode<synchronous>, transform_indices = @transform_3, window_bounds = array<i64: 128, 128>}, {transform_indices = @transform_4, window_bounds = array<i64: 8, 128>}]} {
    %c8_i32 = arith.constant 8 : i32
    %0 = arith.muli %arg1, %c8_i32 : i32
    %1 = tpu.assume_multiple %0, 8 : i32
    %c0_i32 = arith.constant 0 : i32
    %2 = arith.cmpi eq, %arg0, %c0_i32 : i32
    %3 = arith.extui %2 : i1 to i32
    %c0_i32_0 = arith.constant 0 : i32
    %4 = arith.cmpi ne, %3, %c0_i32_0 : i32
    scf.if %4 {
      %c0_i32_2 = arith.constant 0 : i32
      %8 = arith.cmpi eq, %arg1, %c0_i32_2 : i32
      %9 = arith.extui %8 : i1 to i32
      %c0_i32_3 = arith.constant 0 : i32
      %10 = arith.cmpi ne, %9, %c0_i32_3 : i32
      scf.if %10 {
        %cst_26 = arith.constant 0.000000e+00 : f32
        %39 = vector.broadcast %cst_26 : f32 to vector<2x128xf32>
        %c0_27 = arith.constant 0 : index
        %c0_28 = arith.constant 0 : index
        %40 = vector.load %arg8[%c0_27, %c0_28] : memref<2x128xf32, #tpu.memory_space<vmem>>, vector<2x128xf32>
        tpu.vector_store %arg8[%c0_27, %c0_28], %39 {strides = array<i32>} : memref<2x128xf32, #tpu.memory_space<vmem>>, vector<2x128xf32>,
        %cst_29 = arith.constant 0.000000e+00 : f32
        %41 = vector.broadcast %cst_29 : f32 to vector<2x128xf32>
        %c0_30 = arith.constant 0 : index
        %c0_31 = arith.constant 0 : index
        %42 = vector.load %arg10[%c0_30, %c0_31] : memref<2x128xf32, #tpu.memory_space<vmem>>, vector<2x128xf32>
        tpu.vector_store %arg10[%c0_30, %c0_31], %41 {strides = array<i32>} : memref<2x128xf32, #tpu.memory_space<vmem>>, vector<2x128xf32>,
      } else {
      }
      %c0 = arith.constant 0 : index
      %c0_4 = arith.constant 0 : index
      %11 = vector.load %arg2[%c0, %c0_4] : memref<8x128xbf16, #tpu.memory_space<vmem>>, vector<8x128xbf16>
      %c0_5 = arith.constant 0 : index
      %c0_6 = arith.constant 0 : index
      %12 = vector.load %arg3[%c0_5, %c0_6] : memref<128x128xbf16, #tpu.memory_space<vmem>>, vector<128x128xbf16>
      %cst = arith.constant dense<0.000000e+00> : vector<8x128xf32>
      %13 = tpu.matmul %11, %12, %cst {dimension_numbers = #tpu.dot_dimension_numbers<[1], [0], [0], [1], [0, 0, 1, 1], [], []>} : vector<8x128xbf16>, vector<128x128xbf16>, vector<8x128xf32> -> vector<8x128xf32>
      %14 = arith.index_cast %1 : i32 to index
      %c0_7 = arith.constant 0 : index
      %15 = vector.load %arg7[%14, %c0_7] : memref<8x128xf32, #tpu.memory_space<vmem>>, vector<8x128xf32>
      tpu.vector_store %arg7[%14, %c0_7], %13 {strides = array<i32>} : memref<8x128xf32, #tpu.memory_space<vmem>>, vector<8x128xf32>,
      %c0_8 = arith.constant 0 : index
      %c0_9 = arith.constant 0 : index
      %16 = vector.load %arg8[%c0_8, %c0_9] : memref<2x128xf32, #tpu.memory_space<vmem>>, vector<2x128xf32>
      %cst_10 = arith.constant dense<0.000000e+00> : vector<128xf32>
      %17 = vector.multi_reduction <add>, %13, %cst_10 [0] : vector<8x128xf32> to vector<128xf32>
      %18 = vector.shape_cast %17 : vector<128xf32> to vector<1x128xf32>
      %19 = arith.mulf %13, %13 : vector<8x128xf32>
      %cst_11 = arith.constant dense<0.000000e+00> : vector<128xf32>
      %20 = vector.multi_reduction <add>, %19, %cst_11 [0] : vector<8x128xf32> to vector<128xf32>
      %21 = vector.shape_cast %20 : vector<128xf32> to vector<1x128xf32>
      %22 = tpu.concatenate %18, %21 in 0 : vector<1x128xf32>, vector<1x128xf32> -> vector<2x128xf32>
      %23 = arith.addf %16, %22 : vector<2x128xf32>
      %c0_12 = arith.constant 0 : index
      %c0_13 = arith.constant 0 : index
      %24 = vector.load %arg8[%c0_12, %c0_13] : memref<2x128xf32, #tpu.memory_space<vmem>>, vector<2x128xf32>
      tpu.vector_store %arg8[%c0_12, %c0_13], %23 {strides = array<i32>} : memref<2x128xf32, #tpu.memory_space<vmem>>, vector<2x128xf32>,
      %c0_14 = arith.constant 0 : index
      %c0_15 = arith.constant 0 : index
      %25 = vector.load %arg4[%c0_14, %c0_15] : memref<8x128xbf16, #tpu.memory_space<vmem>>, vector<8x128xbf16>
      %c0_16 = arith.constant 0 : index
      %c0_17 = arith.constant 0 : index
      %26 = vector.load %arg5[%c0_16, %c0_17] : memref<128x128xbf16, #tpu.memory_space<vmem>>, vector<128x128xbf16>
      %cst_18 = arith.constant dense<0.000000e+00> : vector<8x128xf32>
      %27 = tpu.matmul %25, %26, %cst_18 {dimension_numbers = #tpu.dot_dimension_numbers<[1], [0], [0], [1], [0, 0, 1, 1], [], []>} : vector<8x128xbf16>, vector<128x128xbf16>, vector<8x128xf32> -> vector<8x128xf32>
      %28 = arith.index_cast %1 : i32 to index
      %c0_19 = arith.constant 0 : index
      %29 = vector.load %arg9[%28, %c0_19] : memref<8x128xf32, #tpu.memory_space<vmem>>, vector<8x128xf32>
      tpu.vector_store %arg9[%28, %c0_19], %27 {strides = array<i32>} : memref<8x128xf32, #tpu.memory_space<vmem>>, vector<8x128xf32>,
      %c0_20 = arith.constant 0 : index
      %c0_21 = arith.constant 0 : index
      %30 = vector.load %arg10[%c0_20, %c0_21] : memref<2x128xf32, #tpu.memory_space<vmem>>, vector<2x128xf32>
      %cst_22 = arith.constant dense<0.000000e+00> : vector<128xf32>
      %31 = vector.multi_reduction <add>, %27, %cst_22 [0] : vector<8x128xf32> to vector<128xf32>
      %32 = vector.shape_cast %31 : vector<128xf32> to vector<1x128xf32>
      %33 = arith.mulf %27, %27 : vector<8x128xf32>
      %cst_23 = arith.constant dense<0.000000e+00> : vector<128xf32>
      %34 = vector.multi_reduction <add>, %33, %cst_23 [0] : vector<8x128xf32> to vector<128xf32>
      %35 = vector.shape_cast %34 : vector<128xf32> to vector<1x128xf32>
      %36 = tpu.concatenate %32, %35 in 0 : vector<1x128xf32>, vector<1x128xf32> -> vector<2x128xf32>
      %37 = arith.addf %30, %36 : vector<2x128xf32>
      %c0_24 = arith.constant 0 : index
      %c0_25 = arith.constant 0 : index
      %38 = vector.load %arg10[%c0_24, %c0_25] : memref<2x128xf32, #tpu.memory_space<vmem>>, vector<2x128xf32>
      tpu.vector_store %arg10[%c0_24, %c0_25], %37 {strides = array<i32>} : memref<2x128xf32, #tpu.memory_space<vmem>>, vector<2x128xf32>,
    } else {
    }
    %c1_i32 = arith.constant 1 : i32
    %5 = arith.cmpi eq, %arg0, %c1_i32 : i32
    %6 = arith.extui %5 : i1 to i32
    %c0_i32_1 = arith.constant 0 : i32
    %7 = arith.cmpi ne, %6, %c0_i32_1 : i32
    scf.if %7 {
      %8 = arith.index_cast %1 : i32 to index
      %c0 = arith.constant 0 : index
      %9 = vector.load %arg7[%8, %c0] : memref<8x128xf32, #tpu.memory_space<vmem>>, vector<8x128xf32>
      %c0_2 = arith.constant 0 : index
      %c0_3 = arith.constant 0 : index
      %10 = vector.load %arg8[%c0_2, %c0_3] : memref<2x128xf32, #tpu.memory_space<vmem>>, vector<1x128xf32>
      %cst = arith.constant 1.250000e-01 : f32
      %11 = vector.broadcast %cst : f32 to vector<1x128xf32>
      %12 = arith.mulf %10, %11 : vector<1x128xf32>
      %c1 = arith.constant 1 : index
      %c0_4 = arith.constant 0 : index
      %13 = vector.load %arg8[%c1, %c0_4] : memref<2x128xf32, #tpu.memory_space<vmem>>, vector<1x128xf32>
      %cst_5 = arith.constant 1.250000e-01 : f32
      %14 = vector.broadcast %cst_5 : f32 to vector<1x128xf32>
      %15 = arith.mulf %13, %14 : vector<1x128xf32>
      %16 = arith.mulf %12, %12 : vector<1x128xf32>
      %17 = arith.subf %15, %16 : vector<1x128xf32>
      %cst_6 = arith.constant 0.000000e+00 : f32
      %18 = vector.broadcast %cst_6 : f32 to vector<1x128xf32>
      %19 = arith.maximumf %17, %18 : vector<1x128xf32>
      %20 = vector.broadcast %12 : vector<1x128xf32> to vector<8x128xf32>
      %21 = arith.subf %9, %20 : vector<8x128xf32>
      %cst_7 = arith.constant 9.99999974E-6 : f32
      %22 = vector.broadcast %cst_7 : f32 to vector<1x128xf32>
      %23 = arith.addf %19, %22 : vector<1x128xf32>
      %24 = math.rsqrt %23 : vector<1x128xf32>
      %25 = vector.broadcast %24 : vector<1x128xf32> to vector<8x128xf32>
      %26 = arith.mulf %21, %25 : vector<8x128xf32>
      %cst_8 = arith.constant 0.000000e+00 : f32
      %27 = vector.broadcast %cst_8 : f32 to vector<8x128xf32>
      %28 = arith.maximumf %26, %27 : vector<8x128xf32>
      %29 = arith.index_cast %1 : i32 to index
      %c0_9 = arith.constant 0 : index
      %30 = vector.load %arg9[%29, %c0_9] : memref<8x128xf32, #tpu.memory_space<vmem>>, vector<8x128xf32>
      %c0_10 = arith.constant 0 : index
      %c0_11 = arith.constant 0 : index
      %31 = vector.load %arg10[%c0_10, %c0_11] : memref<2x128xf32, #tpu.memory_space<vmem>>, vector<1x128xf32>
      %cst_12 = arith.constant 1.250000e-01 : f32
      %32 = vector.broadcast %cst_12 : f32 to vector<1x128xf32>
      %33 = arith.mulf %31, %32 : vector<1x128xf32>
      %c1_13 = arith.constant 1 : index
      %c0_14 = arith.constant 0 : index
      %34 = vector.load %arg10[%c1_13, %c0_14] : memref<2x128xf32, #tpu.memory_space<vmem>>, vector<1x128xf32>
      %cst_15 = arith.constant 1.250000e-01 : f32
      %35 = vector.broadcast %cst_15 : f32 to vector<1x128xf32>
      %36 = arith.mulf %34, %35 : vector<1x128xf32>
      %37 = arith.mulf %33, %33 : vector<1x128xf32>
      %38 = arith.subf %36, %37 : vector<1x128xf32>
      %cst_16 = arith.constant 0.000000e+00 : f32
      %39 = vector.broadcast %cst_16 : f32 to vector<1x128xf32>
      %40 = arith.maximumf %38, %39 : vector<1x128xf32>
      %41 = vector.broadcast %33 : vector<1x128xf32> to vector<8x128xf32>
      %42 = arith.subf %30, %41 : vector<8x128xf32>
      %cst_17 = arith.constant 9.99999974E-6 : f32
      %43 = vector.broadcast %cst_17 : f32 to vector<1x128xf32>
      %44 = arith.addf %40, %43 : vector<1x128xf32>
      %45 = math.rsqrt %44 : vector<1x128xf32>
      %46 = vector.broadcast %45 : vector<1x128xf32> to vector<8x128xf32>
      %47 = arith.mulf %42, %46 : vector<8x128xf32>
      %48 = arith.addf %28, %47 : vector<8x128xf32>
      %cst_18 = arith.constant 0.000000e+00 : f32
      %49 = vector.broadcast %cst_18 : f32 to vector<8x128xf32>
      %50 = arith.maximumf %48, %49 : vector<8x128xf32>
      %51 = tpu.iota {dimensions = array<i32: 0>} : vector<8x1xi32>
      %52 = vector.broadcast %1 : i32 to vector<8x1xi32>
      %53 = arith.addi %52, %51 : vector<8x1xi32>
      %c8_i32_19 = arith.constant 8 : i32
      %54 = vector.broadcast %c8_i32_19 : i32 to vector<8x1xi32>
      %55 = arith.cmpi slt, %53, %54 : vector<8x1xi32>
      %cst_20 = arith.constant 0.000000e+00 : f32
      %56 = vector.shape_cast %55 : vector<8x1xi1> to vector<8x1xi1>
      %57 = vector.broadcast %56 : vector<8x1xi1> to vector<8x128xi1>
      %58 = vector.broadcast %cst_20 : f32 to vector<8x128xf32>
      %59 = arith.select %57, %50, %58 : vector<8x128xi1>, vector<8x128xf32>
      %60 = arith.truncf %59 : vector<8x128xf32> to vector<8x128xbf16>
      %c0_21 = arith.constant 0 : index
      %c0_22 = arith.constant 0 : index
      %61 = vector.load %arg6[%c0_21, %c0_22] : memref<8x128xbf16, #tpu.memory_space<vmem>>, vector<8x128xbf16>
      tpu.vector_store %arg6[%c0_21, %c0_22], %60 {strides = array<i32>} : memref<8x128xbf16, #tpu.memory_space<vmem>>, vector<8x128xbf16>,
    } else {
    }
    return
  }
  func.func @transform_0(%arg0: i32, %arg1: i32) -> (i32, i32) {
    %c1_i32 = arith.constant 1 : i32
    %0 = arith.subi %c1_i32, %arg0 : i32
    %1 = arith.muli %arg1, %0 : i32
    %c0_i32 = arith.constant 0 : i32
    %c0_i32_0 = arith.constant 0 : i32
    return %1, %c0_i32 : i32, i32
  }
  func.func @transform_1(%arg0: i32, %arg1: i32) -> (i32, i32) {
    %c0_i32 = arith.constant 0 : i32
    %c0_i32_0 = arith.constant 0 : i32
    %c0_i32_1 = arith.constant 0 : i32
    return %c0_i32, %c0_i32_0 : i32, i32
  }
  func.func @transform_2(%arg0: i32, %arg1: i32) -> (i32, i32) {
    %c1_i32 = arith.constant 1 : i32
    %0 = arith.subi %c1_i32, %arg0 : i32
    %1 = arith.muli %arg1, %0 : i32
    %c0_i32 = arith.constant 0 : i32
    %c0_i32_0 = arith.constant 0 : i32
    return %1, %c0_i32 : i32, i32
  }
  func.func @transform_3(%arg0: i32, %arg1: i32) -> (i32, i32) {
    %c0_i32 = arith.constant 0 : i32
    %c0_i32_0 = arith.constant 0 : i32
    %c0_i32_1 = arith.constant 0 : i32
    return %c0_i32, %c0_i32_0 : i32, i32
  }
  func.func @transform_4(%arg0: i32, %arg1: i32) -> (i32, i32) {
    %0 = arith.muli %arg1, %arg0 : i32
    %c0_i32 = arith.constant 0 : i32
    %c0_i32_0 = arith.constant 0 : i32
    return %0, %c0_i32 : i32, i32
  }
}

module attributes {stable_mosaic.version = 11 : i64} {
  func.func @_fused_conv_bn_kernel(%arg0: i32, %arg1: i32, %arg2: memref<8x128xbf16, #tpu.memory_space<vmem>>, %arg3: memref<128x128xbf16, #tpu.memory_space<vmem>>, %arg4: memref<8x128xbf16, #tpu.memory_space<vmem>>, %arg5: memref<8x128xf32, #tpu.memory_space<vmem>>, %arg6: memref<2x128xf32, #tpu.memory_space<vmem>>) attributes {dimension_semantics = [#tpu.dimension_semantics<arbitrary>, #tpu.dimension_semantics<arbitrary>], iteration_bounds = array<i64: 2, 1>, scalar_prefetch = 0 : i64, scratch_operands = 2 : i64, tpu.core_type = #tpu.core_type<tc>, window_params = [{transform_indices = @transform_0, window_bounds = array<i64: 8, 128>}, {pipeline_mode = #tpu.pipeline_mode<synchronous>, transform_indices = @transform_1, window_bounds = array<i64: 128, 128>}, {transform_indices = @transform_2, window_bounds = array<i64: 8, 128>}]} {
    %c8_i32 = arith.constant 8 : i32
    %0 = arith.muli %arg1, %c8_i32 : i32
    %1 = tpu.assume_multiple %0, 8 : i32
    %c0_i32 = arith.constant 0 : i32
    %2 = arith.cmpi eq, %arg0, %c0_i32 : i32
    %3 = arith.extui %2 : i1 to i32
    %c0_i32_0 = arith.constant 0 : i32
    %4 = arith.cmpi ne, %3, %c0_i32_0 : i32
    scf.if %4 {
      %c0_i32_2 = arith.constant 0 : i32
      %8 = arith.cmpi eq, %arg1, %c0_i32_2 : i32
      %9 = arith.extui %8 : i1 to i32
      %c0_i32_3 = arith.constant 0 : i32
      %10 = arith.cmpi ne, %9, %c0_i32_3 : i32
      scf.if %10 {
        %cst_14 = arith.constant 0.000000e+00 : f32
        %25 = vector.broadcast %cst_14 : f32 to vector<2x128xf32>
        %c0_15 = arith.constant 0 : index
        %c0_16 = arith.constant 0 : index
        %26 = vector.load %arg6[%c0_15, %c0_16] : memref<2x128xf32, #tpu.memory_space<vmem>>, vector<2x128xf32>
        tpu.vector_store %arg6[%c0_15, %c0_16], %25 {strides = array<i32>} : memref<2x128xf32, #tpu.memory_space<vmem>>, vector<2x128xf32>,
      } else {
      }
      %c0 = arith.constant 0 : index
      %c0_4 = arith.constant 0 : index
      %11 = vector.load %arg2[%c0, %c0_4] : memref<8x128xbf16, #tpu.memory_space<vmem>>, vector<8x128xbf16>
      %c0_5 = arith.constant 0 : index
      %c0_6 = arith.constant 0 : index
      %12 = vector.load %arg3[%c0_5, %c0_6] : memref<128x128xbf16, #tpu.memory_space<vmem>>, vector<128x128xbf16>
      %cst = arith.constant dense<0.000000e+00> : vector<8x128xf32>
      %13 = tpu.matmul %11, %12, %cst {dimension_numbers = #tpu.dot_dimension_numbers<[1], [0], [0], [1], [0, 0, 1, 1], [], []>} : vector<8x128xbf16>, vector<128x128xbf16>, vector<8x128xf32> -> vector<8x128xf32>
      %14 = arith.index_cast %1 : i32 to index
      %c0_7 = arith.constant 0 : index
      %15 = vector.load %arg5[%14, %c0_7] : memref<8x128xf32, #tpu.memory_space<vmem>>, vector<8x128xf32>
      tpu.vector_store %arg5[%14, %c0_7], %13 {strides = array<i32>} : memref<8x128xf32, #tpu.memory_space<vmem>>, vector<8x128xf32>,
      %c0_8 = arith.constant 0 : index
      %c0_9 = arith.constant 0 : index
      %16 = vector.load %arg6[%c0_8, %c0_9] : memref<2x128xf32, #tpu.memory_space<vmem>>, vector<2x128xf32>
      %cst_10 = arith.constant dense<0.000000e+00> : vector<128xf32>
      %17 = vector.multi_reduction <add>, %13, %cst_10 [0] : vector<8x128xf32> to vector<128xf32>
      %18 = vector.shape_cast %17 : vector<128xf32> to vector<1x128xf32>
      %19 = arith.mulf %13, %13 : vector<8x128xf32>
      %cst_11 = arith.constant dense<0.000000e+00> : vector<128xf32>
      %20 = vector.multi_reduction <add>, %19, %cst_11 [0] : vector<8x128xf32> to vector<128xf32>
      %21 = vector.shape_cast %20 : vector<128xf32> to vector<1x128xf32>
      %22 = tpu.concatenate %18, %21 in 0 : vector<1x128xf32>, vector<1x128xf32> -> vector<2x128xf32>
      %23 = arith.addf %16, %22 : vector<2x128xf32>
      %c0_12 = arith.constant 0 : index
      %c0_13 = arith.constant 0 : index
      %24 = vector.load %arg6[%c0_12, %c0_13] : memref<2x128xf32, #tpu.memory_space<vmem>>, vector<2x128xf32>
      tpu.vector_store %arg6[%c0_12, %c0_13], %23 {strides = array<i32>} : memref<2x128xf32, #tpu.memory_space<vmem>>, vector<2x128xf32>,
    } else {
    }
    %c1_i32 = arith.constant 1 : i32
    %5 = arith.cmpi eq, %arg0, %c1_i32 : i32
    %6 = arith.extui %5 : i1 to i32
    %c0_i32_1 = arith.constant 0 : i32
    %7 = arith.cmpi ne, %6, %c0_i32_1 : i32
    scf.if %7 {
      %8 = arith.index_cast %1 : i32 to index
      %c0 = arith.constant 0 : index
      %9 = vector.load %arg5[%8, %c0] : memref<8x128xf32, #tpu.memory_space<vmem>>, vector<8x128xf32>
      %c0_2 = arith.constant 0 : index
      %c0_3 = arith.constant 0 : index
      %10 = vector.load %arg6[%c0_2, %c0_3] : memref<2x128xf32, #tpu.memory_space<vmem>>, vector<1x128xf32>
      %cst = arith.constant 1.250000e-01 : f32
      %11 = vector.broadcast %cst : f32 to vector<1x128xf32>
      %12 = arith.mulf %10, %11 : vector<1x128xf32>
      %c1 = arith.constant 1 : index
      %c0_4 = arith.constant 0 : index
      %13 = vector.load %arg6[%c1, %c0_4] : memref<2x128xf32, #tpu.memory_space<vmem>>, vector<1x128xf32>
      %cst_5 = arith.constant 1.250000e-01 : f32
      %14 = vector.broadcast %cst_5 : f32 to vector<1x128xf32>
      %15 = arith.mulf %13, %14 : vector<1x128xf32>
      %16 = arith.mulf %12, %12 : vector<1x128xf32>
      %17 = arith.subf %15, %16 : vector<1x128xf32>
      %cst_6 = arith.constant 0.000000e+00 : f32
      %18 = vector.broadcast %cst_6 : f32 to vector<1x128xf32>
      %19 = arith.maximumf %17, %18 : vector<1x128xf32>
      %20 = vector.broadcast %12 : vector<1x128xf32> to vector<8x128xf32>
      %21 = arith.subf %9, %20 : vector<8x128xf32>
      %cst_7 = arith.constant 9.99999974E-6 : f32
      %22 = vector.broadcast %cst_7 : f32 to vector<1x128xf32>
      %23 = arith.addf %19, %22 : vector<1x128xf32>
      %24 = math.rsqrt %23 : vector<1x128xf32>
      %25 = vector.broadcast %24 : vector<1x128xf32> to vector<8x128xf32>
      %26 = arith.mulf %21, %25 : vector<8x128xf32>
      %cst_8 = arith.constant 0.000000e+00 : f32
      %27 = vector.broadcast %cst_8 : f32 to vector<8x128xf32>
      %28 = arith.maximumf %26, %27 : vector<8x128xf32>
      %29 = tpu.iota {dimensions = array<i32: 0>} : vector<8x1xi32>
      %30 = vector.broadcast %1 : i32 to vector<8x1xi32>
      %31 = arith.addi %30, %29 : vector<8x1xi32>
      %c8_i32_9 = arith.constant 8 : i32
      %32 = vector.broadcast %c8_i32_9 : i32 to vector<8x1xi32>
      %33 = arith.cmpi slt, %31, %32 : vector<8x1xi32>
      %cst_10 = arith.constant 0.000000e+00 : f32
      %34 = vector.shape_cast %33 : vector<8x1xi1> to vector<8x1xi1>
      %35 = vector.broadcast %34 : vector<8x1xi1> to vector<8x128xi1>
      %36 = vector.broadcast %cst_10 : f32 to vector<8x128xf32>
      %37 = arith.select %35, %28, %36 : vector<8x128xi1>, vector<8x128xf32>
      %38 = arith.truncf %37 : vector<8x128xf32> to vector<8x128xbf16>
      %c0_11 = arith.constant 0 : index
      %c0_12 = arith.constant 0 : index
      %39 = vector.load %arg4[%c0_11, %c0_12] : memref<8x128xbf16, #tpu.memory_space<vmem>>, vector<8x128xbf16>
      tpu.vector_store %arg4[%c0_11, %c0_12], %38 {strides = array<i32>} : memref<8x128xbf16, #tpu.memory_space<vmem>>, vector<8x128xbf16>,
    } else {
    }
    return
  }
  func.func @transform_0(%arg0: i32, %arg1: i32) -> (i32, i32) {
    %c1_i32 = arith.constant 1 : i32
    %0 = arith.subi %c1_i32, %arg0 : i32
    %1 = arith.muli %arg1, %0 : i32
    %c0_i32 = arith.constant 0 : i32
    %c0_i32_0 = arith.constant 0 : i32
    return %1, %c0_i32 : i32, i32
  }
  func.func @transform_1(%arg0: i32, %arg1: i32) -> (i32, i32) {
    %c0_i32 = arith.constant 0 : i32
    %c0_i32_0 = arith.constant 0 : i32
    %c0_i32_1 = arith.constant 0 : i32
    return %c0_i32, %c0_i32_0 : i32, i32
  }
  func.func @transform_2(%arg0: i32, %arg1: i32) -> (i32, i32) {
    %0 = arith.muli %arg1, %arg0 : i32
    %c0_i32 = arith.constant 0 : i32
    %c0_i32_0 = arith.constant 0 : i32
    return %0, %c0_i32 : i32, i32
  }
}

module attributes {stable_mosaic.version = 11 : i64} {
  func.func @_fused_conv_bn_kernel(%arg0: i32, %arg1: i32, %arg2: memref<8x128xbf16, #tpu.memory_space<vmem>>, %arg3: memref<128x128xbf16, #tpu.memory_space<vmem>>, %arg4: memref<8x128xbf16, #tpu.memory_space<vmem>>, %arg5: memref<8x128xbf16, #tpu.memory_space<vmem>>, %arg6: memref<8x128xf32, #tpu.memory_space<vmem>>, %arg7: memref<2x128xf32, #tpu.memory_space<vmem>>) attributes {dimension_semantics = [#tpu.dimension_semantics<arbitrary>, #tpu.dimension_semantics<arbitrary>], iteration_bounds = array<i64: 2, 1>, scalar_prefetch = 0 : i64, scratch_operands = 2 : i64, tpu.core_type = #tpu.core_type<tc>, window_params = [{transform_indices = @transform_0, window_bounds = array<i64: 8, 128>}, {pipeline_mode = #tpu.pipeline_mode<synchronous>, transform_indices = @transform_1, window_bounds = array<i64: 128, 128>}, {transform_indices = @transform_2, window_bounds = array<i64: 8, 128>}, {transform_indices = @transform_3, window_bounds = array<i64: 8, 128>}]} {
    %c8_i32 = arith.constant 8 : i32
    %0 = arith.muli %arg1, %c8_i32 : i32
    %1 = tpu.assume_multiple %0, 8 : i32
    %c0_i32 = arith.constant 0 : i32
    %2 = arith.cmpi eq, %arg0, %c0_i32 : i32
    %3 = arith.extui %2 : i1 to i32
    %c0_i32_0 = arith.constant 0 : i32
    %4 = arith.cmpi ne, %3, %c0_i32_0 : i32
    scf.if %4 {
      %c0_i32_2 = arith.constant 0 : i32
      %8 = arith.cmpi eq, %arg1, %c0_i32_2 : i32
      %9 = arith.extui %8 : i1 to i32
      %c0_i32_3 = arith.constant 0 : i32
      %10 = arith.cmpi ne, %9, %c0_i32_3 : i32
      scf.if %10 {
        %cst_14 = arith.constant 0.000000e+00 : f32
        %25 = vector.broadcast %cst_14 : f32 to vector<2x128xf32>
        %c0_15 = arith.constant 0 : index
        %c0_16 = arith.constant 0 : index
        %26 = vector.load %arg7[%c0_15, %c0_16] : memref<2x128xf32, #tpu.memory_space<vmem>>, vector<2x128xf32>
        tpu.vector_store %arg7[%c0_15, %c0_16], %25 {strides = array<i32>} : memref<2x128xf32, #tpu.memory_space<vmem>>, vector<2x128xf32>,
      } else {
      }
      %c0 = arith.constant 0 : index
      %c0_4 = arith.constant 0 : index
      %11 = vector.load %arg2[%c0, %c0_4] : memref<8x128xbf16, #tpu.memory_space<vmem>>, vector<8x128xbf16>
      %c0_5 = arith.constant 0 : index
      %c0_6 = arith.constant 0 : index
      %12 = vector.load %arg3[%c0_5, %c0_6] : memref<128x128xbf16, #tpu.memory_space<vmem>>, vector<128x128xbf16>
      %cst = arith.constant dense<0.000000e+00> : vector<8x128xf32>
      %13 = tpu.matmul %11, %12, %cst {dimension_numbers = #tpu.dot_dimension_numbers<[1], [0], [0], [1], [0, 0, 1, 1], [], []>} : vector<8x128xbf16>, vector<128x128xbf16>, vector<8x128xf32> -> vector<8x128xf32>
      %14 = arith.index_cast %1 : i32 to index
      %c0_7 = arith.constant 0 : index
      %15 = vector.load %arg6[%14, %c0_7] : memref<8x128xf32, #tpu.memory_space<vmem>>, vector<8x128xf32>
      tpu.vector_store %arg6[%14, %c0_7], %13 {strides = array<i32>} : memref<8x128xf32, #tpu.memory_space<vmem>>, vector<8x128xf32>,
      %c0_8 = arith.constant 0 : index
      %c0_9 = arith.constant 0 : index
      %16 = vector.load %arg7[%c0_8, %c0_9] : memref<2x128xf32, #tpu.memory_space<vmem>>, vector<2x128xf32>
      %cst_10 = arith.constant dense<0.000000e+00> : vector<128xf32>
      %17 = vector.multi_reduction <add>, %13, %cst_10 [0] : vector<8x128xf32> to vector<128xf32>
      %18 = vector.shape_cast %17 : vector<128xf32> to vector<1x128xf32>
      %19 = arith.mulf %13, %13 : vector<8x128xf32>
      %cst_11 = arith.constant dense<0.000000e+00> : vector<128xf32>
      %20 = vector.multi_reduction <add>, %19, %cst_11 [0] : vector<8x128xf32> to vector<128xf32>
      %21 = vector.shape_cast %20 : vector<128xf32> to vector<1x128xf32>
      %22 = tpu.concatenate %18, %21 in 0 : vector<1x128xf32>, vector<1x128xf32> -> vector<2x128xf32>
      %23 = arith.addf %16, %22 : vector<2x128xf32>
      %c0_12 = arith.constant 0 : index
      %c0_13 = arith.constant 0 : index
      %24 = vector.load %arg7[%c0_12, %c0_13] : memref<2x128xf32, #tpu.memory_space<vmem>>, vector<2x128xf32>
      tpu.vector_store %arg7[%c0_12, %c0_13], %23 {strides = array<i32>} : memref<2x128xf32, #tpu.memory_space<vmem>>, vector<2x128xf32>,
    } else {
    }
    %c1_i32 = arith.constant 1 : i32
    %5 = arith.cmpi eq, %arg0, %c1_i32 : i32
    %6 = arith.extui %5 : i1 to i32
    %c0_i32_1 = arith.constant 0 : i32
    %7 = arith.cmpi ne, %6, %c0_i32_1 : i32
    scf.if %7 {
      %8 = arith.index_cast %1 : i32 to index
      %c0 = arith.constant 0 : index
      %9 = vector.load %arg6[%8, %c0] : memref<8x128xf32, #tpu.memory_space<vmem>>, vector<8x128xf32>
      %c0_2 = arith.constant 0 : index
      %c0_3 = arith.constant 0 : index
      %10 = vector.load %arg7[%c0_2, %c0_3] : memref<2x128xf32, #tpu.memory_space<vmem>>, vector<1x128xf32>
      %cst = arith.constant 1.250000e-01 : f32
      %11 = vector.broadcast %cst : f32 to vector<1x128xf32>
      %12 = arith.mulf %10, %11 : vector<1x128xf32>
      %c1 = arith.constant 1 : index
      %c0_4 = arith.constant 0 : index
      %13 = vector.load %arg7[%c1, %c0_4] : memref<2x128xf32, #tpu.memory_space<vmem>>, vector<1x128xf32>
      %cst_5 = arith.constant 1.250000e-01 : f32
      %14 = vector.broadcast %cst_5 : f32 to vector<1x128xf32>
      %15 = arith.mulf %13, %14 : vector<1x128xf32>
      %16 = arith.mulf %12, %12 : vector<1x128xf32>
      %17 = arith.subf %15, %16 : vector<1x128xf32>
      %cst_6 = arith.constant 0.000000e+00 : f32
      %18 = vector.broadcast %cst_6 : f32 to vector<1x128xf32>
      %19 = arith.maximumf %17, %18 : vector<1x128xf32>
      %20 = vector.broadcast %12 : vector<1x128xf32> to vector<8x128xf32>
      %21 = arith.subf %9, %20 : vector<8x128xf32>
      %cst_7 = arith.constant 9.99999974E-6 : f32
      %22 = vector.broadcast %cst_7 : f32 to vector<1x128xf32>
      %23 = arith.addf %19, %22 : vector<1x128xf32>
      %24 = math.rsqrt %23 : vector<1x128xf32>
      %25 = vector.broadcast %24 : vector<1x128xf32> to vector<8x128xf32>
      %26 = arith.mulf %21, %25 : vector<8x128xf32>
      %cst_8 = arith.constant 0.000000e+00 : f32
      %27 = vector.broadcast %cst_8 : f32 to vector<8x128xf32>
      %28 = arith.maximumf %26, %27 : vector<8x128xf32>
      %c0_9 = arith.constant 0 : index
      %c0_10 = arith.constant 0 : index
      %29 = vector.load %arg4[%c0_9, %c0_10] : memref<8x128xbf16, #tpu.memory_space<vmem>>, vector<8x128xbf16>
      %30 = arith.extf %29 : vector<8x128xbf16> to vector<8x128xf32>
      %31 = arith.addf %28, %30 : vector<8x128xf32>
      %cst_11 = arith.constant 0.000000e+00 : f32
      %32 = vector.broadcast %cst_11 : f32 to vector<8x128xf32>
      %33 = arith.maximumf %31, %32 : vector<8x128xf32>
      %34 = tpu.iota {dimensions = array<i32: 0>} : vector<8x1xi32>
      %35 = vector.broadcast %1 : i32 to vector<8x1xi32>
      %36 = arith.addi %35, %34 : vector<8x1xi32>
      %c8_i32_12 = arith.constant 8 : i32
      %37 = vector.broadcast %c8_i32_12 : i32 to vector<8x1xi32>
      %38 = arith.cmpi slt, %36, %37 : vector<8x1xi32>
      %cst_13 = arith.constant 0.000000e+00 : f32
      %39 = vector.shape_cast %38 : vector<8x1xi1> to vector<8x1xi1>
      %40 = vector.broadcast %39 : vector<8x1xi1> to vector<8x128xi1>
      %41 = vector.broadcast %cst_13 : f32 to vector<8x128xf32>
      %42 = arith.select %40, %33, %41 : vector<8x128xi1>, vector<8x128xf32>
      %43 = arith.truncf %42 : vector<8x128xf32> to vector<8x128xbf16>
      %c0_14 = arith.constant 0 : index
      %c0_15 = arith.constant 0 : index
      %44 = vector.load %arg5[%c0_14, %c0_15] : memref<8x128xbf16, #tpu.memory_space<vmem>>, vector<8x128xbf16>
      tpu.vector_store %arg5[%c0_14, %c0_15], %43 {strides = array<i32>} : memref<8x128xbf16, #tpu.memory_space<vmem>>, vector<8x128xbf16>,
    } else {
    }
    return
  }
  func.func @transform_0(%arg0: i32, %arg1: i32) -> (i32, i32) {
    %c1_i32 = arith.constant 1 : i32
    %0 = arith.subi %c1_i32, %arg0 : i32
    %1 = arith.muli %arg1, %0 : i32
    %c0_i32 = arith.constant 0 : i32
    %c0_i32_0 = arith.constant 0 : i32
    return %1, %c0_i32 : i32, i32
  }
  func.func @transform_1(%arg0: i32, %arg1: i32) -> (i32, i32) {
    %c0_i32 = arith.constant 0 : i32
    %c0_i32_0 = arith.constant 0 : i32
    %c0_i32_1 = arith.constant 0 : i32
    return %c0_i32, %c0_i32_0 : i32, i32
  }
  func.func @transform_2(%arg0: i32, %arg1: i32) -> (i32, i32) {
    %0 = arith.muli %arg1, %arg0 : i32
    %c0_i32 = arith.constant 0 : i32
    %c0_i32_0 = arith.constant 0 : i32
    return %0, %c0_i32 : i32, i32
  }
  func.func @transform_3(%arg0: i32, %arg1: i32) -> (i32, i32) {
    %0 = arith.muli %arg1, %arg0 : i32
    %c0_i32 = arith.constant 0 : i32
    %c0_i32_0 = arith.constant 0 : i32
    return %0, %c0_i32 : i32, i32
  }
}

</mosaic_0001>

<bundles_post_ra>
// kernel: _lambda_.20
= control target key start
LH: loop header
LB: loop body
LE: loop exit
PB: predicated region body
PF: predicated region fallthrough
CT: control target
= control target key end

     0   :  { %s966_s9 = smov 0   ;;  %s968_s10 = smov 0   ;;  %s1099_s0 = inlined_call_operand.vmem [shape: bf16[128,128], index: 0, kind: input, shape index: {}]   ;;  %s1100_s1 = inlined_call_operand.vmem [shape: bf16[128,128], index: 1, kind: input, shape index: {}]   ;;  %s1101_s2 = inlined_call_operand.vmem [shape: bf16[128,128], index: 2, kind: output, shape index: {}]  }
   0x1   :  { %s970_s11 = smov 0  }
   0x2 LB: > { %s24_s12 = sadd.s32 1, %s944_s10  ;;  %p741_p0 = scmp.ge.s32.totalorder %s948_s11, 1  ;;  %s948_s11 = sphi %s970_s11, %s12_s11   ;;  %s944_s10 = sphi %s968_s10, %s1105_s10   ;;  %s940_s9 = sphi %s966_s9, %s1104_s9  }
   0x3   : > { %p26_p1 = scmp.ge.s32.totalorder %s24_s12, 2  ;;  %p135_p2 = scmp.lt.s32.totalorder %s948_s11, 3 }
   0x5   : > { %s1107_s12 = smov (%p26_p1, %s24_s12), 0  ;;  %p136_p3 = pnand %p741_p0, %p135_p2 }
   0x6   : > { %p742_p4 = scmp.ne.s32.totalorder (!%p136_p3), %s940_s9, 0 }
   0x7   : > { %139 = sbr.rel (%p136_p3) target bundleno = 295 (0x127), region = 28 }
   0xc   : > { %182 = sbr.rel (%p742_p4) target bundleno = 243 (0xf3), region = 32 }
  0x11   : > { %v827_v0 = vld [vmem:[%s1100_s1 + $0x38] sm:$0xff]  ;;  %v826_v1 = vld [vmem:[%s1100_s1 + $0x30] sm:$0xff]  ;;  %v825_v2 = vld [vmem:[%s1100_s1 + $0x28] sm:$0xff]  ;;  %v950_v27 = vmov 0.0   ;;  %vm441_vm0 = vcmask 1040384  }
  0x12   : > { %316 = vmatpush.bf16.msra.mxu0 %v827_v0  ;;  %875 = vmatpush.bf16.msra.mxu1 %v827_v0  ;;  %v824_v3 = vld [vmem:[%s1100_s1 + $0x20] sm:$0xff]  ;;  %v823_v4 = vld [vmem:[%s1100_s1 + $0x18] sm:$0xff]  ;;  %v822_v5 = vld [vmem:[%s1100_s1 + $0x10] sm:$0xff]  ;;  %187 = vst [vmem:[#allocation3] sm:$0x3] %v950_v27 }
  0x13   : > { %876 = vmatpush.bf16.msra.mxu2 %v827_v0  ;;  %877 = vmatpush.bf16.msra.mxu3 %v827_v0  ;;  %v821_v6 = vld [vmem:[%s1100_s1 + $0x8] sm:$0xff]  ;;  %v820_v7 = vld [vmem:[%s1100_s1] sm:$0xff]  ;;  %v814_v9 = vld [vmem:[%s1099_s0 + $0x10] sm:$0xff] }
  0x14   : > { %v812_v8 = vld [vmem:[%s1099_s0] sm:$0xff]  ;;  %v818_v11 = vld [vmem:[%s1099_s0 + $0x30] sm:$0xff]  ;;  %v813_v12 = vld [vmem:[%s1099_s0 + $0x8] sm:$0xff] }
  0x15   : > { %v816_v10 = vld [vmem:[%s1099_s0 + $0x20] sm:$0xff]  ;;  %v815_v13 = vld [vmem:[%s1099_s0 + $0x18] sm:$0xff]  ;;  %v817_v14 = vld [vmem:[%s1099_s0 + $0x28] sm:$0xff] }
  0x16   : > { %317 = vmatpush.bf16.msra.mxu0 %v826_v1  ;;  %878 = vmatpush.bf16.msra.mxu1 %v826_v1  ;;  %v819_v15 = vld [vmem:[%s1099_s0 + $0x38] sm:$0xff] }
  0x17   : > { %879 = vmatpush.bf16.msra.mxu2 %v826_v1  ;;  %880 = vmatpush.bf16.msra.mxu3 %v826_v1 }
  0x1a   : > { %318 = vmatpush.bf16.msra.mxu0 %v825_v2  ;;  %881 = vmatpush.bf16.msra.mxu1 %v825_v2 }
  0x1b   : > { %882 = vmatpush.bf16.msra.mxu2 %v825_v2  ;;  %883 = vmatpush.bf16.msra.mxu3 %v825_v2 }
  0x1e   : > { %319 = vmatpush.bf16.msra.mxu0 %v824_v3  ;;  %884 = vmatpush.bf16.msra.mxu1 %v824_v3 }
  0x1f   : > { %885 = vmatpush.bf16.msra.mxu2 %v824_v3  ;;  %886 = vmatpush.bf16.msra.mxu3 %v824_v3 }
  0x22   : > { %320 = vmatpush.bf16.msra.mxu0 %v823_v4  ;;  %887 = vmatpush.bf16.msra.mxu1 %v823_v4 }
  0x23   : > { %888 = vmatpush.bf16.msra.mxu2 %v823_v4  ;;  %889 = vmatpush.bf16.msra.mxu3 %v823_v4 }
  0x26   : > { %321 = vmatpush.bf16.msra.mxu0 %v822_v5  ;;  %890 = vmatpush.bf16.msra.mxu1 %v822_v5 }
  0x27   : > { %891 = vmatpush.bf16.msra.mxu2 %v822_v5  ;;  %892 = vmatpush.bf16.msra.mxu3 %v822_v5 }
  0x2a   : > { %322 = vmatpush.bf16.msra.mxu0 %v821_v6  ;;  %893 = vmatpush.bf16.msra.mxu1 %v821_v6 }
  0x2b   : > { %894 = vmatpush.bf16.msra.mxu2 %v821_v6  ;;  %895 = vmatpush.bf16.msra.mxu3 %v821_v6 }
  0x2e   : > { %323 = vmatpush.bf16.msra.mxu0 %v820_v7  ;;  %896 = vmatpush.bf16.msra.mxu1 %v820_v7 }
  0x2f   : > { %897 = vmatpush.bf16.msra.mxu2 %v820_v7  ;;  %898 = vmatpush.bf16.msra.mxu3 %v820_v7 }
  0x31   : > { %324 = vmatmul.bf16.vlgmr.msra.gmra.mxu0 %v812_v8  ;;  %334 = vmatmul.bf16.vlgmr.msra.gmra.mxu1 %v814_v9 }
  0x32   : > { %344 = vmatmul.bf16.vlgmr.msra.gmra.mxu2 %v816_v10  ;;  %354 = vmatmul.bf16.vlgmr.msra.gmra.mxu3 %v818_v11 }
  0x41   : > { %329 = vmatmul.bf16.gmra.mxu0 %v813_v12  ;;  %339 = vmatmul.bf16.gmra.mxu1 %v815_v13 }
  0x42   : > { %349 = vmatmul.bf16.gmra.mxu2 %v817_v14  ;;  %359 = vmatmul.bf16.gmra.mxu3 %v819_v15 }
  0xae   : > { %v325_v16 = vpop.f32.mrf.mxu0  ;;  %v335_v17 = vpop.f32.mrf.mxu1 }
  0xaf   : > { %366 = vst [vmem:[#allocation2 + $0x30] sm:$0xff] %v325_v16  ;;  %v404_v28 = vmul.f32 %v325_v16, %v325_v16  ;;  %v408_v40 = vmul.f32 %v335_v17, %v335_v17 }
  0xb0   : > { %370 = vst [vmem:[#allocation2 + $0x50] sm:$0xff] %v335_v17 }
  0xb5   : > { %v345_v18 = vpop.f32.mrf.mxu2  ;;  %v1035_v19 = vpop.f32.mrf.mxu3 }
  0xb6   : > { %v327_v20 = vpop.f32.mrf.mxu0  ;;  %v337_v21 = vpop.f32.mrf.mxu1  ;;  %374 = vst [vmem:[#allocation2 + $0x40] sm:$0xff] %v345_v18  ;;  %v412_v54 = vmul.f32 %v345_v18, %v345_v18  ;;  %v416_v2 = vmul.f32 %v1035_v19, %v1035_v19 }
  0xb7   : > { %367 = vst [vmem:[#allocation2] sm:$0xff] %v327_v20  ;;  %v405_v26 = vmul.f32 %v327_v20, %v327_v20  ;;  %v383_v29 = vadd.f32 %v327_v20, %v325_v16  ;;  %v409_v43 = vmul.f32 %v337_v21, %v337_v21 }
  0xb8   : > { %371 = vst [vmem:[#allocation2 + $0x68] sm:$0xff] %v337_v21 }
  0xb9   : > { %378 = vst [vmem:[#allocation2 + $0x60] sm:$0xff] %v1035_v19  ;;  %v420_v31 = vadd.f32 %v405_v26, %v404_v28  ;;  %v382_v26 = vld [vmem:[#allocation3] sm:$0x3] }
  0xbd   : > { %v347_v22 = vpop.f32.mrf.mxu2  ;;  %v357_v23 = vpop.f32.mrf.mxu3 }
  0xbe   : > { %v330_v24 = vpop.f32.mrf.mxu0  ;;  %v340_v25 = vpop.f32.mrf.mxu1  ;;  %375 = vst [vmem:[#allocation2 + $0x20] sm:$0xff] %v347_v22  ;;  %v413_v57 = vmul.f32 %v347_v22, %v347_v22  ;;  %v417_v5 = vmul.f32 %v357_v23, %v357_v23 }
  0xbf   : > { %368 = vst [vmem:[#allocation2 + $0x58] sm:$0xff] %v330_v24  ;;  %v406_v30 = vmul.f32 %v330_v24, %v330_v24  ;;  %v384_v32 = vadd.f32 %v383_v29, %v330_v24  ;;  %v410_v46 = vmul.f32 %v340_v25, %v340_v25 }
  0xc0   : > { %372 = vst [vmem:[#allocation2 + $0x8] sm:$0xff] %v340_v25 }
  0xc1   : > { %379 = vst [vmem:[#allocation2 + $0x70] sm:$0xff] %v357_v23  ;;  %v421_v37 = vadd.f32 %v420_v31, %v406_v30 }
  0xc5   : > { %v350_v33 = vpop.f32.mrf.mxu2  ;;  %v360_v34 = vpop.f32.mrf.mxu3 }
  0xc6   : > { %v332_v35 = vpop.f32.mrf.mxu0  ;;  %v342_v36 = vpop.f32.mrf.mxu1  ;;  %376 = vst [vmem:[#allocation2 + $0x10] sm:$0xff] %v350_v33  ;;  %v414_v61 = vmul.f32 %v350_v33, %v350_v33  ;;  %v418_v9 = vmul.f32 %v360_v34, %v360_v34 }
  0xc7   : > { %369 = vst [vmem:[#allocation2 + $0x18] sm:$0xff] %v332_v35  ;;  %v385_v38 = vadd.f32 %v384_v32, %v332_v35  ;;  %v407_v39 = vmul.f32 %v332_v35, %v332_v35  ;;  %v411_v52 = vmul.f32 %v342_v36, %v342_v36 }
  0xc8   : > { %373 = vst [vmem:[#allocation2 + $0x48] sm:$0xff] %v342_v36 }
  0xc9   : > { %v386_v41 = vadd.f32 %v385_v38, %v335_v17  ;;  %v422_v42 = vadd.f32 %v421_v37, %v407_v39  ;;  %380 = vst [vmem:[#allocation2 + $0x78] sm:$0xff] %v360_v34 }
  0xcb   : > { %v423_v44 = vadd.f32 %v422_v42, %v408_v40  ;;  %v387_v45 = vadd.f32 %v386_v41, %v337_v21 }
  0xcd   : > { %v388_v47 = vadd.f32 %v387_v45, %v340_v25  ;;  %v424_v48 = vadd.f32 %v423_v44, %v409_v43  ;;  %v352_v49 = vpop.f32.mrf.mxu2  ;;  %v362_v50 = vpop.f32.mrf.mxu3 }
  0xce   : > { %377 = vst [vmem:[#allocation2 + $0x38] sm:$0xff] %v352_v49  ;;  %v415_v1 = vmul.f32 %v352_v49, %v352_v49  ;;  %v419_v13 = vmul.f32 %v362_v50, %v362_v50 }
  0xcf   : > { %v389_v51 = vadd.f32 %v388_v47, %v342_v36  ;;  %v425_v53 = vadd.f32 %v424_v48, %v410_v46  ;;  %381 = vst [vmem:[#allocation2 + $0x28] sm:$0xff] %v362_v50 }
  0xd1   : > { %v390_v55 = vadd.f32 %v389_v51, %v345_v18  ;;  %v426_v56 = vadd.f32 %v425_v53, %v411_v52 }
  0xd3   : > { %v427_v58 = vadd.f32 %v426_v56, %v412_v54  ;;  %v391_v59 = vadd.f32 %v390_v55, %v347_v22 }
  0xd5   : > { %v392_v60 = vadd.f32 %v391_v59, %v350_v33  ;;  %v428_v62 = vadd.f32 %v427_v58, %v413_v57 }
  0xd7   : > { %v429_v63 = vadd.f32 %v428_v62, %v414_v61  ;;  %v393_v0 = vadd.f32 %v392_v60, %v352_v49 }
  0xd9   : > { %v394_v3 = vadd.f32 %v393_v0, %v1035_v19  ;;  %v430_v4 = vadd.f32 %v429_v63, %v415_v1 }
  0xdb   : > { %v431_v6 = vadd.f32 %v430_v4, %v416_v2  ;;  %v395_v7 = vadd.f32 %v394_v3, %v357_v23 }
  0xdd   : > { %v396_v8 = vadd.f32 %v395_v7, %v360_v34  ;;  %v432_v10 = vadd.f32 %v431_v6, %v417_v5 }
  0xdf   : > { %v433_v11 = vadd.f32 %v432_v10, %v418_v9  ;;  %v397_v12 = vadd.f32 %v396_v8, %v362_v50 }
  0xe1   : > { %v398_v14 = vrot.slane %v397_v12, 4  ;;  %v434_v15 = vadd.f32 %v433_v11, %v419_v13 }
  0xe3   : > { %v399_v16 = vadd.f32 %v398_v14, %v397_v12  ;;  %v435_v17 = vrot.slane %v434_v15, 4 }
  0xe5   : > { %v400_v18 = vrot.slane %v399_v16, 2  ;;  %v436_v20 = vadd.f32 %v435_v17, %v434_v15 }
  0xe7   : > { %v401_v21 = vadd.f32 %v400_v18, %v399_v16  ;;  %v437_v22 = vrot.slane %v436_v20, 2 }
  0xe9   : > { %v402_v24 = vrot.slane %v401_v21, 1  ;;  %v438_v19 = vadd.f32 %v437_v22, %v436_v20 }
  0xeb   : > { %v439_v25 = vrot.slane %v438_v19, 1  ;;  %v403_v23 = vadd.f32 %v402_v24, %v401_v21 }
  0xed   : > { %v440_v27 = vadd.f32 %v439_v25, %v438_v19 }
  0xef   : > { %v442_v28 = vsel %vm441_vm0, %v403_v23, %v440_v27 }
  0xf0   : > { %v443_v29 = vadd.f32 %v442_v28, %v382_v26 }
  0xf2   : > { %444 = vst [vmem:[#allocation3] sm:$0x3] %v443_v29 }
  0xf3 PF: > { %p807_p5 = scmp.ne.s32.totalorder %s940_s9, 1 }
  0xf5   : > { %448 = sbr.rel (%p807_p5) target bundleno = 295 (0x127), region = 40 }
  0xfa   : > { %v466_v30 = vld [vmem:[#allocation3] sm:$0x1]  ;;  %v468_v32 = vld [vmem:[#allocation3 + $0x1] sm:$0x1]  ;;  %v450_v41 = vld [vmem:[#allocation2 + $0x30] sm:$0xff] }
  0xfb   : > { %v467_v31 = vmul.f32 0.0078125, %v466_v30  ;;  %v469_v33 = vmul.f32 0.0078125, %v468_v32  ;;  %v451_v42 = vld [vmem:[#allocation2] sm:$0xff]  ;;  %v452_v45 = vld [vmem:[#allocation2 + $0x58] sm:$0xff]  ;;  %v454_v47 = vld [vmem:[#allocation2 + $0x50] sm:$0xff] }
  0xfc   : > { %v453_v46 = vld [vmem:[#allocation2 + $0x18] sm:$0xff]  ;;  %v455_v49 = vld [vmem:[#allocation2 + $0x68] sm:$0xff]  ;;  %v458_v53 = vld [vmem:[#allocation2 + $0x40] sm:$0xff] }
  0xfd   : > { %v470_v34 = vmul.f32 %v467_v31, %v467_v31  ;;  %v1042_v43 = vperm.slane %v467_v31, 0  ;;  %v456_v50 = vld [vmem:[#allocation2 + $0x8] sm:$0xff]  ;;  %v459_v54 = vld [vmem:[#allocation2 + $0x20] sm:$0xff]  ;;  %v460_v58 = vld [vmem:[#allocation2 + $0x10] sm:$0xff] }
  0xfe   : > { %v457_v51 = vld [vmem:[#allocation2 + $0x48] sm:$0xff]  ;;  %v461_v59 = vld [vmem:[#allocation2 + $0x38] sm:$0xff]  ;;  %v462_v60 = vld [vmem:[#allocation2 + $0x60] sm:$0xff] }
  0xff   : > { %v471_v35 = vsub.f32 %v469_v33, %v470_v34  ;;  %v474_v55 = vsub.f32 %v450_v41, %v1042_v43  ;;  %v475_v56 = vsub.f32 %v451_v42, %v1042_v43  ;;  %v476_v61 = vsub.f32 %v452_v45, %v1042_v43  ;;  %v463_v1 = vld [vmem:[#allocation2 + $0x70] sm:$0xff]  ;;  %v464_v2 = vld [vmem:[#allocation2 + $0x78] sm:$0xff]  ;;  %v465_v3 = vld [vmem:[#allocation2 + $0x28] sm:$0xff] }
 0x100   : > { %v477_v62 = vsub.f32 %v453_v46, %v1042_v43  ;;  %v478_v63 = vsub.f32 %v454_v47, %v1042_v43  ;;  %v479_v0 = vsub.f32 %v455_v49, %v1042_v43  ;;  %v480_v5 = vsub.f32 %v456_v50, %v1042_v43 }
 0x101   : > { %v472_v36 = vmax.f32 %v471_v35, 0.0  ;;  %v481_v6 = vsub.f32 %v457_v51, %v1042_v43  ;;  %v482_v7 = vsub.f32 %v458_v53, %v1042_v43  ;;  %v483_v9 = vsub.f32 %v459_v54, %v1042_v43 }
 0x102   : > { %v484_v10 = vsub.f32 %v460_v58, %v1042_v43  ;;  %v485_v11 = vsub.f32 %v461_v59, %v1042_v43  ;;  %v486_v12 = vsub.f32 %v462_v60, %v1042_v43  ;;  %v487_v13 = vsub.f32 %v463_v1, %v1042_v43 }
 0x103   : > { %v490_v37 = vadd.f32 1e-05, %v472_v36  ;;  %v488_v14 = vsub.f32 %v464_v2, %v1042_v43  ;;  %v489_v15 = vsub.f32 %v465_v3, %v1042_v43 }
 0x105   : > { %924 = vrsqrt.f32 %v490_v37  ;;  %vm497_vm1 = vweird.f32 %v490_v37 }
 0x10b   : > { %v925_v38 = vpop.eup %924 }
 0x10c   : > { %v492_v39 = vmul.f32 %v925_v38, %v490_v37  ;;  %vm498_vm2 = vweird.f32 %v925_v38 }
 0x10d   : > { %vm1044_vm3 = vmor %vm497_vm1, %vm498_vm2 }
 0x10e   : > { %v493_v40 = vmul.f32 %v925_v38, %v492_v39 }
 0x110   : > { %v494_v44 = vmul.f32 0.5, %v493_v40 }
 0x112   : > { %v495_v48 = vsub.f32 1.5, %v494_v44 }
 0x114   : > { %v496_v57 = vmul.f32 %v925_v38, %v495_v48 }
 0x116   : > { %v500_v4 = vsel %vm1044_vm3, %v925_v38, %v496_v57 }
 0x117   : > { %v501_v8 = vperm.slane %v500_v4, 0 }
 0x119   : > { %v502_v16 = vmul.f32 %v501_v8, %v474_v55  ;;  %v503_v17 = vmul.f32 %v501_v8, %v475_v56  ;;  %v504_v18 = vmul.f32 %v501_v8, %v476_v61  ;;  %v505_v20 = vmul.f32 %v501_v8, %v477_v62 }
 0x11a   : > { %v506_v21 = vmul.f32 %v501_v8, %v478_v63  ;;  %v507_v22 = vmul.f32 %v501_v8, %v479_v0  ;;  %v508_v24 = vmul.f32 %v501_v8, %v480_v5  ;;  %v509_v19 = vmul.f32 %v501_v8, %v481_v6 }
 0x11b   : > { %v518_v25 = vmax.f32 %v502_v16, 0.0  ;;  %v519_v26 = vmax.f32 %v503_v17, 0.0  ;;  %v520_v23 = vmax.f32 %v504_v18, 0.0  ;;  %v521_v27 = vmax.f32 %v505_v20, 0.0 }
 0x11c   : > { %v522_v28 = vmax.f32 %v506_v21, 0.0  ;;  %v523_v29 = vmax.f32 %v507_v22, 0.0  ;;  %v524_v30 = vmax.f32 %v508_v24, 0.0  ;;  %v525_v31 = vmax.f32 %v509_v19, 0.0 }
 0x11d   : > { %v831_v32 = vpack.c.bf16 %v519_v26, %v518_v25  ;;  %v836_v33 = vpack.c.bf16 %v521_v27, %v520_v23  ;;  %v510_v34 = vmul.f32 %v501_v8, %v482_v7  ;;  %v511_v35 = vmul.f32 %v501_v8, %v483_v9 }
 0x11e   : > { %v841_v36 = vpack.c.bf16 %v523_v29, %v522_v28  ;;  %v846_v37 = vpack.c.bf16 %v525_v31, %v524_v30  ;;  %v512_v38 = vmul.f32 %v501_v8, %v484_v10  ;;  %v513_v39 = vmul.f32 %v501_v8, %v485_v11 }
 0x11f   : > { %832 = vst [vmem:[%s1101_s2] sm:$0xff] %v831_v32   ;;  %v526_v40 = vmax.f32 %v510_v34, 0.0  ;;  %v527_v41 = vmax.f32 %v511_v35, 0.0  ;;  %v514_v42 = vmul.f32 %v501_v8, %v486_v12  ;;  %v515_v43 = vmul.f32 %v501_v8, %v487_v13 }
 0x120   : > { %868 = vst [vmem:[%s1101_s2 + $0x8] sm:$0xff] %v836_v33   ;;  %v528_v44 = vmax.f32 %v512_v38, 0.0  ;;  %v529_v45 = vmax.f32 %v513_v39, 0.0  ;;  %v516_v46 = vmul.f32 %v501_v8, %v488_v14  ;;  %v517_v47 = vmul.f32 %v501_v8, %v489_v15 }
 0x121   : > { %869 = vst [vmem:[%s1101_s2 + $0x10] sm:$0xff] %v841_v36   ;;  %v851_v48 = vpack.c.bf16 %v527_v41, %v526_v40  ;;  %v530_v49 = vmax.f32 %v514_v42, 0.0  ;;  %v531_v50 = vmax.f32 %v515_v43, 0.0 }
 0x122   : > { %870 = vst [vmem:[%s1101_s2 + $0x18] sm:$0xff] %v846_v37   ;;  %v856_v51 = vpack.c.bf16 %v529_v45, %v528_v44  ;;  %v532_v52 = vmax.f32 %v516_v46, 0.0  ;;  %v533_v53 = vmax.f32 %v517_v47, 0.0 }
 0x123   : > { %871 = vst [vmem:[%s1101_s2 + $0x20] sm:$0xff] %v851_v48   ;;  %v861_v54 = vpack.c.bf16 %v531_v50, %v530_v49 }
 0x124   : > { %872 = vst [vmem:[%s1101_s2 + $0x28] sm:$0xff] %v856_v51   ;;  %v866_v55 = vpack.c.bf16 %v533_v53, %v532_v52 }
 0x125   : > { %873 = vst [vmem:[%s1101_s2 + $0x30] sm:$0xff] %v861_v54  }
 0x126   : > { %874 = vst [vmem:[%s1101_s2 + $0x38] sm:$0xff] %v866_v55  }
 0x127 PF: > { %s12_s11 = sadd.s32 1, %s948_s11   ;;  %s1104_s9 = smov %s944_s10 }
 0x128   : > { %p9_p6 = scmp.ge.s32.totalorder %s12_s11, 4   ;;  %s1105_s10 = smov %s1107_s12 }
 0x12a   :  { %11 = sbr.rel (!%p9_p6) target bundleno = 2 (0x2), region = 72 }

// kernel: _lambda_.19
= control target key start
LH: loop header
LB: loop body
LE: loop exit
PB: predicated region body
PF: predicated region fallthrough
CT: control target
= control target key end

     0   :  { %s1123_s9 = smov 0   ;;  %s1125_s10 = smov 0   ;;  %s1354_s0 = inlined_call_operand.vmem [shape: bf16[128,152], index: 0, kind: input, shape index: {}]   ;;  %s1355_s1 = inlined_call_operand.vmem [shape: bf16[152,128], index: 1, kind: input, shape index: {}]   ;;  %s1356_s2 = inlined_call_operand.vmem [shape: bf16[128,128], index: 2, kind: output, shape index: {}]  }
   0x1   :  { %s1127_s11 = smov 0  }
   0x2 LB: > { %s24_s12 = sadd.s32 1, %s1101_s10  ;;  %p859_p0 = scmp.ge.s32.totalorder %s1105_s11, 1  ;;  %s1105_s11 = sphi %s1127_s11, %s12_s11   ;;  %s1101_s10 = sphi %s1125_s10, %s1360_s10   ;;  %s1097_s9 = sphi %s1123_s9, %s1359_s9  }
   0x3   : > { %p26_p1 = scmp.ge.s32.totalorder %s24_s12, 2  ;;  %p136_p2 = scmp.lt.s32.totalorder %s1105_s11, 3 }
   0x5   : > { %s1362_s12 = smov (%p26_p1, %s24_s12), 0  ;;  %p137_p3 = pnand %p859_p0, %p136_p2 }
   0x6   : > { %p860_p4 = scmp.ne.s32.totalorder (!%p137_p3), %s1097_s9, 0 }
   0x7   : > { %140 = sbr.rel (%p137_p3) target bundleno = 321 (0x141), region = 28 }
   0xc   : > { %186 = sbr.rel (%p860_p4) target bundleno = 269 (0x10d), region = 32 }
  0x11   : > { %v997_v0 = vld [vmem:[%s1355_s1 + $0x38] sm:$0xff]  ;;  %v226_v1 = vld [vmem:[%s1355_s1 + $0x48] sm:$0xf]  ;;  %vm381_vm0 = vcmask 1043456   ;;  %v996_v3 = vld [vmem:[%s1355_s1 + $0x30] sm:$0xff]  ;;  %vm356_vm1 = vcmask 195584  }
  0x12   : > { %v336_v2 = vunpack.c.l.b16 %v226_v1  ;;  %385 = vmatpush.bf16.msra.mxu0 %v997_v0  ;;  %1046 = vmatpush.bf16.msra.mxu2 %v997_v0  ;;  %v998_v6 = vld [vmem:[%s1355_s1 + $0x40] sm:$0xff]  ;;  %v995_v7 = vld [vmem:[%s1355_s1 + $0x28] sm:$0xff]  ;;  %v993_v12 = vld [vmem:[%s1355_s1 + $0x18] sm:$0xff]  ;;  %vm559_vm2 = vcmask 1040384  }
  0x13   : > { %v974_v8 = vld [vmem:[%s1354_s0 + $0x4] sm:$0xf]  ;;  %v865_v9 = vld [vmem:[%s1354_s0 + $0x8] sm:$0xf0]  ;;  %v984_v13 = vld [vmem:[%s1354_s0 + $0x54] sm:$0xf] }
  0x14   : > { %v346_v4 = vpack.c.b16 %v336_v2, %v336_v2  ;;  %v868_v10 = vor.u32 %v974_v8, %v865_v9  ;;  %v994_v11 = vld [vmem:[%s1355_s1 + $0x20] sm:$0xff]  ;;  %v905_v14 = vld [vmem:[%s1354_s0 + $0x58] sm:$0xf0]  ;;  %v992_v15 = vld [vmem:[%s1355_s1 + $0x10] sm:$0xff] }
  0x15   : > { %v908_v16 = vor.u32 %v984_v13, %v905_v14  ;;  %v991_v17 = vld [vmem:[%s1355_s1 + $0x8] sm:$0xff]  ;;  %v976_v18 = vld [vmem:[%s1354_s0 + $0x14] sm:$0xf]  ;;  %v873_v19 = vld [vmem:[%s1354_s0 + $0x18] sm:$0xf0] }
  0x16   : > { %v383_v5 = vsel %vm381_vm0, %v346_v4, 0  ;;  %386 = vmatpush.bf16.msra.mxu0 %v996_v3  ;;  %1047 = vmatpush.bf16.msra.mxu2 %v996_v3  ;;  %v876_v20 = vor.u32 %v976_v18, %v873_v19  ;;  %v990_v21 = vld [vmem:[%s1355_s1] sm:$0xff]  ;;  %v975_v23 = vld [vmem:[%s1354_s0 + $0x4] sm:$0xf0]  ;;  %v913_v29 = vld [vmem:[%s1354_s0 + $0x68] sm:$0xf0] }
  0x17   : > { %440 = vmatpush.bf16.msra.mxu1 %v383_v5  ;;  %1054 = vmatpush.bf16.msra.mxu3 %v383_v5  ;;  %v863_v22 = vld [vmem:[%s1354_s0] sm:$0xf]  ;;  %v983_v25 = vld [vmem:[%s1354_s0 + $0x44] sm:$0xf0]  ;;  %v986_v28 = vld [vmem:[%s1354_s0 + $0x64] sm:$0xf] }
  0x18   : > { %v895_v24 = vld [vmem:[%s1354_s0 + $0x40] sm:$0xf]  ;;  %v864_v26 = vor.u32 %v975_v23, %v863_v22  ;;  %v916_v30 = vor.u32 %v986_v28, %v913_v29  ;;  %v978_v31 = vld [vmem:[%s1354_s0 + $0x24] sm:$0xf]  ;;  %v881_v32 = vld [vmem:[%s1354_s0 + $0x28] sm:$0xf0] }
  0x19   : > { %v896_v27 = vor.u32 %v983_v25, %v895_v24  ;;  %v884_v33 = vor.u32 %v978_v31, %v881_v32  ;;  %v871_v34 = vld [vmem:[%s1354_s0 + $0x10] sm:$0xf]  ;;  %v977_v35 = vld [vmem:[%s1354_s0 + $0x14] sm:$0xf0]  ;;  %v988_v40 = vld [vmem:[%s1354_s0 + $0x74] sm:$0xf] }
  0x1a   : > { %387 = vmatpush.bf16.msra.mxu0 %v995_v7  ;;  %1048 = vmatpush.bf16.msra.mxu2 %v995_v7  ;;  %v903_v36 = vld [vmem:[%s1354_s0 + $0x50] sm:$0xf]  ;;  %v985_v37 = vld [vmem:[%s1354_s0 + $0x54] sm:$0xf0]  ;;  %v872_v38 = vor.u32 %v977_v35, %v871_v34  ;;  %v921_v41 = vld [vmem:[%s1354_s0 + $0x78] sm:$0xf0] }
  0x1b   : > { %441 = vmatpush.bf16.msra.mxu1 %v998_v6  ;;  %1055 = vmatpush.bf16.msra.mxu3 %v998_v6  ;;  %v904_v39 = vor.u32 %v985_v37, %v903_v36  ;;  %v924_v42 = vor.u32 %v988_v40, %v921_v41  ;;  %v980_v43 = vld [vmem:[%s1354_s0 + $0x34] sm:$0xf]  ;;  %v889_v44 = vld [vmem:[%s1354_s0 + $0x38] sm:$0xf0]  ;;  %v879_v46 = vld [vmem:[%s1354_s0 + $0x20] sm:$0xf] }
  0x1c   : > { %v892_v45 = vor.u32 %v980_v43, %v889_v44  ;;  %v979_v47 = vld [vmem:[%s1354_s0 + $0x24] sm:$0xf0]  ;;  %v911_v48 = vld [vmem:[%s1354_s0 + $0x60] sm:$0xf]  ;;  %v982_v52 = vld [vmem:[%s1354_s0 + $0x44] sm:$0xf] }
  0x1d   : > { %v987_v49 = vld [vmem:[%s1354_s0 + $0x64] sm:$0xf0]  ;;  %v880_v50 = vor.u32 %v979_v47, %v879_v46  ;;  %v897_v53 = vld [vmem:[%s1354_s0 + $0x48] sm:$0xf0]  ;;  %v887_v55 = vld [vmem:[%s1354_s0 + $0x30] sm:$0xf] }
  0x1e   : > { %961 = vmatmul.msk.bf16.vlgmr.msra.gmra.mxu1 %vm356_vm1, %v868_v10  ;;  %388 = vmatpush.bf16.msra.mxu0 %v994_v11  ;;  %v912_v51 = vor.u32 %v987_v49, %v911_v48  ;;  %v900_v54 = vor.u32 %v982_v52, %v897_v53  ;;  %v981_v56 = vld [vmem:[%s1354_s0 + $0x34] sm:$0xf0]  ;;  %v919_v57 = vld [vmem:[%s1354_s0 + $0x70] sm:$0xf] }
  0x1f   : > { %1049 = vmatpush.bf16.msra.mxu2 %v994_v11  ;;  %966 = vmatmul.msk.bf16.vlgmr.msra.gmra.mxu3 %vm356_vm1, %v908_v16  ;;  %v989_v58 = vld [vmem:[%s1354_s0 + $0x74] sm:$0xf0]  ;;  %v888_v59 = vor.u32 %v981_v56, %v887_v55 }
  0x20   : > { %v920_v60 = vor.u32 %v989_v58, %v919_v57 }
  0x22   : > { %389 = vmatpush.bf16.msra.mxu0 %v993_v12 }
  0x23   : > { %1050 = vmatpush.bf16.msra.mxu2 %v993_v12 }
  0x26   : > { %390 = vmatpush.bf16.msra.mxu0 %v992_v15 }
  0x27   : > { %1051 = vmatpush.bf16.msra.mxu2 %v992_v15 }
  0x2a   : > { %391 = vmatpush.bf16.msra.mxu0 %v991_v17 }
  0x2b   : > { %1052 = vmatpush.bf16.msra.mxu2 %v991_v17 }
  0x2e   : > { %962 = vmatmul.msk.bf16.gmra.mxu1 %vm356_vm1, %v876_v20  ;;  %392 = vmatpush.bf16.msra.mxu0 %v990_v21 }
  0x2f   : > { %1053 = vmatpush.bf16.msra.mxu2 %v990_v21  ;;  %967 = vmatmul.msk.bf16.gmra.mxu3 %vm356_vm1, %v916_v30  ;;  %v1107_v30 = vmov 0.0  }
  0x30   : > { %191 = vst [vmem:[#allocation3] sm:$0x3] %v1107_v30 }
  0x31   : > { %393 = vmatmul.bf16.vlgmr.msra.gmra.mxu0 %v864_v26 }
  0x32   : > { %413 = vmatmul.bf16.vlgmr.msra.gmra.mxu2 %v896_v27 }
  0x3e   : > { %963 = vmatmul.msk.bf16.gmra.mxu1 %vm356_vm1, %v884_v33 }
  0x3f   : > { %968 = vmatmul.msk.bf16.gmra.mxu3 %vm356_vm1, %v924_v42 }
  0x41   : > { %398 = vmatmul.bf16.gmra.mxu0 %v872_v38 }
  0x42   : > { %418 = vmatmul.bf16.gmra.mxu2 %v904_v39 }
  0x4e   : > { %964 = vmatmul.msk.bf16.gmra.mxu1 %vm356_vm1, %v892_v45 }
  0x51   : > { %403 = vmatmul.bf16.gmra.mxu0 %v880_v50 }
  0x52   : > { %423 = vmatmul.bf16.gmra.mxu2 %v912_v51 }
  0x5e   : > { %965 = vmatmul.msk.bf16.gmra.mxu1 %vm356_vm1, %v900_v54 }
  0x61   : > { %408 = vmatmul.bf16.gmra.mxu0 %v888_v59 }
  0x62   : > { %428 = vmatmul.bf16.gmra.mxu2 %v920_v60 }
  0x9b   : > { %v443_v61 = vpop.f32.mrf.mxu1 }
  0xa2   : > { %v468_v6 = vpop.f32.mrf.mxu3 }
  0xa3   : > { %v445_v62 = vpop.f32.mrf.mxu1 }
  0xaa   : > { %v470_v12 = vpop.f32.mrf.mxu3 }
  0xab   : > { %v448_v63 = vpop.f32.mrf.mxu1 }
  0xae   : > { %v394_v0 = vpop.f32.mrf.mxu0 }
  0xaf   : > { %v444_v1 = vadd.f32 %v443_v61, %v394_v0 }
  0xb1   : > { %484 = vst [vmem:[#allocation2 + $0x30] sm:$0xff] %v444_v1  ;;  %v522_v33 = vmul.f32 %v444_v1, %v444_v1 }
  0xb2   : > { %v473_v19 = vpop.f32.mrf.mxu3 }
  0xb3   : > { %v450_v2 = vpop.f32.mrf.mxu1 }
  0xb5   : > { %v414_v3 = vpop.f32.mrf.mxu2 }
  0xb6   : > { %v396_v4 = vpop.f32.mrf.mxu0 }
  0xb7   : > { %v446_v5 = vadd.f32 %v445_v62, %v396_v4 }
  0xb9   : > { %485 = vst [vmem:[#allocation2] sm:$0xff] %v446_v5  ;;  %v523_v31 = vmul.f32 %v446_v5, %v446_v5  ;;  %v501_v34 = vadd.f32 %v446_v5, %v444_v1 }
  0xba   : > { %v475_v28 = vpop.f32.mrf.mxu3 }
  0xbb   : > { %v453_v7 = vpop.f32.mrf.mxu1  ;;  %v538_v39 = vadd.f32 %v523_v31, %v522_v33 }
  0xbd   : > { %v416_v8 = vpop.f32.mrf.mxu2 }
  0xbe   : > { %v399_v9 = vpop.f32.mrf.mxu0 }
  0xbf   : > { %v449_v10 = vadd.f32 %v448_v63, %v399_v9 }
  0xc1   : > { %486 = vst [vmem:[#allocation2 + $0x58] sm:$0xff] %v449_v10  ;;  %v524_v35 = vmul.f32 %v449_v10, %v449_v10  ;;  %v502_v40 = vadd.f32 %v501_v34, %v449_v10 }
  0xc2   : > { %v478_v46 = vpop.f32.mrf.mxu3 }
  0xc3   : > { %v455_v11 = vpop.f32.mrf.mxu1  ;;  %v539_v43 = vadd.f32 %v538_v39, %v524_v35 }
  0xc5   : > { %v419_v13 = vpop.f32.mrf.mxu2 }
  0xc6   : > { %v401_v14 = vpop.f32.mrf.mxu0  ;;  %v1278_v15 = vadd.f32 %v468_v6, %v419_v13 }
  0xc7   : > { %v451_v16 = vadd.f32 %v450_v2, %v401_v14 }
  0xc8   : > { %494 = vst [vmem:[#allocation2 + $0x10] sm:$0xff] %v1278_v15  ;;  %v532_v9 = vmul.f32 %v1278_v15, %v1278_v15 }
  0xc9   : > { %487 = vst [vmem:[#allocation2 + $0x18] sm:$0xff] %v451_v16  ;;  %v525_v41 = vmul.f32 %v451_v16, %v451_v16  ;;  %v503_v44 = vadd.f32 %v502_v40, %v451_v16 }
  0xcb   : > { %v458_v17 = vpop.f32.mrf.mxu1  ;;  %v540_v48 = vadd.f32 %v539_v43, %v525_v41 }
  0xcd   : > { %v421_v18 = vpop.f32.mrf.mxu2 }
  0xce   : > { %v404_v20 = vpop.f32.mrf.mxu0  ;;  %v1281_v21 = vadd.f32 %v470_v12, %v421_v18 }
  0xcf   : > { %v454_v22 = vadd.f32 %v453_v7, %v404_v20 }
  0xd0   : > { %495 = vst [vmem:[#allocation2 + $0x38] sm:$0xff] %v1281_v21  ;;  %v533_v12 = vmul.f32 %v1281_v21, %v1281_v21 }
  0xd1   : > { %488 = vst [vmem:[#allocation2 + $0x50] sm:$0xff] %v454_v22  ;;  %v526_v45 = vmul.f32 %v454_v22, %v454_v22  ;;  %v504_v49 = vadd.f32 %v503_v44, %v454_v22 }
  0xd3   : > { %v460_v23 = vpop.f32.mrf.mxu1  ;;  %v541_v52 = vadd.f32 %v540_v48, %v526_v45 }
  0xd5   : > { %v424_v24 = vpop.f32.mrf.mxu2 }
  0xd6   : > { %v406_v25 = vpop.f32.mrf.mxu0  ;;  %v1284_v26 = vadd.f32 %v473_v19, %v424_v24 }
  0xd7   : > { %v456_v27 = vadd.f32 %v455_v11, %v406_v25 }
  0xd8   : > { %496 = vst [vmem:[#allocation2 + $0x60] sm:$0xff] %v1284_v26  ;;  %v534_v16 = vmul.f32 %v1284_v26, %v1284_v26 }
  0xd9   : > { %489 = vst [vmem:[#allocation2 + $0x68] sm:$0xff] %v456_v27  ;;  %v527_v50 = vmul.f32 %v456_v27, %v456_v27  ;;  %v505_v53 = vadd.f32 %v504_v49, %v456_v27 }
  0xdb   : > { %v463_v29 = vpop.f32.mrf.mxu1  ;;  %v542_v58 = vadd.f32 %v541_v52, %v527_v50 }
  0xdc   : > { %v464_v32 = vadd.f32 %v463_v29, %v414_v3  ;;  %v480_v3 = vpop.f32.mrf.mxu3 }
  0xdd   : > { %v426_v36 = vpop.f32.mrf.mxu2 }
  0xde   : > { %492 = vst [vmem:[#allocation2 + $0x40] sm:$0xff] %v464_v32  ;;  %v409_v37 = vpop.f32.mrf.mxu0  ;;  %v476_v38 = vadd.f32 %v475_v28, %v426_v36  ;;  %v530_v0 = vmul.f32 %v464_v32, %v464_v32 }
  0xdf   : > { %v459_v42 = vadd.f32 %v458_v17, %v409_v37 }
  0xe0   : > { %497 = vst [vmem:[#allocation2 + $0x70] sm:$0xff] %v476_v38  ;;  %v535_v19 = vmul.f32 %v476_v38, %v476_v38 }
  0xe1   : > { %490 = vst [vmem:[#allocation2 + $0x8] sm:$0xff] %v459_v42  ;;  %v528_v54 = vmul.f32 %v459_v42, %v459_v42  ;;  %v506_v59 = vadd.f32 %v505_v53, %v459_v42 }
  0xe3   : > { %v465_v47 = vpop.f32.mrf.mxu1  ;;  %v543_v61 = vadd.f32 %v542_v58, %v528_v54 }
  0xe4   : > { %v466_v51 = vadd.f32 %v465_v47, %v416_v8 }
  0xe5   : > { %v429_v55 = vpop.f32.mrf.mxu2 }
  0xe6   : > { %493 = vst [vmem:[#allocation2 + $0x20] sm:$0xff] %v466_v51  ;;  %v411_v56 = vpop.f32.mrf.mxu0  ;;  %v479_v57 = vadd.f32 %v478_v46, %v429_v55  ;;  %v531_v4 = vmul.f32 %v466_v51, %v466_v51 }
  0xe7   : > { %v461_v60 = vadd.f32 %v460_v23, %v411_v56 }
  0xe8   : > { %498 = vst [vmem:[#allocation2 + $0x78] sm:$0xff] %v479_v57  ;;  %v536_v24 = vmul.f32 %v479_v57, %v479_v57 }
  0xe9   : > { %491 = vst [vmem:[#allocation2 + $0x48] sm:$0xff] %v461_v60  ;;  %v507_v62 = vadd.f32 %v506_v59, %v461_v60  ;;  %v529_v63 = vmul.f32 %v461_v60, %v461_v60 }
  0xeb   : > { %v508_v1 = vadd.f32 %v507_v62, %v464_v32  ;;  %v544_v2 = vadd.f32 %v543_v61, %v529_v63 }
  0xed   : > { %v509_v5 = vadd.f32 %v508_v1, %v466_v51  ;;  %v545_v6 = vadd.f32 %v544_v2, %v530_v0  ;;  %v431_v7 = vpop.f32.mrf.mxu2 }
  0xee   : > { %v481_v8 = vadd.f32 %v480_v3, %v431_v7 }
  0xef   : > { %v510_v10 = vadd.f32 %v509_v5, %v1278_v15  ;;  %v546_v11 = vadd.f32 %v545_v6, %v531_v4 }
  0xf0   : > { %499 = vst [vmem:[#allocation2 + $0x28] sm:$0xff] %v481_v8  ;;  %v537_v28 = vmul.f32 %v481_v8, %v481_v8 }
  0xf1   : > { %v547_v13 = vadd.f32 %v546_v11, %v532_v9  ;;  %v511_v14 = vadd.f32 %v510_v10, %v1281_v21 }
  0xf3   : > { %v512_v17 = vadd.f32 %v511_v14, %v1284_v26  ;;  %v548_v18 = vadd.f32 %v547_v13, %v533_v12 }
  0xf5   : > { %v513_v20 = vadd.f32 %v512_v17, %v476_v38  ;;  %v549_v22 = vadd.f32 %v548_v18, %v534_v16  ;;  %v500_v38 = vld [vmem:[#allocation3] sm:$0x3] }
  0xf7   : > { %v514_v23 = vadd.f32 %v513_v20, %v479_v57  ;;  %v550_v15 = vadd.f32 %v549_v22, %v535_v19 }
  0xf9   : > { %v551_v25 = vadd.f32 %v550_v15, %v536_v24  ;;  %v515_v27 = vadd.f32 %v514_v23, %v481_v8 }
  0xfb   : > { %v516_v29 = vrot.slane %v515_v27, 4  ;;  %v552_v30 = vadd.f32 %v551_v25, %v537_v28 }
  0xfd   : > { %v517_v31 = vadd.f32 %v516_v29, %v515_v27  ;;  %v553_v32 = vrot.slane %v552_v30, 4 }
  0xff   : > { %v518_v21 = vrot.slane %v517_v31, 2  ;;  %v554_v33 = vadd.f32 %v553_v32, %v552_v30 }
 0x101   : > { %v519_v34 = vadd.f32 %v518_v21, %v517_v31  ;;  %v555_v35 = vrot.slane %v554_v33, 2 }
 0x103   : > { %v520_v36 = vrot.slane %v519_v34, 1  ;;  %v556_v26 = vadd.f32 %v555_v35, %v554_v33 }
 0x105   : > { %v557_v37 = vrot.slane %v556_v26, 1  ;;  %v521_v39 = vadd.f32 %v520_v36, %v519_v34 }
 0x107   : > { %v558_v40 = vadd.f32 %v557_v37, %v556_v26 }
 0x109   : > { %v560_v41 = vsel %vm559_vm2, %v521_v39, %v558_v40 }
 0x10a   : > { %v561_v42 = vadd.f32 %v560_v41, %v500_v38 }
 0x10c   : > { %562 = vst [vmem:[#allocation3] sm:$0x3] %v561_v42 }
 0x10d PF: > { %p969_p5 = scmp.ne.s32.totalorder %s1097_s9, 1 }
 0x10f   : > { %566 = sbr.rel (%p969_p5) target bundleno = 321 (0x141), region = 40 }
 0x114   : > { %v584_v43 = vld [vmem:[#allocation3] sm:$0x1]  ;;  %v586_v45 = vld [vmem:[#allocation3 + $0x1] sm:$0x1]  ;;  %v568_v54 = vld [vmem:[#allocation2 + $0x30] sm:$0xff] }
 0x115   : > { %v585_v44 = vmul.f32 0.0078125, %v584_v43  ;;  %v587_v46 = vmul.f32 0.0078125, %v586_v45  ;;  %v569_v55 = vld [vmem:[#allocation2] sm:$0xff]  ;;  %v570_v58 = vld [vmem:[#allocation2 + $0x58] sm:$0xff]  ;;  %v572_v60 = vld [vmem:[#allocation2 + $0x50] sm:$0xff] }
 0x116   : > { %v571_v59 = vld [vmem:[#allocation2 + $0x18] sm:$0xff]  ;;  %v573_v62 = vld [vmem:[#allocation2 + $0x68] sm:$0xff]  ;;  %v576_v2 = vld [vmem:[#allocation2 + $0x40] sm:$0xff] }
 0x117   : > { %v588_v47 = vmul.f32 %v585_v44, %v585_v44  ;;  %v1297_v56 = vperm.slane %v585_v44, 0  ;;  %v574_v63 = vld [vmem:[#allocation2 + $0x8] sm:$0xff]  ;;  %v577_v3 = vld [vmem:[#allocation2 + $0x20] sm:$0xff]  ;;  %v578_v7 = vld [vmem:[#allocation2 + $0x10] sm:$0xff] }
 0x118   : > { %v575_v0 = vld [vmem:[#allocation2 + $0x48] sm:$0xff]  ;;  %v579_v8 = vld [vmem:[#allocation2 + $0x38] sm:$0xff]  ;;  %v580_v9 = vld [vmem:[#allocation2 + $0x60] sm:$0xff] }
 0x119   : > { %v589_v48 = vsub.f32 %v587_v46, %v588_v47  ;;  %v592_v4 = vsub.f32 %v568_v54, %v1297_v56  ;;  %v593_v5 = vsub.f32 %v569_v55, %v1297_v56  ;;  %v594_v10 = vsub.f32 %v570_v58, %v1297_v56  ;;  %v581_v14 = vld [vmem:[#allocation2 + $0x70] sm:$0xff]  ;;  %v582_v16 = vld [vmem:[#allocation2 + $0x78] sm:$0xff]  ;;  %v583_v17 = vld [vmem:[#allocation2 + $0x28] sm:$0xff] }
 0x11a   : > { %v595_v11 = vsub.f32 %v571_v59, %v1297_v56  ;;  %v596_v12 = vsub.f32 %v572_v60, %v1297_v56  ;;  %v597_v13 = vsub.f32 %v573_v62, %v1297_v56  ;;  %v598_v19 = vsub.f32 %v574_v63, %v1297_v56 }
 0x11b   : > { %v590_v49 = vmax.f32 %v589_v48, 0.0  ;;  %v599_v20 = vsub.f32 %v575_v0, %v1297_v56  ;;  %v600_v22 = vsub.f32 %v576_v2, %v1297_v56  ;;  %v601_v24 = vsub.f32 %v577_v3, %v1297_v56 }
 0x11c   : > { %v602_v15 = vsub.f32 %v578_v7, %v1297_v56  ;;  %v603_v25 = vsub.f32 %v579_v8, %v1297_v56  ;;  %v604_v27 = vsub.f32 %v580_v9, %v1297_v56  ;;  %v605_v28 = vsub.f32 %v581_v14, %v1297_v56 }
 0x11d   : > { %v608_v50 = vadd.f32 1e-05, %v590_v49  ;;  %v606_v29 = vsub.f32 %v582_v16, %v1297_v56  ;;  %v607_v30 = vsub.f32 %v583_v17, %v1297_v56 }
 0x11f   : > { %1081 = vrsqrt.f32 %v608_v50  ;;  %vm615_vm3 = vweird.f32 %v608_v50 }
 0x125   : > { %v1082_v51 = vpop.eup %1081 }
 0x126   : > { %v610_v52 = vmul.f32 %v1082_v51, %v608_v50  ;;  %vm616_vm4 = vweird.f32 %v1082_v51 }
 0x127   : > { %vm1299_vm5 = vmor %vm615_vm3, %vm616_vm4 }
 0x128   : > { %v611_v53 = vmul.f32 %v1082_v51, %v610_v52 }
 0x12a   : > { %v612_v57 = vmul.f32 0.5, %v611_v53 }
 0x12c   : > { %v613_v61 = vsub.f32 1.5, %v612_v57 }
 0x12e   : > { %v614_v6 = vmul.f32 %v1082_v51, %v613_v61 }
 0x130   : > { %v618_v18 = vsel %vm1299_vm5, %v1082_v51, %v614_v6 }
 0x131   : > { %v619_v23 = vperm.slane %v618_v18, 0 }
 0x133   : > { %v620_v31 = vmul.f32 %v619_v23, %v592_v4  ;;  %v621_v32 = vmul.f32 %v619_v23, %v593_v5  ;;  %v622_v21 = vmul.f32 %v619_v23, %v594_v10  ;;  %v623_v33 = vmul.f32 %v619_v23, %v595_v11 }
 0x134   : > { %v624_v34 = vmul.f32 %v619_v23, %v596_v12  ;;  %v625_v35 = vmul.f32 %v619_v23, %v597_v13  ;;  %v626_v36 = vmul.f32 %v619_v23, %v598_v19  ;;  %v627_v26 = vmul.f32 %v619_v23, %v599_v20 }
 0x135   : > { %v636_v37 = vmax.f32 %v620_v31, 0.0  ;;  %v637_v38 = vmax.f32 %v621_v32, 0.0  ;;  %v638_v39 = vmax.f32 %v622_v21, 0.0  ;;  %v639_v40 = vmax.f32 %v623_v33, 0.0 }
 0x136   : > { %v640_v41 = vmax.f32 %v624_v34, 0.0  ;;  %v641_v42 = vmax.f32 %v625_v35, 0.0  ;;  %v642_v43 = vmax.f32 %v626_v36, 0.0  ;;  %v643_v44 = vmax.f32 %v627_v26, 0.0 }
 0x137   : > { %v1002_v45 = vpack.c.bf16 %v637_v38, %v636_v37  ;;  %v1007_v46 = vpack.c.bf16 %v639_v40, %v638_v39  ;;  %v628_v47 = vmul.f32 %v619_v23, %v600_v22  ;;  %v629_v48 = vmul.f32 %v619_v23, %v601_v24 }
 0x138   : > { %v1012_v49 = vpack.c.bf16 %v641_v42, %v640_v41  ;;  %v1017_v50 = vpack.c.bf16 %v643_v44, %v642_v43  ;;  %v630_v51 = vmul.f32 %v619_v23, %v602_v15  ;;  %v631_v52 = vmul.f32 %v619_v23, %v603_v25 }
 0x139   : > { %1003 = vst [vmem:[%s1356_s2] sm:$0xff] %v1002_v45   ;;  %v644_v53 = vmax.f32 %v628_v47, 0.0  ;;  %v645_v54 = vmax.f32 %v629_v48, 0.0  ;;  %v632_v55 = vmul.f32 %v619_v23, %v604_v27  ;;  %v633_v56 = vmul.f32 %v619_v23, %v605_v28 }
 0x13a   : > { %1039 = vst [vmem:[%s1356_s2 + $0x8] sm:$0xff] %v1007_v46   ;;  %v646_v57 = vmax.f32 %v630_v51, 0.0  ;;  %v647_v58 = vmax.f32 %v631_v52, 0.0  ;;  %v634_v59 = vmul.f32 %v619_v23, %v606_v29  ;;  %v635_v60 = vmul.f32 %v619_v23, %v607_v30 }
 0x13b   : > { %1040 = vst [vmem:[%s1356_s2 + $0x10] sm:$0xff] %v1012_v49   ;;  %v1022_v61 = vpack.c.bf16 %v645_v54, %v644_v53  ;;  %v648_v62 = vmax.f32 %v632_v55, 0.0  ;;  %v649_v63 = vmax.f32 %v633_v56, 0.0 }
 0x13c   : > { %1041 = vst [vmem:[%s1356_s2 + $0x18] sm:$0xff] %v1017_v50   ;;  %v1027_v0 = vpack.c.bf16 %v647_v58, %v646_v57  ;;  %v650_v1 = vmax.f32 %v634_v59, 0.0  ;;  %v651_v2 = vmax.f32 %v635_v60, 0.0 }
 0x13d   : > { %1042 = vst [vmem:[%s1356_s2 + $0x20] sm:$0xff] %v1022_v61   ;;  %v1032_v3 = vpack.c.bf16 %v649_v63, %v648_v62 }
 0x13e   : > { %1043 = vst [vmem:[%s1356_s2 + $0x28] sm:$0xff] %v1027_v0   ;;  %v1037_v4 = vpack.c.bf16 %v651_v2, %v650_v1 }
 0x13f   : > { %1044 = vst [vmem:[%s1356_s2 + $0x30] sm:$0xff] %v1032_v3  }
 0x140   : > { %1045 = vst [vmem:[%s1356_s2 + $0x38] sm:$0xff] %v1037_v4  }
 0x141 PF: > { %s12_s11 = sadd.s32 1, %s1105_s11   ;;  %s1359_s9 = smov %s1101_s10 }
 0x142   : > { %p9_p6 = scmp.ge.s32.totalorder %s12_s11, 4   ;;  %s1360_s10 = smov %s1362_s12 }
 0x144   :  { %11 = sbr.rel (!%p9_p6) target bundleno = 2 (0x2), region = 72 }

// kernel: _lambda_.21
= control target key start
LH: loop header
LB: loop body
LE: loop exit
PB: predicated region body
PF: predicated region fallthrough
CT: control target
= control target key end

     0   :  { %s939_s9 = smov 0   ;;  %s941_s10 = smov 0   ;;  %s1071_s0 = inlined_call_operand.vmem [shape: bf16[128,72], index: 0, kind: input, shape index: {}]   ;;  %s1072_s1 = inlined_call_operand.vmem [shape: bf16[72,128], index: 1, kind: input, shape index: {}]   ;;  %s1073_s2 = inlined_call_operand.vmem [shape: bf16[128,128], index: 2, kind: output, shape index: {}]  }
   0x1   :  { %s943_s11 = smov 0  }
   0x2 LB: > { %s24_s12 = sadd.s32 1, %s917_s10  ;;  %p735_p0 = scmp.ge.s32.totalorder %s921_s11, 1  ;;  %s921_s11 = sphi %s943_s11, %s12_s11   ;;  %s917_s10 = sphi %s941_s10, %s1077_s10   ;;  %s913_s9 = sphi %s939_s9, %s1076_s9  }
   0x3   : > { %p26_p1 = scmp.ge.s32.totalorder %s24_s12, 2  ;;  %p135_p2 = scmp.lt.s32.totalorder %s921_s11, 3 }
   0x5   : > { %s1079_s12 = smov (%p26_p1, %s24_s12), 0  ;;  %p136_p3 = pnand %p735_p0, %p135_p2 }
   0x6   : > { %p736_p4 = scmp.ne.s32.totalorder (!%p136_p3), %s913_s9, 0 }
   0x7   : > { %139 = sbr.rel (%p136_p3) target bundleno = 288 (0x120), region = 28 }
   0xc   : > { %183 = sbr.rel (%p736_p4) target bundleno = 236 (0xec), region = 32 }
  0x11   : > { %v213_v0 = vld [vmem:[%s1072_s1 + $0x20] sm:$0xf]  ;;  %vm306_vm0 = vcmask 1043456   ;;  %v809_v4 = vld [vmem:[%s1072_s1 + $0x18] sm:$0xff]  ;;  %v808_v5 = vld [vmem:[%s1072_s1 + $0x10] sm:$0xff]  ;;  %vm281_vm1 = vcmask 588800  }
  0x12   : > { %v271_v1 = vunpack.c.l.b16 %v213_v0  ;;  %v807_v6 = vld [vmem:[%s1072_s1 + $0x8] sm:$0xff]  ;;  %v806_v7 = vld [vmem:[%s1072_s1] sm:$0xff]  ;;  %v800_v9 = vld [vmem:[%s1071_s0 + $0x10] sm:$0xff]  ;;  %v923_v27 = vmov 0.0   ;;  %vm435_vm2 = vcmask 1040384  }
  0x13   : > { %v798_v8 = vld [vmem:[%s1071_s0] sm:$0xff]  ;;  %v804_v11 = vld [vmem:[%s1071_s0 + $0x30] sm:$0xff]  ;;  %v799_v12 = vld [vmem:[%s1071_s0 + $0x8] sm:$0xff]  ;;  %188 = vst [vmem:[#allocation3] sm:$0x3] %v923_v27 }
  0x14   : > { %v276_v2 = vpack.c.b16 %v271_v1, %v271_v1  ;;  %v802_v10 = vld [vmem:[%s1071_s0 + $0x20] sm:$0xff]  ;;  %v801_v13 = vld [vmem:[%s1071_s0 + $0x18] sm:$0xff]  ;;  %v803_v14 = vld [vmem:[%s1071_s0 + $0x28] sm:$0xff] }
  0x15   : > { %v805_v15 = vld [vmem:[%s1071_s0 + $0x38] sm:$0xff] }
  0x16   : > { %v308_v3 = vsel %vm306_vm0, %v276_v2, 0 }
  0x17   : > { %313 = vmatpush.bf16.msra.mxu0 %v308_v3  ;;  %857 = vmatpush.bf16.msra.mxu1 %v308_v3 }
  0x18   : > { %858 = vmatpush.bf16.msra.mxu2 %v308_v3  ;;  %859 = vmatpush.bf16.msra.mxu3 %v308_v3 }
  0x1b   : > { %314 = vmatpush.bf16.msra.mxu0 %v809_v4  ;;  %860 = vmatpush.bf16.msra.mxu1 %v809_v4 }
  0x1c   : > { %861 = vmatpush.bf16.msra.mxu2 %v809_v4  ;;  %862 = vmatpush.bf16.msra.mxu3 %v809_v4 }
  0x1f   : > { %315 = vmatpush.bf16.msra.mxu0 %v808_v5  ;;  %863 = vmatpush.bf16.msra.mxu1 %v808_v5 }
  0x20   : > { %864 = vmatpush.bf16.msra.mxu2 %v808_v5  ;;  %865 = vmatpush.bf16.msra.mxu3 %v808_v5 }
  0x23   : > { %316 = vmatpush.bf16.msra.mxu0 %v807_v6  ;;  %866 = vmatpush.bf16.msra.mxu1 %v807_v6 }
  0x24   : > { %867 = vmatpush.bf16.msra.mxu2 %v807_v6  ;;  %868 = vmatpush.bf16.msra.mxu3 %v807_v6 }
  0x27   : > { %317 = vmatpush.bf16.msra.mxu0 %v806_v7  ;;  %869 = vmatpush.bf16.msra.mxu1 %v806_v7 }
  0x28   : > { %870 = vmatpush.bf16.msra.mxu2 %v806_v7  ;;  %871 = vmatpush.bf16.msra.mxu3 %v806_v7 }
  0x2a   : > { %785 = vmatmul.msk.bf16.vlgmr.msra.gmra.mxu0 %vm281_vm1, %v798_v8  ;;  %787 = vmatmul.msk.bf16.vlgmr.msra.gmra.mxu1 %vm281_vm1, %v800_v9 }
  0x2b   : > { %789 = vmatmul.msk.bf16.vlgmr.msra.gmra.mxu2 %vm281_vm1, %v802_v10  ;;  %791 = vmatmul.msk.bf16.vlgmr.msra.gmra.mxu3 %vm281_vm1, %v804_v11 }
  0x3a   : > { %786 = vmatmul.msk.bf16.gmra.mxu0 %vm281_vm1, %v799_v12  ;;  %788 = vmatmul.msk.bf16.gmra.mxu1 %vm281_vm1, %v801_v13 }
  0x3b   : > { %790 = vmatmul.msk.bf16.gmra.mxu2 %vm281_vm1, %v803_v14  ;;  %792 = vmatmul.msk.bf16.gmra.mxu3 %vm281_vm1, %v805_v15 }
  0xa7   : > { %v319_v16 = vpop.f32.mrf.mxu0  ;;  %v329_v17 = vpop.f32.mrf.mxu1 }
  0xa8   : > { %360 = vst [vmem:[#allocation2 + $0x30] sm:$0xff] %v319_v16  ;;  %v398_v28 = vmul.f32 %v319_v16, %v319_v16  ;;  %v402_v40 = vmul.f32 %v329_v17, %v329_v17 }
  0xa9   : > { %364 = vst [vmem:[#allocation2 + $0x50] sm:$0xff] %v329_v17 }
  0xae   : > { %v339_v18 = vpop.f32.mrf.mxu2  ;;  %v1007_v19 = vpop.f32.mrf.mxu3 }
  0xaf   : > { %v321_v20 = vpop.f32.mrf.mxu0  ;;  %v331_v21 = vpop.f32.mrf.mxu1  ;;  %368 = vst [vmem:[#allocation2 + $0x40] sm:$0xff] %v339_v18  ;;  %v406_v54 = vmul.f32 %v339_v18, %v339_v18  ;;  %v410_v2 = vmul.f32 %v1007_v19, %v1007_v19 }
  0xb0   : > { %361 = vst [vmem:[#allocation2] sm:$0xff] %v321_v20  ;;  %v399_v26 = vmul.f32 %v321_v20, %v321_v20  ;;  %v377_v29 = vadd.f32 %v321_v20, %v319_v16  ;;  %v403_v43 = vmul.f32 %v331_v21, %v331_v21 }
  0xb1   : > { %365 = vst [vmem:[#allocation2 + $0x68] sm:$0xff] %v331_v21 }
  0xb2   : > { %372 = vst [vmem:[#allocation2 + $0x60] sm:$0xff] %v1007_v19  ;;  %v414_v31 = vadd.f32 %v399_v26, %v398_v28  ;;  %v376_v26 = vld [vmem:[#allocation3] sm:$0x3] }
  0xb6   : > { %v341_v22 = vpop.f32.mrf.mxu2  ;;  %v351_v23 = vpop.f32.mrf.mxu3 }
  0xb7   : > { %v324_v24 = vpop.f32.mrf.mxu0  ;;  %v334_v25 = vpop.f32.mrf.mxu1  ;;  %369 = vst [vmem:[#allocation2 + $0x20] sm:$0xff] %v341_v22  ;;  %v407_v57 = vmul.f32 %v341_v22, %v341_v22  ;;  %v411_v5 = vmul.f32 %v351_v23, %v351_v23 }
  0xb8   : > { %362 = vst [vmem:[#allocation2 + $0x58] sm:$0xff] %v324_v24  ;;  %v400_v30 = vmul.f32 %v324_v24, %v324_v24  ;;  %v378_v32 = vadd.f32 %v377_v29, %v324_v24  ;;  %v404_v46 = vmul.f32 %v334_v25, %v334_v25 }
  0xb9   : > { %366 = vst [vmem:[#allocation2 + $0x8] sm:$0xff] %v334_v25 }
  0xba   : > { %373 = vst [vmem:[#allocation2 + $0x70] sm:$0xff] %v351_v23  ;;  %v415_v37 = vadd.f32 %v414_v31, %v400_v30 }
  0xbe   : > { %v344_v33 = vpop.f32.mrf.mxu2  ;;  %v354_v34 = vpop.f32.mrf.mxu3 }
  0xbf   : > { %v326_v35 = vpop.f32.mrf.mxu0  ;;  %v336_v36 = vpop.f32.mrf.mxu1  ;;  %370 = vst [vmem:[#allocation2 + $0x10] sm:$0xff] %v344_v33  ;;  %v408_v61 = vmul.f32 %v344_v33, %v344_v33  ;;  %v412_v9 = vmul.f32 %v354_v34, %v354_v34 }
  0xc0   : > { %363 = vst [vmem:[#allocation2 + $0x18] sm:$0xff] %v326_v35  ;;  %v379_v38 = vadd.f32 %v378_v32, %v326_v35  ;;  %v401_v39 = vmul.f32 %v326_v35, %v326_v35  ;;  %v405_v52 = vmul.f32 %v336_v36, %v336_v36 }
  0xc1   : > { %367 = vst [vmem:[#allocation2 + $0x48] sm:$0xff] %v336_v36 }
  0xc2   : > { %v380_v41 = vadd.f32 %v379_v38, %v329_v17  ;;  %v416_v42 = vadd.f32 %v415_v37, %v401_v39  ;;  %374 = vst [vmem:[#allocation2 + $0x78] sm:$0xff] %v354_v34 }
  0xc4   : > { %v417_v44 = vadd.f32 %v416_v42, %v402_v40  ;;  %v381_v45 = vadd.f32 %v380_v41, %v331_v21 }
  0xc6   : > { %v382_v47 = vadd.f32 %v381_v45, %v334_v25  ;;  %v418_v48 = vadd.f32 %v417_v44, %v403_v43  ;;  %v346_v49 = vpop.f32.mrf.mxu2  ;;  %v356_v50 = vpop.f32.mrf.mxu3 }
  0xc7   : > { %371 = vst [vmem:[#allocation2 + $0x38] sm:$0xff] %v346_v49  ;;  %v409_v1 = vmul.f32 %v346_v49, %v346_v49  ;;  %v413_v13 = vmul.f32 %v356_v50, %v356_v50 }
  0xc8   : > { %v383_v51 = vadd.f32 %v382_v47, %v336_v36  ;;  %v419_v53 = vadd.f32 %v418_v48, %v404_v46  ;;  %375 = vst [vmem:[#allocation2 + $0x28] sm:$0xff] %v356_v50 }
  0xca   : > { %v384_v55 = vadd.f32 %v383_v51, %v339_v18  ;;  %v420_v56 = vadd.f32 %v419_v53, %v405_v52 }
  0xcc   : > { %v421_v58 = vadd.f32 %v420_v56, %v406_v54  ;;  %v385_v59 = vadd.f32 %v384_v55, %v341_v22 }
  0xce   : > { %v386_v60 = vadd.f32 %v385_v59, %v344_v33  ;;  %v422_v62 = vadd.f32 %v421_v58, %v407_v57 }
  0xd0   : > { %v423_v63 = vadd.f32 %v422_v62, %v408_v61  ;;  %v387_v0 = vadd.f32 %v386_v60, %v346_v49 }
  0xd2   : > { %v388_v3 = vadd.f32 %v387_v0, %v1007_v19  ;;  %v424_v4 = vadd.f32 %v423_v63, %v409_v1 }
  0xd4   : > { %v425_v6 = vadd.f32 %v424_v4, %v410_v2  ;;  %v389_v7 = vadd.f32 %v388_v3, %v351_v23 }
  0xd6   : > { %v390_v8 = vadd.f32 %v389_v7, %v354_v34  ;;  %v426_v10 = vadd.f32 %v425_v6, %v411_v5 }
  0xd8   : > { %v427_v11 = vadd.f32 %v426_v10, %v412_v9  ;;  %v391_v12 = vadd.f32 %v390_v8, %v356_v50 }
  0xda   : > { %v392_v14 = vrot.slane %v391_v12, 4  ;;  %v428_v15 = vadd.f32 %v427_v11, %v413_v13 }
  0xdc   : > { %v393_v16 = vadd.f32 %v392_v14, %v391_v12  ;;  %v429_v17 = vrot.slane %v428_v15, 4 }
  0xde   : > { %v394_v18 = vrot.slane %v393_v16, 2  ;;  %v430_v20 = vadd.f32 %v429_v17, %v428_v15 }
  0xe0   : > { %v395_v21 = vadd.f32 %v394_v18, %v393_v16  ;;  %v431_v22 = vrot.slane %v430_v20, 2 }
  0xe2   : > { %v396_v24 = vrot.slane %v395_v21, 1  ;;  %v432_v19 = vadd.f32 %v431_v22, %v430_v20 }
  0xe4   : > { %v433_v25 = vrot.slane %v432_v19, 1  ;;  %v397_v23 = vadd.f32 %v396_v24, %v395_v21 }
  0xe6   : > { %v434_v27 = vadd.f32 %v433_v25, %v432_v19 }
  0xe8   : > { %v436_v28 = vsel %vm435_vm2, %v397_v23, %v434_v27 }
  0xe9   : > { %v437_v29 = vadd.f32 %v436_v28, %v376_v26 }
  0xeb   : > { %438 = vst [vmem:[#allocation3] sm:$0x3] %v437_v29 }
  0xec PF: > { %p793_p5 = scmp.ne.s32.totalorder %s913_s9, 1 }
  0xee   : > { %442 = sbr.rel (%p793_p5) target bundleno = 288 (0x120), region = 40 }
  0xf3   : > { %v460_v30 = vld [vmem:[#allocation3] sm:$0x1]  ;;  %v462_v32 = vld [vmem:[#allocation3 + $0x1] sm:$0x1]  ;;  %v444_v41 = vld [vmem:[#allocation2 + $0x30] sm:$0xff] }
  0xf4   : > { %v461_v31 = vmul.f32 0.0078125, %v460_v30  ;;  %v463_v33 = vmul.f32 0.0078125, %v462_v32  ;;  %v445_v42 = vld [vmem:[#allocation2] sm:$0xff]  ;;  %v446_v45 = vld [vmem:[#allocation2 + $0x58] sm:$0xff]  ;;  %v448_v47 = vld [vmem:[#allocation2 + $0x50] sm:$0xff] }
  0xf5   : > { %v447_v46 = vld [vmem:[#allocation2 + $0x18] sm:$0xff]  ;;  %v449_v49 = vld [vmem:[#allocation2 + $0x68] sm:$0xff]  ;;  %v452_v53 = vld [vmem:[#allocation2 + $0x40] sm:$0xff] }
  0xf6   : > { %v464_v34 = vmul.f32 %v461_v31, %v461_v31  ;;  %v1014_v43 = vperm.slane %v461_v31, 0  ;;  %v450_v50 = vld [vmem:[#allocation2 + $0x8] sm:$0xff]  ;;  %v453_v54 = vld [vmem:[#allocation2 + $0x20] sm:$0xff]  ;;  %v454_v58 = vld [vmem:[#allocation2 + $0x10] sm:$0xff] }
  0xf7   : > { %v451_v51 = vld [vmem:[#allocation2 + $0x48] sm:$0xff]  ;;  %v455_v59 = vld [vmem:[#allocation2 + $0x38] sm:$0xff]  ;;  %v456_v60 = vld [vmem:[#allocation2 + $0x60] sm:$0xff] }
  0xf8   : > { %v465_v35 = vsub.f32 %v463_v33, %v464_v34  ;;  %v468_v55 = vsub.f32 %v444_v41, %v1014_v43  ;;  %v469_v56 = vsub.f32 %v445_v42, %v1014_v43  ;;  %v470_v61 = vsub.f32 %v446_v45, %v1014_v43  ;;  %v457_v1 = vld [vmem:[#allocation2 + $0x70] sm:$0xff]  ;;  %v458_v2 = vld [vmem:[#allocation2 + $0x78] sm:$0xff]  ;;  %v459_v3 = vld [vmem:[#allocation2 + $0x28] sm:$0xff] }
  0xf9   : > { %v471_v62 = vsub.f32 %v447_v46, %v1014_v43  ;;  %v472_v63 = vsub.f32 %v448_v47, %v1014_v43  ;;  %v473_v0 = vsub.f32 %v449_v49, %v1014_v43  ;;  %v474_v5 = vsub.f32 %v450_v50, %v1014_v43 }
  0xfa   : > { %v466_v36 = vmax.f32 %v465_v35, 0.0  ;;  %v475_v6 = vsub.f32 %v451_v51, %v1014_v43  ;;  %v476_v7 = vsub.f32 %v452_v53, %v1014_v43  ;;  %v477_v9 = vsub.f32 %v453_v54, %v1014_v43 }
  0xfb   : > { %v478_v10 = vsub.f32 %v454_v58, %v1014_v43  ;;  %v479_v11 = vsub.f32 %v455_v59, %v1014_v43  ;;  %v480_v12 = vsub.f32 %v456_v60, %v1014_v43  ;;  %v481_v13 = vsub.f32 %v457_v1, %v1014_v43 }
  0xfc   : > { %v484_v37 = vadd.f32 1e-05, %v466_v36  ;;  %v482_v14 = vsub.f32 %v458_v2, %v1014_v43  ;;  %v483_v15 = vsub.f32 %v459_v3, %v1014_v43 }
  0xfe   : > { %897 = vrsqrt.f32 %v484_v37  ;;  %vm491_vm3 = vweird.f32 %v484_v37 }
 0x104   : > { %v898_v38 = vpop.eup %897 }
 0x105   : > { %v486_v39 = vmul.f32 %v898_v38, %v484_v37  ;;  %vm492_vm4 = vweird.f32 %v898_v38 }
 0x106   : > { %vm1016_vm5 = vmor %vm491_vm3, %vm492_vm4 }
 0x107   : > { %v487_v40 = vmul.f32 %v898_v38, %v486_v39 }
 0x109   : > { %v488_v44 = vmul.f32 0.5, %v487_v40 }
 0x10b   : > { %v489_v48 = vsub.f32 1.5, %v488_v44 }
 0x10d   : > { %v490_v57 = vmul.f32 %v898_v38, %v489_v48 }
 0x10f   : > { %v494_v4 = vsel %vm1016_vm5, %v898_v38, %v490_v57 }
 0x110   : > { %v495_v8 = vperm.slane %v494_v4, 0 }
 0x112   : > { %v496_v16 = vmul.f32 %v495_v8, %v468_v55  ;;  %v497_v17 = vmul.f32 %v495_v8, %v469_v56  ;;  %v498_v18 = vmul.f32 %v495_v8, %v470_v61  ;;  %v499_v20 = vmul.f32 %v495_v8, %v471_v62 }
 0x113   : > { %v500_v21 = vmul.f32 %v495_v8, %v472_v63  ;;  %v501_v22 = vmul.f32 %v495_v8, %v473_v0  ;;  %v502_v24 = vmul.f32 %v495_v8, %v474_v5  ;;  %v503_v19 = vmul.f32 %v495_v8, %v475_v6 }
 0x114   : > { %v512_v25 = vmax.f32 %v496_v16, 0.0  ;;  %v513_v26 = vmax.f32 %v497_v17, 0.0  ;;  %v514_v23 = vmax.f32 %v498_v18, 0.0  ;;  %v515_v27 = vmax.f32 %v499_v20, 0.0 }
 0x115   : > { %v516_v28 = vmax.f32 %v500_v21, 0.0  ;;  %v517_v29 = vmax.f32 %v501_v22, 0.0  ;;  %v518_v30 = vmax.f32 %v502_v24, 0.0  ;;  %v519_v31 = vmax.f32 %v503_v19, 0.0 }
 0x116   : > { %v813_v32 = vpack.c.bf16 %v513_v26, %v512_v25  ;;  %v818_v33 = vpack.c.bf16 %v515_v27, %v514_v23  ;;  %v504_v34 = vmul.f32 %v495_v8, %v476_v7  ;;  %v505_v35 = vmul.f32 %v495_v8, %v477_v9 }
 0x117   : > { %v823_v36 = vpack.c.bf16 %v517_v29, %v516_v28  ;;  %v828_v37 = vpack.c.bf16 %v519_v31, %v518_v30  ;;  %v506_v38 = vmul.f32 %v495_v8, %v478_v10  ;;  %v507_v39 = vmul.f32 %v495_v8, %v479_v11 }
 0x118   : > { %814 = vst [vmem:[%s1073_s2] sm:$0xff] %v813_v32   ;;  %v520_v40 = vmax.f32 %v504_v34, 0.0  ;;  %v521_v41 = vmax.f32 %v505_v35, 0.0  ;;  %v508_v42 = vmul.f32 %v495_v8, %v480_v12  ;;  %v509_v43 = vmul.f32 %v495_v8, %v481_v13 }
 0x119   : > { %850 = vst [vmem:[%s1073_s2 + $0x8] sm:$0xff] %v818_v33   ;;  %v522_v44 = vmax.f32 %v506_v38, 0.0  ;;  %v523_v45 = vmax.f32 %v507_v39, 0.0  ;;  %v510_v46 = vmul.f32 %v495_v8, %v482_v14  ;;  %v511_v47 = vmul.f32 %v495_v8, %v483_v15 }
 0x11a   : > { %851 = vst [vmem:[%s1073_s2 + $0x10] sm:$0xff] %v823_v36   ;;  %v833_v48 = vpack.c.bf16 %v521_v41, %v520_v40  ;;  %v524_v49 = vmax.f32 %v508_v42, 0.0  ;;  %v525_v50 = vmax.f32 %v509_v43, 0.0 }
 0x11b   : > { %852 = vst [vmem:[%s1073_s2 + $0x18] sm:$0xff] %v828_v37   ;;  %v838_v51 = vpack.c.bf16 %v523_v45, %v522_v44  ;;  %v526_v52 = vmax.f32 %v510_v46, 0.0  ;;  %v527_v53 = vmax.f32 %v511_v47, 0.0 }
 0x11c   : > { %853 = vst [vmem:[%s1073_s2 + $0x20] sm:$0xff] %v833_v48   ;;  %v843_v54 = vpack.c.bf16 %v525_v50, %v524_v49 }
 0x11d   : > { %854 = vst [vmem:[%s1073_s2 + $0x28] sm:$0xff] %v838_v51   ;;  %v848_v55 = vpack.c.bf16 %v527_v53, %v526_v52 }
 0x11e   : > { %855 = vst [vmem:[%s1073_s2 + $0x30] sm:$0xff] %v843_v54  }
 0x11f   : > { %856 = vst [vmem:[%s1073_s2 + $0x38] sm:$0xff] %v848_v55  }
 0x120 PF: > { %s12_s11 = sadd.s32 1, %s921_s11   ;;  %s1076_s9 = smov %s917_s10 }
 0x121   : > { %p9_p6 = scmp.ge.s32.totalorder %s12_s11, 4   ;;  %s1077_s10 = smov %s1079_s12 }
 0x123   :  { %11 = sbr.rel (!%p9_p6) target bundleno = 2 (0x2), region = 72 }

// kernel: _lambda_.22
= control target key start
LH: loop header
LB: loop body
LE: loop exit
PB: predicated region body
PF: predicated region fallthrough
CT: control target
= control target key end

     0   :  { %s1143_s12 = smov 0   ;;  %s1145_s13 = smov 0   ;;  %s1395_s0 = inlined_call_operand.vmem [shape: bf16[128,128], index: 0, kind: input, shape index: {}]   ;;  %s1396_s1 = inlined_call_operand.vmem [shape: bf16[128,128], index: 1, kind: input, shape index: {}]   ;;  %s1397_s2 = inlined_call_operand.vmem [shape: bf16[128,128], index: 2, kind: input, shape index: {}]   ;;  %s1398_s3 = inlined_call_operand.vmem [shape: bf16[128,128], index: 3, kind: output, shape index: {}]  }
   0x1   :  { %s1147_s14 = smov 0  }
   0x2 LB: > { %s25_s15 = sadd.s32 1, %s1116_s13  ;;  %p874_p0 = scmp.ge.s32.totalorder %s1120_s14, 1  ;;  %s1120_s14 = sphi %s1147_s14, %s13_s14   ;;  %s1116_s13 = sphi %s1145_s13, %s1402_s13   ;;  %s1112_s12 = sphi %s1143_s12, %s1401_s12  }
   0x3   : > { %p27_p1 = scmp.ge.s32.totalorder %s25_s15, 2  ;;  %p175_p2 = scmp.lt.s32.totalorder %s1120_s14, 3 }
   0x5   : > { %s1404_s15 = smov (%p27_p1, %s25_s15), 0  ;;  %p176_p3 = pnand %p874_p0, %p175_p2 }
   0x6   : > { %p875_p4 = scmp.ne.s32.totalorder (!%p176_p3), %s1112_s12, 0 }
   0x7   : > { %179 = sbr.rel (%p176_p3) target bundleno = 303 (0x12f), region = 32 }
   0xc   : > { %238 = sbr.rel (%p875_p4) target bundleno = 243 (0xf3), region = 36 }
  0x11   : > { %v960_v0 = vld [vmem:[%s1396_s1 + $0x38] sm:$0xff]  ;;  %v959_v1 = vld [vmem:[%s1396_s1 + $0x30] sm:$0xff]  ;;  %v958_v2 = vld [vmem:[%s1396_s1 + $0x28] sm:$0xff]  ;;  %v1122_v27 = vmov 0.0   ;;  %vm497_vm0 = vcmask 1040384  }
  0x12   : > { %372 = vmatpush.bf16.msra.mxu0 %v960_v0  ;;  %1047 = vmatpush.bf16.msra.mxu1 %v960_v0  ;;  %v957_v3 = vld [vmem:[%s1396_s1 + $0x20] sm:$0xff]  ;;  %v956_v4 = vld [vmem:[%s1396_s1 + $0x18] sm:$0xff]  ;;  %v955_v5 = vld [vmem:[%s1396_s1 + $0x10] sm:$0xff]  ;;  %243 = vst [vmem:[#allocation3] sm:$0x3] %v1122_v27 }
  0x13   : > { %1048 = vmatpush.bf16.msra.mxu2 %v960_v0  ;;  %1049 = vmatpush.bf16.msra.mxu3 %v960_v0  ;;  %v954_v6 = vld [vmem:[%s1396_s1 + $0x8] sm:$0xff]  ;;  %v953_v7 = vld [vmem:[%s1396_s1] sm:$0xff]  ;;  %v947_v9 = vld [vmem:[%s1395_s0 + $0x10] sm:$0xff] }
  0x14   : > { %v945_v8 = vld [vmem:[%s1395_s0] sm:$0xff]  ;;  %v951_v11 = vld [vmem:[%s1395_s0 + $0x30] sm:$0xff]  ;;  %v946_v12 = vld [vmem:[%s1395_s0 + $0x8] sm:$0xff] }
  0x15   : > { %v949_v10 = vld [vmem:[%s1395_s0 + $0x20] sm:$0xff]  ;;  %v948_v13 = vld [vmem:[%s1395_s0 + $0x18] sm:$0xff]  ;;  %v950_v14 = vld [vmem:[%s1395_s0 + $0x28] sm:$0xff] }
  0x16   : > { %373 = vmatpush.bf16.msra.mxu0 %v959_v1  ;;  %1050 = vmatpush.bf16.msra.mxu1 %v959_v1  ;;  %v952_v15 = vld [vmem:[%s1395_s0 + $0x38] sm:$0xff] }
  0x17   : > { %1051 = vmatpush.bf16.msra.mxu2 %v959_v1  ;;  %1052 = vmatpush.bf16.msra.mxu3 %v959_v1 }
  0x1a   : > { %374 = vmatpush.bf16.msra.mxu0 %v958_v2  ;;  %1053 = vmatpush.bf16.msra.mxu1 %v958_v2 }
  0x1b   : > { %1054 = vmatpush.bf16.msra.mxu2 %v958_v2  ;;  %1055 = vmatpush.bf16.msra.mxu3 %v958_v2 }
  0x1e   : > { %375 = vmatpush.bf16.msra.mxu0 %v957_v3  ;;  %1056 = vmatpush.bf16.msra.mxu1 %v957_v3 }
  0x1f   : > { %1057 = vmatpush.bf16.msra.mxu2 %v957_v3  ;;  %1058 = vmatpush.bf16.msra.mxu3 %v957_v3 }
  0x22   : > { %376 = vmatpush.bf16.msra.mxu0 %v956_v4  ;;  %1059 = vmatpush.bf16.msra.mxu1 %v956_v4 }
  0x23   : > { %1060 = vmatpush.bf16.msra.mxu2 %v956_v4  ;;  %1061 = vmatpush.bf16.msra.mxu3 %v956_v4 }
  0x26   : > { %377 = vmatpush.bf16.msra.mxu0 %v955_v5  ;;  %1062 = vmatpush.bf16.msra.mxu1 %v955_v5 }
  0x27   : > { %1063 = vmatpush.bf16.msra.mxu2 %v955_v5  ;;  %1064 = vmatpush.bf16.msra.mxu3 %v955_v5 }
  0x2a   : > { %378 = vmatpush.bf16.msra.mxu0 %v954_v6  ;;  %1065 = vmatpush.bf16.msra.mxu1 %v954_v6 }
  0x2b   : > { %1066 = vmatpush.bf16.msra.mxu2 %v954_v6  ;;  %1067 = vmatpush.bf16.msra.mxu3 %v954_v6 }
  0x2e   : > { %379 = vmatpush.bf16.msra.mxu0 %v953_v7  ;;  %1068 = vmatpush.bf16.msra.mxu1 %v953_v7 }
  0x2f   : > { %1069 = vmatpush.bf16.msra.mxu2 %v953_v7  ;;  %1070 = vmatpush.bf16.msra.mxu3 %v953_v7 }
  0x31   : > { %380 = vmatmul.bf16.vlgmr.msra.gmra.mxu0 %v945_v8  ;;  %390 = vmatmul.bf16.vlgmr.msra.gmra.mxu1 %v947_v9 }
  0x32   : > { %400 = vmatmul.bf16.vlgmr.msra.gmra.mxu2 %v949_v10  ;;  %410 = vmatmul.bf16.vlgmr.msra.gmra.mxu3 %v951_v11 }
  0x41   : > { %385 = vmatmul.bf16.gmra.mxu0 %v946_v12  ;;  %395 = vmatmul.bf16.gmra.mxu1 %v948_v13 }
  0x42   : > { %405 = vmatmul.bf16.gmra.mxu2 %v950_v14  ;;  %415 = vmatmul.bf16.gmra.mxu3 %v952_v15 }
  0xae   : > { %v381_v16 = vpop.f32.mrf.mxu0  ;;  %v391_v17 = vpop.f32.mrf.mxu1 }
  0xaf   : > { %422 = vst [vmem:[#allocation2 + $0x30] sm:$0xff] %v381_v16  ;;  %v460_v28 = vmul.f32 %v381_v16, %v381_v16  ;;  %v464_v40 = vmul.f32 %v391_v17, %v391_v17 }
  0xb0   : > { %426 = vst [vmem:[#allocation2 + $0x50] sm:$0xff] %v391_v17 }
  0xb5   : > { %v401_v18 = vpop.f32.mrf.mxu2  ;;  %v1212_v19 = vpop.f32.mrf.mxu3 }
  0xb6   : > { %v383_v20 = vpop.f32.mrf.mxu0  ;;  %v393_v21 = vpop.f32.mrf.mxu1  ;;  %430 = vst [vmem:[#allocation2 + $0x40] sm:$0xff] %v401_v18  ;;  %v468_v54 = vmul.f32 %v401_v18, %v401_v18  ;;  %v472_v2 = vmul.f32 %v1212_v19, %v1212_v19 }
  0xb7   : > { %423 = vst [vmem:[#allocation2] sm:$0xff] %v383_v20  ;;  %v461_v26 = vmul.f32 %v383_v20, %v383_v20  ;;  %v439_v29 = vadd.f32 %v383_v20, %v381_v16  ;;  %v465_v43 = vmul.f32 %v393_v21, %v393_v21 }
  0xb8   : > { %427 = vst [vmem:[#allocation2 + $0x68] sm:$0xff] %v393_v21 }
  0xb9   : > { %434 = vst [vmem:[#allocation2 + $0x60] sm:$0xff] %v1212_v19  ;;  %v476_v31 = vadd.f32 %v461_v26, %v460_v28  ;;  %v438_v26 = vld [vmem:[#allocation3] sm:$0x3] }
  0xbd   : > { %v403_v22 = vpop.f32.mrf.mxu2  ;;  %v413_v23 = vpop.f32.mrf.mxu3 }
  0xbe   : > { %v386_v24 = vpop.f32.mrf.mxu0  ;;  %v396_v25 = vpop.f32.mrf.mxu1  ;;  %431 = vst [vmem:[#allocation2 + $0x20] sm:$0xff] %v403_v22  ;;  %v469_v57 = vmul.f32 %v403_v22, %v403_v22  ;;  %v473_v5 = vmul.f32 %v413_v23, %v413_v23 }
  0xbf   : > { %424 = vst [vmem:[#allocation2 + $0x58] sm:$0xff] %v386_v24  ;;  %v462_v30 = vmul.f32 %v386_v24, %v386_v24  ;;  %v440_v32 = vadd.f32 %v439_v29, %v386_v24  ;;  %v466_v46 = vmul.f32 %v396_v25, %v396_v25 }
  0xc0   : > { %428 = vst [vmem:[#allocation2 + $0x8] sm:$0xff] %v396_v25 }
  0xc1   : > { %435 = vst [vmem:[#allocation2 + $0x70] sm:$0xff] %v413_v23  ;;  %v477_v37 = vadd.f32 %v476_v31, %v462_v30 }
  0xc5   : > { %v406_v33 = vpop.f32.mrf.mxu2  ;;  %v416_v34 = vpop.f32.mrf.mxu3 }
  0xc6   : > { %v388_v35 = vpop.f32.mrf.mxu0  ;;  %v398_v36 = vpop.f32.mrf.mxu1  ;;  %432 = vst [vmem:[#allocation2 + $0x10] sm:$0xff] %v406_v33  ;;  %v470_v61 = vmul.f32 %v406_v33, %v406_v33  ;;  %v474_v9 = vmul.f32 %v416_v34, %v416_v34 }
  0xc7   : > { %425 = vst [vmem:[#allocation2 + $0x18] sm:$0xff] %v388_v35  ;;  %v441_v38 = vadd.f32 %v440_v32, %v388_v35  ;;  %v463_v39 = vmul.f32 %v388_v35, %v388_v35  ;;  %v467_v52 = vmul.f32 %v398_v36, %v398_v36 }
  0xc8   : > { %429 = vst [vmem:[#allocation2 + $0x48] sm:$0xff] %v398_v36 }
  0xc9   : > { %v442_v41 = vadd.f32 %v441_v38, %v391_v17  ;;  %v478_v42 = vadd.f32 %v477_v37, %v463_v39  ;;  %436 = vst [vmem:[#allocation2 + $0x78] sm:$0xff] %v416_v34 }
  0xcb   : > { %v479_v44 = vadd.f32 %v478_v42, %v464_v40  ;;  %v443_v45 = vadd.f32 %v442_v41, %v393_v21 }
  0xcd   : > { %v444_v47 = vadd.f32 %v443_v45, %v396_v25  ;;  %v480_v48 = vadd.f32 %v479_v44, %v465_v43  ;;  %v408_v49 = vpop.f32.mrf.mxu2  ;;  %v418_v50 = vpop.f32.mrf.mxu3 }
  0xce   : > { %433 = vst [vmem:[#allocation2 + $0x38] sm:$0xff] %v408_v49  ;;  %v471_v1 = vmul.f32 %v408_v49, %v408_v49  ;;  %v475_v13 = vmul.f32 %v418_v50, %v418_v50 }
  0xcf   : > { %v445_v51 = vadd.f32 %v444_v47, %v398_v36  ;;  %v481_v53 = vadd.f32 %v480_v48, %v466_v46  ;;  %437 = vst [vmem:[#allocation2 + $0x28] sm:$0xff] %v418_v50 }
  0xd1   : > { %v446_v55 = vadd.f32 %v445_v51, %v401_v18  ;;  %v482_v56 = vadd.f32 %v481_v53, %v467_v52 }
  0xd3   : > { %v483_v58 = vadd.f32 %v482_v56, %v468_v54  ;;  %v447_v59 = vadd.f32 %v446_v55, %v403_v22 }
  0xd5   : > { %v448_v60 = vadd.f32 %v447_v59, %v406_v33  ;;  %v484_v62 = vadd.f32 %v483_v58, %v469_v57 }
  0xd7   : > { %v485_v63 = vadd.f32 %v484_v62, %v470_v61  ;;  %v449_v0 = vadd.f32 %v448_v60, %v408_v49 }
  0xd9   : > { %v450_v3 = vadd.f32 %v449_v0, %v1212_v19  ;;  %v486_v4 = vadd.f32 %v485_v63, %v471_v1 }
  0xdb   : > { %v487_v6 = vadd.f32 %v486_v4, %v472_v2  ;;  %v451_v7 = vadd.f32 %v450_v3, %v413_v23 }
  0xdd   : > { %v452_v8 = vadd.f32 %v451_v7, %v416_v34  ;;  %v488_v10 = vadd.f32 %v487_v6, %v473_v5 }
  0xdf   : > { %v489_v11 = vadd.f32 %v488_v10, %v474_v9  ;;  %v453_v12 = vadd.f32 %v452_v8, %v418_v50 }
  0xe1   : > { %v454_v14 = vrot.slane %v453_v12, 4  ;;  %v490_v15 = vadd.f32 %v489_v11, %v475_v13 }
  0xe3   : > { %v455_v16 = vadd.f32 %v454_v14, %v453_v12  ;;  %v491_v17 = vrot.slane %v490_v15, 4 }
  0xe5   : > { %v456_v18 = vrot.slane %v455_v16, 2  ;;  %v492_v20 = vadd.f32 %v491_v17, %v490_v15 }
  0xe7   : > { %v457_v21 = vadd.f32 %v456_v18, %v455_v16  ;;  %v493_v22 = vrot.slane %v492_v20, 2 }
  0xe9   : > { %v458_v24 = vrot.slane %v457_v21, 1  ;;  %v494_v19 = vadd.f32 %v493_v22, %v492_v20 }
  0xeb   : > { %v495_v25 = vrot.slane %v494_v19, 1  ;;  %v459_v23 = vadd.f32 %v458_v24, %v457_v21 }
  0xed   : > { %v496_v27 = vadd.f32 %v495_v25, %v494_v19 }
  0xef   : > { %v498_v28 = vsel %vm497_vm0, %v459_v23, %v496_v27 }
  0xf0   : > { %v499_v29 = vadd.f32 %v498_v28, %v438_v26 }
  0xf2   : > { %500 = vst [vmem:[#allocation3] sm:$0x3] %v499_v29 }
  0xf3 PF: > { %p940_p5 = scmp.ne.s32.totalorder %s1112_s12, 1 }
  0xf5   : > { %504 = sbr.rel (%p940_p5) target bundleno = 303 (0x12f), region = 44 }
  0xfa   : > { %v522_v30 = vld [vmem:[#allocation3] sm:$0x1]  ;;  %v524_v32 = vld [vmem:[#allocation3 + $0x1] sm:$0x1]  ;;  %v1227_v41 = vld [vmem:[%s1397_s2 + $0x8] sm:$0xff]  }
  0xfb   : > { %v523_v31 = vmul.f32 0.0078125, %v522_v30  ;;  %v525_v33 = vmul.f32 0.0078125, %v524_v32  ;;  %v1222_v40 = vld [vmem:[%s1397_s2] sm:$0xff]   ;;  %v1229_v42 = vld [vmem:[#allocation2 + $0x30] sm:$0xff]  ;;  %v1235_v46 = vld [vmem:[#allocation2 + $0x58] sm:$0xff]  ;;  %v967_v51 = vunpack.c.l.bf16 %v1227_v41  ;;  %v968_v55 = vunpack.c.h.bf16 %v1227_v41 }
  0xfc   : > { %v1233_v44 = vld [vmem:[#allocation2] sm:$0xff]  ;;  %v1240_v47 = vld [vmem:[%s1397_s2 + $0x10] sm:$0xff]   ;;  %v963_v48 = vunpack.c.l.bf16 %v1222_v40  ;;  %v964_v49 = vunpack.c.h.bf16 %v1222_v40  ;;  %v509_v50 = vld [vmem:[#allocation2 + $0x18] sm:$0xff] }
  0xfd   : > { %v526_v34 = vmul.f32 %v523_v31, %v523_v31  ;;  %v1231_v43 = vperm.slane %v523_v31, 0  ;;  %v510_v52 = vld [vmem:[#allocation2 + $0x50] sm:$0xff]  ;;  %v511_v53 = vld [vmem:[#allocation2 + $0x68] sm:$0xff]  ;;  %v1249_v58 = vld [vmem:[%s1397_s2 + $0x18] sm:$0xff]   ;;  %v971_v61 = vunpack.c.l.bf16 %v1240_v47  ;;  %v972_v62 = vunpack.c.h.bf16 %v1240_v47 }
  0xfe   : > { %v512_v56 = vld [vmem:[#allocation2 + $0x8] sm:$0xff]  ;;  %v1257_v63 = vld [vmem:[#allocation2 + $0x40] sm:$0xff]  ;;  %v1270_v6 = vld [vmem:[#allocation2 + $0x10] sm:$0xff]  ;;  %v975_v12 = vunpack.c.l.bf16 %v1249_v58  ;;  %v976_v16 = vunpack.c.h.bf16 %v1249_v58 }
  0xff   : > { %v527_v35 = vsub.f32 %v525_v33, %v526_v34  ;;  %v513_v57 = vld [vmem:[#allocation2 + $0x48] sm:$0xff]  ;;  %v530_v59 = vsub.f32 %v1229_v42, %v1231_v43  ;;  %v531_v60 = vsub.f32 %v1233_v44, %v1231_v43  ;;  %v1259_v0 = vld [vmem:[#allocation2 + $0x20] sm:$0xff]  ;;  %v532_v2 = vsub.f32 %v1235_v46, %v1231_v43  ;;  %v1272_v7 = vld [vmem:[#allocation2 + $0x38] sm:$0xff] }
 0x100   : > { %v533_v3 = vsub.f32 %v509_v50, %v1231_v43  ;;  %v534_v4 = vsub.f32 %v510_v52, %v1231_v43  ;;  %v1268_v5 = vld [vmem:[%s1397_s2 + $0x20] sm:$0xff]   ;;  %v535_v9 = vsub.f32 %v511_v53, %v1231_v43  ;;  %v536_v10 = vsub.f32 %v512_v56, %v1231_v43  ;;  %v1287_v13 = vld [vmem:[%s1397_s2 + $0x28] sm:$0xff]   ;;  %v1296_v20 = vld [vmem:[#allocation2 + $0x70] sm:$0xff] }
 0x101   : > { %v528_v36 = vmax.f32 %v527_v35, 0.0  ;;  %v537_v11 = vsub.f32 %v513_v57, %v1231_v43  ;;  %v1289_v14 = vld [vmem:[#allocation2 + $0x60] sm:$0xff]  ;;  %v538_v17 = vsub.f32 %v1257_v63, %v1231_v43  ;;  %v539_v18 = vsub.f32 %v1259_v0, %v1231_v43  ;;  %v1301_v21 = vld [vmem:[%s1397_s2 + $0x30] sm:$0xff]   ;;  %v1303_v22 = vld [vmem:[#allocation2 + $0x78] sm:$0xff] }
 0x102   : > { %v979_v24 = vunpack.c.l.bf16 %v1268_v5  ;;  %v980_v19 = vunpack.c.h.bf16 %v1268_v5  ;;  %v540_v25 = vsub.f32 %v1270_v6, %v1231_v43  ;;  %v541_v26 = vsub.f32 %v1272_v7, %v1231_v43  ;;  %v1311_v23 = vld [vmem:[#allocation2 + $0x28] sm:$0xff]  ;;  %v1316_v27 = vld [vmem:[%s1397_s2 + $0x38] sm:$0xff]  }
 0x103   : > { %v546_v37 = vadd.f32 1e-05, %v528_v36  ;;  %v983_v29 = vunpack.c.l.bf16 %v1287_v13  ;;  %v984_v30 = vunpack.c.h.bf16 %v1287_v13  ;;  %v542_v31 = vsub.f32 %v1289_v14, %v1231_v43 }
 0x104   : > { %v543_v33 = vsub.f32 %v1296_v20, %v1231_v43  ;;  %v987_v34 = vunpack.c.l.bf16 %v1301_v21  ;;  %v544_v35 = vsub.f32 %v1303_v22, %v1231_v43  ;;  %v988_v36 = vunpack.c.h.bf16 %v1301_v21 }
 0x105   : > { %1096 = vrsqrt.f32 %v546_v37  ;;  %vm553_vm1 = vweird.f32 %v546_v37 }
 0x10b   : > { %v1097_v38 = vpop.eup %1096 }
 0x10c   : > { %v548_v39 = vmul.f32 %v1097_v38, %v546_v37  ;;  %vm554_vm2 = vweird.f32 %v1097_v38  ;;  %v545_v37 = vsub.f32 %v1311_v23, %v1231_v43 }
 0x10d   : > { %vm1276_vm3 = vmor %vm553_vm1, %vm554_vm2 }
 0x10e   : > { %v549_v45 = vmul.f32 %v1097_v38, %v548_v39  ;;  %v992_v39 = vunpack.c.h.bf16 %v1316_v27 }
 0x110   : > { %v550_v54 = vmul.f32 0.5, %v549_v45 }
 0x112   : > { %v551_v1 = vsub.f32 1.5, %v550_v54 }
 0x114   : > { %v552_v15 = vmul.f32 %v1097_v38, %v551_v1 }
 0x116   : > { %v556_v28 = vsel %vm1276_vm3, %v1097_v38, %v552_v15  ;;  %v991_v38 = vunpack.c.l.bf16 %v1316_v27 }
 0x117   : > { %v557_v32 = vperm.slane %v556_v28, 0 }
 0x119   : > { %v558_v42 = vmul.f32 %v557_v32, %v530_v59  ;;  %v559_v44 = vmul.f32 %v557_v32, %v531_v60  ;;  %v560_v45 = vmul.f32 %v557_v32, %v532_v2  ;;  %v561_v46 = vmul.f32 %v557_v32, %v533_v3 }
 0x11a   : > { %v562_v50 = vmul.f32 %v557_v32, %v534_v4  ;;  %v563_v52 = vmul.f32 %v557_v32, %v535_v9  ;;  %v564_v53 = vmul.f32 %v557_v32, %v536_v10  ;;  %v565_v54 = vmul.f32 %v557_v32, %v537_v11 }
 0x11b   : > { %v574_v56 = vmax.f32 %v558_v42, 0.0  ;;  %v575_v57 = vmax.f32 %v559_v44, 0.0  ;;  %v576_v58 = vmax.f32 %v560_v45, 0.0  ;;  %v577_v63 = vmax.f32 %v561_v46, 0.0 }
 0x11c   : > { %v578_v0 = vmax.f32 %v562_v50, 0.0  ;;  %v579_v1 = vmax.f32 %v563_v52, 0.0  ;;  %v580_v6 = vmax.f32 %v564_v53, 0.0  ;;  %v581_v43 = vmax.f32 %v565_v54, 0.0 }
 0x11d   : > { %v622_v7 = vadd.f32 %v963_v48, %v574_v56  ;;  %v623_v59 = vadd.f32 %v964_v49, %v575_v57  ;;  %v624_v60 = vadd.f32 %v967_v51, %v576_v58  ;;  %v625_v2 = vadd.f32 %v968_v55, %v577_v63 }
 0x11e   : > { %v626_v3 = vadd.f32 %v971_v61, %v578_v0  ;;  %v627_v4 = vadd.f32 %v972_v62, %v579_v1  ;;  %v628_v8 = vadd.f32 %v975_v12, %v580_v6  ;;  %v629_v9 = vadd.f32 %v976_v16, %v581_v43 }
 0x11f   : > { %v638_v10 = vmax.f32 %v622_v7, 0.0  ;;  %v639_v11 = vmax.f32 %v623_v59, 0.0  ;;  %v640_v48 = vmax.f32 %v624_v60, 0.0  ;;  %v641_v14 = vmax.f32 %v625_v2, 0.0 }
 0x120   : > { %v642_v40 = vmax.f32 %v626_v3, 0.0  ;;  %v643_v49 = vmax.f32 %v627_v4, 0.0  ;;  %v644_v15 = vmax.f32 %v628_v8, 0.0  ;;  %v645_v20 = vmax.f32 %v629_v9, 0.0 }
 0x121   : > { %v996_v51 = vpack.c.bf16 %v639_v11, %v638_v10  ;;  %v1001_v22 = vpack.c.bf16 %v641_v14, %v640_v48  ;;  %v566_v41 = vmul.f32 %v557_v32, %v538_v17  ;;  %v567_v55 = vmul.f32 %v557_v32, %v539_v18 }
 0x122   : > { %v1006_v23 = vpack.c.bf16 %v643_v49, %v642_v40  ;;  %v1011_v28 = vpack.c.bf16 %v645_v20, %v644_v15  ;;  %v568_v61 = vmul.f32 %v557_v32, %v540_v25  ;;  %v569_v42 = vmul.f32 %v557_v32, %v541_v26 }
 0x123   : > { %997 = vst [vmem:[%s1398_s3] sm:$0xff] %v996_v51   ;;  %v582_v47 = vmax.f32 %v566_v41, 0.0  ;;  %v583_v62 = vmax.f32 %v567_v55, 0.0  ;;  %v570_v12 = vmul.f32 %v557_v32, %v542_v31  ;;  %v571_v16 = vmul.f32 %v557_v32, %v543_v33 }
 0x124   : > { %1040 = vst [vmem:[%s1398_s3 + $0x8] sm:$0xff] %v1001_v22   ;;  %v584_v44 = vmax.f32 %v568_v61, 0.0  ;;  %v585_v45 = vmax.f32 %v569_v42, 0.0  ;;  %v572_v17 = vmul.f32 %v557_v32, %v544_v35  ;;  %v573_v18 = vmul.f32 %v557_v32, %v545_v37 }
 0x125   : > { %1041 = vst [vmem:[%s1398_s3 + $0x10] sm:$0xff] %v1006_v23   ;;  %v630_v25 = vadd.f32 %v979_v24, %v582_v47  ;;  %v631_v26 = vadd.f32 %v980_v19, %v583_v62  ;;  %v586_v31 = vmax.f32 %v570_v12, 0.0  ;;  %v587_v33 = vmax.f32 %v571_v16, 0.0 }
 0x126   : > { %1042 = vst [vmem:[%s1398_s3 + $0x18] sm:$0xff] %v1011_v28   ;;  %v632_v35 = vadd.f32 %v983_v29, %v584_v44  ;;  %v633_v32 = vadd.f32 %v984_v30, %v585_v45  ;;  %v588_v37 = vmax.f32 %v572_v17, 0.0  ;;  %v589_v46 = vmax.f32 %v573_v18, 0.0 }
 0x127   : > { %v646_v50 = vmax.f32 %v630_v25, 0.0  ;;  %v647_v52 = vmax.f32 %v631_v26, 0.0  ;;  %v634_v5 = vadd.f32 %v987_v34, %v586_v31  ;;  %v635_v24 = vadd.f32 %v988_v36, %v587_v33 }
 0x128   : > { %v648_v19 = vmax.f32 %v632_v35, 0.0  ;;  %v649_v53 = vmax.f32 %v633_v32, 0.0  ;;  %v636_v54 = vadd.f32 %v991_v38, %v588_v37  ;;  %v637_v29 = vadd.f32 %v992_v39, %v589_v46 }
 0x129   : > { %v1016_v13 = vpack.c.bf16 %v647_v52, %v646_v50  ;;  %v650_v30 = vmax.f32 %v634_v5, 0.0  ;;  %v651_v56 = vmax.f32 %v635_v24, 0.0 }
 0x12a   : > { %v1021_v57 = vpack.c.bf16 %v649_v53, %v648_v19  ;;  %v652_v58 = vmax.f32 %v636_v54, 0.0  ;;  %v653_v63 = vmax.f32 %v637_v29, 0.0 }
 0x12b   : > { %1043 = vst [vmem:[%s1398_s3 + $0x20] sm:$0xff] %v1016_v13   ;;  %v1026_v21 = vpack.c.bf16 %v651_v56, %v650_v30 }
 0x12c   : > { %1044 = vst [vmem:[%s1398_s3 + $0x28] sm:$0xff] %v1021_v57   ;;  %v1031_v34 = vpack.c.bf16 %v653_v63, %v652_v58 }
 0x12d   : > { %1045 = vst [vmem:[%s1398_s3 + $0x30] sm:$0xff] %v1026_v21  }
 0x12e   : > { %1046 = vst [vmem:[%s1398_s3 + $0x38] sm:$0xff] %v1031_v34  }
 0x12f PF: > { %s13_s14 = sadd.s32 1, %s1120_s14   ;;  %s1401_s12 = smov %s1116_s13 }
 0x130   : > { %p10_p6 = scmp.ge.s32.totalorder %s13_s14, 4   ;;  %s1402_s13 = smov %s1404_s15 }
 0x132   :  { %12 = sbr.rel (!%p10_p6) target bundleno = 2 (0x2), region = 79 }

// kernel: _lambda_.28
= control target key start
LH: loop header
LB: loop body
LE: loop exit
PB: predicated region body
PF: predicated region fallthrough
CT: control target
= control target key end

     0   :  { %s963_s15 = smov 0   ;;  %s965_s16 = smov 0   ;;  %s1066_s0 = inlined_call_operand.vmem [shape: bf16[32,128], index: 0, kind: input, shape index: {}]   ;;  %s1067_s1 = inlined_call_operand.vmem [shape: bf16[128,128], index: 1, kind: input, shape index: {}]   ;;  %s1068_s2 = inlined_call_operand.vmem [shape: bf16[32,128], index: 2, kind: input, shape index: {}]   ;;  %s1069_s3 = inlined_call_operand.vmem [shape: bf16[128,128], index: 3, kind: input, shape index: {}]   ;;  %s1070_s4 = inlined_call_operand.vmem [shape: bf16[32,128], index: 4, kind: output, shape index: {}]  }
   0x1   :  { %s967_s17 = smov 0  }
   0x2 LB: > { %s26_s18 = sadd.s32 1, %s931_s16  ;;  %p750_p0 = scmp.ge.s32.totalorder %s935_s17, 1  ;;  %s935_s17 = sphi %s967_s17, %s14_s17   ;;  %s931_s16 = sphi %s965_s16, %s1074_s16   ;;  %s927_s15 = sphi %s963_s15, %s1073_s15  }
   0x3   : > { %p28_p1 = scmp.ge.s32.totalorder %s26_s18, 2  ;;  %p204_p2 = scmp.lt.s32.totalorder %s935_s17, 3 }
   0x5   : > { %s1076_s18 = smov (%p28_p1, %s26_s18), 0  ;;  %p205_p3 = pnand %p750_p0, %p204_p2 }
   0x6   : > { %p751_p4 = scmp.ne.s32.totalorder (!%p205_p3), %s927_s15, 0 }
   0x7   : > { %208 = sbr.rel (%p205_p3) target bundleno = 260 (0x104), region = 36 }
   0xc   : > { %272 = sbr.rel (%p751_p4) target bundleno = 210 (0xd2), region = 40 }
  0x11   : > { %v846_v0 = vld [vmem:[%s1067_s1 + $0x38] sm:$0xff]  ;;  %v845_v2 = vld [vmem:[%s1067_s1 + $0x30] sm:$0xff]  ;;  %v844_v4 = vld [vmem:[%s1067_s1 + $0x28] sm:$0xff]  ;;  %v937_v20 = vmov 0.0   ;;  %vm406_vm0 = vcmask 1040384  }
  0x12   : > { %v856_v1 = vld [vmem:[%s1069_s3 + $0x38] sm:$0xff]  ;;  %359 = vmatpush.bf16.msra.mxu0 %v846_v0  ;;  %868 = vmatpush.bf16.msra.mxu2 %v846_v0  ;;  %v855_v3 = vld [vmem:[%s1069_s3 + $0x30] sm:$0xff]  ;;  %v854_v5 = vld [vmem:[%s1069_s3 + $0x28] sm:$0xff]  ;;  %277 = vst [vmem:[#allocation3] sm:$0x3] %v937_v20 }
  0x13   : > { %490 = vmatpush.bf16.msra.mxu1 %v856_v1  ;;  %876 = vmatpush.bf16.msra.mxu3 %v856_v1  ;;  %v843_v6 = vld [vmem:[%s1067_s1 + $0x20] sm:$0xff]  ;;  %v842_v8 = vld [vmem:[%s1067_s1 + $0x18] sm:$0xff]  ;;  %v841_v10 = vld [vmem:[%s1067_s1 + $0x10] sm:$0xff]  ;;  %278 = vst [vmem:[#allocation5] sm:$0x3] %v937_v20 }
  0x14   : > { %v853_v7 = vld [vmem:[%s1069_s3 + $0x20] sm:$0xff]  ;;  %v852_v9 = vld [vmem:[%s1069_s3 + $0x18] sm:$0xff]  ;;  %v851_v11 = vld [vmem:[%s1069_s3 + $0x10] sm:$0xff] }
  0x15   : > { %v840_v12 = vld [vmem:[%s1067_s1 + $0x8] sm:$0xff]  ;;  %v839_v14 = vld [vmem:[%s1067_s1] sm:$0xff] }
  0x16   : > { %360 = vmatpush.bf16.msra.mxu0 %v845_v2  ;;  %869 = vmatpush.bf16.msra.mxu2 %v845_v2  ;;  %v850_v13 = vld [vmem:[%s1069_s3 + $0x8] sm:$0xff]  ;;  %v849_v15 = vld [vmem:[%s1069_s3] sm:$0xff] }
  0x17   : > { %491 = vmatpush.bf16.msra.mxu1 %v855_v3  ;;  %877 = vmatpush.bf16.msra.mxu3 %v855_v3  ;;  %v837_v16 = vld [vmem:[%s1066_s0] sm:$0xff]  ;;  %v838_v17 = vld [vmem:[%s1066_s0 + $0x8] sm:$0xff] }
  0x18   : > { %v847_v18 = vld [vmem:[%s1068_s2] sm:$0xff]  ;;  %v848_v19 = vld [vmem:[%s1068_s2 + $0x8] sm:$0xff] }
  0x1a   : > { %361 = vmatpush.bf16.msra.mxu0 %v844_v4  ;;  %870 = vmatpush.bf16.msra.mxu2 %v844_v4 }
  0x1b   : > { %492 = vmatpush.bf16.msra.mxu1 %v854_v5  ;;  %878 = vmatpush.bf16.msra.mxu3 %v854_v5  ;;  %v383_v5 = vld [vmem:[#allocation3] sm:$0x3] }
  0x1e   : > { %362 = vmatpush.bf16.msra.mxu0 %v843_v6  ;;  %871 = vmatpush.bf16.msra.mxu2 %v843_v6 }
  0x1f   : > { %493 = vmatpush.bf16.msra.mxu1 %v853_v7  ;;  %879 = vmatpush.bf16.msra.mxu3 %v853_v7 }
  0x22   : > { %363 = vmatpush.bf16.msra.mxu0 %v842_v8  ;;  %872 = vmatpush.bf16.msra.mxu2 %v842_v8  ;;  %v514_v8 = vld [vmem:[#allocation5] sm:$0x3] }
  0x23   : > { %494 = vmatpush.bf16.msra.mxu1 %v852_v9  ;;  %880 = vmatpush.bf16.msra.mxu3 %v852_v9 }
  0x26   : > { %364 = vmatpush.bf16.msra.mxu0 %v841_v10  ;;  %873 = vmatpush.bf16.msra.mxu2 %v841_v10 }
  0x27   : > { %495 = vmatpush.bf16.msra.mxu1 %v851_v11  ;;  %881 = vmatpush.bf16.msra.mxu3 %v851_v11 }
  0x2a   : > { %365 = vmatpush.bf16.msra.mxu0 %v840_v12  ;;  %874 = vmatpush.bf16.msra.mxu2 %v840_v12 }
  0x2b   : > { %496 = vmatpush.bf16.msra.mxu1 %v850_v13  ;;  %882 = vmatpush.bf16.msra.mxu3 %v850_v13 }
  0x2e   : > { %366 = vmatpush.bf16.msra.mxu0 %v839_v14  ;;  %875 = vmatpush.bf16.msra.mxu2 %v839_v14 }
  0x2f   : > { %497 = vmatpush.bf16.msra.mxu1 %v849_v15  ;;  %883 = vmatpush.bf16.msra.mxu3 %v849_v15 }
  0x31   : > { %367 = vmatmul.bf16.vlgmr.msra.gmra.mxu0 %v837_v16  ;;  %372 = vmatmul.bf16.vlgmr.msra.gmra.mxu2 %v838_v17 }
  0x32   : > { %498 = vmatmul.bf16.vlgmr.msra.gmra.mxu1 %v847_v18  ;;  %503 = vmatmul.bf16.vlgmr.msra.gmra.mxu3 %v848_v19 }
  0xae   : > { %v368_v21 = vpop.f32.mrf.mxu0 }
  0xaf   : > { %379 = vst [vmem:[#allocation2 + $0x10] sm:$0xff] %v368_v21  ;;  %v499_v22 = vpop.f32.mrf.mxu1  ;;  %v393_v26 = vmul.f32 %v368_v21, %v368_v21 }
  0xb0   : > { %510 = vst [vmem:[#allocation4] sm:$0xff] %v499_v22  ;;  %v524_v30 = vmul.f32 %v499_v22, %v499_v22 }
  0xb4   : > { %v373_v23 = vpop.f32.mrf.mxu2 }
  0xb5   : > { %381 = vst [vmem:[#allocation2 + $0x18] sm:$0xff] %v373_v23  ;;  %v504_v24 = vpop.f32.mrf.mxu3  ;;  %v395_v35 = vmul.f32 %v373_v23, %v373_v23 }
  0xb6   : > { %512 = vst [vmem:[#allocation4 + $0x8] sm:$0xff] %v504_v24  ;;  %v370_v25 = vpop.f32.mrf.mxu0  ;;  %v526_v37 = vmul.f32 %v504_v24, %v504_v24 }
  0xb7   : > { %380 = vst [vmem:[#allocation2] sm:$0xff] %v370_v25  ;;  %v384_v27 = vadd.f32 %v370_v25, %v368_v21  ;;  %v394_v28 = vmul.f32 %v370_v25, %v370_v25  ;;  %v501_v29 = vpop.f32.mrf.mxu1 }
  0xb8   : > { %511 = vst [vmem:[#allocation4 + $0x18] sm:$0xff] %v501_v29  ;;  %v515_v31 = vadd.f32 %v501_v29, %v499_v22  ;;  %v525_v32 = vmul.f32 %v501_v29, %v501_v29 }
  0xb9   : > { %v397_v33 = vadd.f32 %v394_v28, %v393_v26  ;;  %v385_v36 = vadd.f32 %v384_v27, %v373_v23 }
  0xba   : > { %v528_v34 = vadd.f32 %v525_v32, %v524_v30  ;;  %v516_v39 = vadd.f32 %v515_v31, %v504_v24 }
  0xbb   : > { %v398_v42 = vadd.f32 %v397_v33, %v395_v35 }
  0xbc   : > { %v375_v38 = vpop.f32.mrf.mxu2  ;;  %v529_v46 = vadd.f32 %v528_v34, %v526_v37 }
  0xbd   : > { %382 = vst [vmem:[#allocation2 + $0x8] sm:$0xff] %v375_v38  ;;  %v386_v40 = vadd.f32 %v385_v36, %v375_v38  ;;  %v396_v41 = vmul.f32 %v375_v38, %v375_v38  ;;  %v506_v43 = vpop.f32.mrf.mxu3 }
  0xbe   : > { %513 = vst [vmem:[#allocation4 + $0x10] sm:$0xff] %v506_v43  ;;  %v517_v44 = vadd.f32 %v516_v39, %v506_v43  ;;  %v527_v45 = vmul.f32 %v506_v43, %v506_v43 }
  0xbf   : > { %v387_v47 = vrot.slane %v386_v40, 4  ;;  %v399_v48 = vadd.f32 %v398_v42, %v396_v41 }
  0xc0   : > { %v518_v49 = vrot.slane %v517_v44, 4  ;;  %v530_v50 = vadd.f32 %v529_v46, %v527_v45 }
  0xc1   : > { %v388_v51 = vadd.f32 %v387_v47, %v386_v40  ;;  %v400_v52 = vrot.slane %v399_v48, 4 }
  0xc2   : > { %v519_v53 = vadd.f32 %v518_v49, %v517_v44  ;;  %v531_v54 = vrot.slane %v530_v50, 4 }
  0xc3   : > { %v389_v55 = vrot.slane %v388_v51, 2  ;;  %v401_v56 = vadd.f32 %v400_v52, %v399_v48 }
  0xc4   : > { %v520_v57 = vrot.slane %v519_v53, 2  ;;  %v532_v58 = vadd.f32 %v531_v54, %v530_v50 }
  0xc5   : > { %v390_v59 = vadd.f32 %v389_v55, %v388_v51  ;;  %v402_v60 = vrot.slane %v401_v56, 2 }
  0xc6   : > { %v521_v61 = vadd.f32 %v520_v57, %v519_v53  ;;  %v533_v62 = vrot.slane %v532_v58, 2 }
  0xc7   : > { %v391_v63 = vrot.slane %v390_v59, 1  ;;  %v403_v0 = vadd.f32 %v402_v60, %v401_v56 }
  0xc8   : > { %v522_v1 = vrot.slane %v521_v61, 1  ;;  %v534_v2 = vadd.f32 %v533_v62, %v532_v58 }
  0xc9   : > { %v404_v3 = vrot.slane %v403_v0, 1  ;;  %v392_v6 = vadd.f32 %v391_v63, %v390_v59 }
  0xca   : > { %v535_v4 = vrot.slane %v534_v2, 1  ;;  %v523_v9 = vadd.f32 %v522_v1, %v521_v61 }
  0xcb   : > { %v405_v7 = vadd.f32 %v404_v3, %v403_v0 }
  0xcc   : > { %v536_v10 = vadd.f32 %v535_v4, %v534_v2 }
  0xcd   : > { %v407_v11 = vsel %vm406_vm0, %v392_v6, %v405_v7 }
  0xce   : > { %v408_v12 = vadd.f32 %v407_v11, %v383_v5  ;;  %v537_v13 = vsel %vm406_vm0, %v523_v9, %v536_v10 }
  0xcf   : > { %v538_v14 = vadd.f32 %v537_v13, %v514_v8 }
  0xd0   : > { %409 = vst [vmem:[#allocation3] sm:$0x3] %v408_v12 }
  0xd1   : > { %539 = vst [vmem:[#allocation5] sm:$0x3] %v538_v14 }
  0xd2 PF: > { %p832_p5 = scmp.ne.s32.totalorder %s927_s15, 1 }
  0xd4   : > { %543 = sbr.rel (%p832_p5) target bundleno = 260 (0x104), region = 48 }
  0xd9   : > { %v549_v15 = vld [vmem:[#allocation3] sm:$0x1]  ;;  %v551_v17 = vld [vmem:[#allocation3 + $0x1] sm:$0x1]  ;;  %v586_v19 = vld [vmem:[#allocation5] sm:$0x1] }
  0xda   : > { %v550_v16 = vmul.f32 0.03125, %v549_v15  ;;  %v552_v18 = vmul.f32 0.03125, %v551_v17  ;;  %v588_v20 = vld [vmem:[#allocation5 + $0x1] sm:$0x1]  ;;  %v587_v22 = vmul.f32 0.03125, %v586_v19  ;;  %v545_v39 = vld [vmem:[#allocation2 + $0x10] sm:$0xff] }
  0xdb   : > { %v589_v23 = vmul.f32 0.03125, %v588_v20  ;;  %v546_v40 = vld [vmem:[#allocation2] sm:$0xff]  ;;  %v547_v43 = vld [vmem:[#allocation2 + $0x18] sm:$0xff]  ;;  %v548_v46 = vld [vmem:[#allocation2 + $0x8] sm:$0xff] }
  0xdc   : > { %v553_v21 = vmul.f32 %v550_v16, %v550_v16  ;;  %v590_v25 = vmul.f32 %v587_v22, %v587_v22  ;;  %v556_v38 = vperm.slane %v550_v16, 0  ;;  %v593_v45 = vperm.slane %v587_v22, 0  ;;  %v582_v48 = vld [vmem:[#allocation4] sm:$0xff]  ;;  %v583_v49 = vld [vmem:[#allocation4 + $0x18] sm:$0xff]  ;;  %v584_v54 = vld [vmem:[#allocation4 + $0x8] sm:$0xff] }
  0xdd   : > { %v585_v55 = vld [vmem:[#allocation4 + $0x10] sm:$0xff] }
  0xde   : > { %v554_v24 = vsub.f32 %v552_v18, %v553_v21  ;;  %v591_v27 = vsub.f32 %v589_v23, %v590_v25  ;;  %v557_v51 = vsub.f32 %v545_v39, %v556_v38  ;;  %v558_v52 = vsub.f32 %v546_v40, %v556_v38 }
  0xdf   : > { %v559_v53 = vsub.f32 %v547_v43, %v556_v38  ;;  %v560_v58 = vsub.f32 %v548_v46, %v556_v38  ;;  %v594_v60 = vsub.f32 %v582_v48, %v593_v45  ;;  %v595_v61 = vsub.f32 %v583_v49, %v593_v45 }
  0xe0   : > { %v555_v26 = vmax.f32 %v554_v24, 0.0  ;;  %v592_v29 = vmax.f32 %v591_v27, 0.0  ;;  %v596_v63 = vsub.f32 %v584_v54, %v593_v45  ;;  %v597_v0 = vsub.f32 %v585_v55, %v593_v45 }
  0xe2   : > { %v561_v28 = vadd.f32 1e-05, %v555_v26  ;;  %v598_v30 = vadd.f32 1e-05, %v592_v29 }
  0xe4   : > { %909 = vrsqrt.f32 %v561_v28  ;;  %vm568_vm1 = vweird.f32 %v561_v28  ;;  %vm605_vm3 = vweird.f32 %v598_v30 }
  0xe5   : > { %911 = vrsqrt.f32 %v598_v30 }
  0xea   : > { %v910_v31 = vpop.eup %909 }
  0xeb   : > { %v563_v32 = vmul.f32 %v910_v31, %v561_v28  ;;  %v912_v33 = vpop.eup %911  ;;  %vm569_vm2 = vweird.f32 %v910_v31 }
  0xec   : > { %v600_v35 = vmul.f32 %v912_v33, %v598_v30  ;;  %vm606_vm4 = vweird.f32 %v912_v33  ;;  %vm1045_vm5 = vmor %vm568_vm1, %vm569_vm2 }
  0xed   : > { %v564_v34 = vmul.f32 %v910_v31, %v563_v32  ;;  %vm607_vm6 = vmor %vm605_vm3, %vm606_vm4 }
  0xee   : > { %v601_v37 = vmul.f32 %v912_v33, %v600_v35 }
  0xef   : > { %v565_v36 = vmul.f32 0.5, %v564_v34 }
  0xf0   : > { %v602_v42 = vmul.f32 0.5, %v601_v37 }
  0xf1   : > { %v566_v41 = vsub.f32 1.5, %v565_v36 }
  0xf2   : > { %v603_v50 = vsub.f32 1.5, %v602_v42 }
  0xf3   : > { %v567_v47 = vmul.f32 %v910_v31, %v566_v41 }
  0xf4   : > { %v604_v57 = vmul.f32 %v912_v33, %v603_v50 }
  0xf5   : > { %v571_v56 = vsel %vm1045_vm5, %v910_v31, %v567_v47 }
  0xf6   : > { %v572_v59 = vperm.slane %v571_v56, 0  ;;  %v608_v62 = vsel %vm607_vm6, %v912_v33, %v604_v57 }
  0xf7   : > { %v609_v3 = vperm.slane %v608_v62, 0 }
  0xf8   : > { %v573_v1 = vmul.f32 %v572_v59, %v557_v51  ;;  %v574_v2 = vmul.f32 %v572_v59, %v558_v52  ;;  %v575_v4 = vmul.f32 %v572_v59, %v559_v53  ;;  %v576_v5 = vmul.f32 %v572_v59, %v560_v58 }
  0xf9   : > { %v610_v8 = vmul.f32 %v609_v3, %v594_v60  ;;  %v611_v9 = vmul.f32 %v609_v3, %v595_v61  ;;  %v612_v12 = vmul.f32 %v609_v3, %v596_v63  ;;  %v613_v13 = vmul.f32 %v609_v3, %v597_v0 }
  0xfa   : > { %v577_v6 = vmax.f32 %v573_v1, 0.0  ;;  %v578_v7 = vmax.f32 %v574_v2, 0.0  ;;  %v579_v10 = vmax.f32 %v575_v4, 0.0  ;;  %v580_v11 = vmax.f32 %v576_v5, 0.0 }
  0xfc   : > { %v614_v14 = vadd.f32 %v610_v8, %v577_v6  ;;  %v615_v15 = vadd.f32 %v611_v9, %v578_v7  ;;  %v616_v16 = vadd.f32 %v612_v12, %v579_v10  ;;  %v617_v17 = vadd.f32 %v613_v13, %v580_v11 }
  0xfe   : > { %v618_v18 = vmax.f32 %v614_v14, 0.0  ;;  %v619_v19 = vmax.f32 %v615_v15, 0.0  ;;  %v620_v20 = vmax.f32 %v616_v16, 0.0  ;;  %v621_v21 = vmax.f32 %v617_v17, 0.0 }
 0x100   : > { %v860_v22 = vpack.c.bf16 %v619_v19, %v618_v18  ;;  %v865_v23 = vpack.c.bf16 %v621_v21, %v620_v20 }
 0x102   : > { %861 = vst [vmem:[%s1070_s4] sm:$0xff] %v860_v22  }
 0x103   : > { %867 = vst [vmem:[%s1070_s4 + $0x8] sm:$0xff] %v865_v23  }
 0x104 PF: > { %s14_s17 = sadd.s32 1, %s935_s17   ;;  %s1073_s15 = smov %s931_s16 }
 0x105   : > { %p11_p6 = scmp.ge.s32.totalorder %s14_s17, 4   ;;  %s1074_s16 = smov %s1076_s18 }
 0x107   :  { %13 = sbr.rel (!%p11_p6) target bundleno = 2 (0x2), region = 85 }

// kernel: _lambda_.29
= control target key start
LH: loop header
LB: loop body
LE: loop exit
PB: predicated region body
PF: predicated region fallthrough
CT: control target
= control target key end

     0   :  { %s614_s9 = smov 0   ;;  %s616_s10 = smov 0   ;;  %s681_s0 = inlined_call_operand.vmem [shape: bf16[32,128], index: 0, kind: input, shape index: {}]   ;;  %s682_s1 = inlined_call_operand.vmem [shape: bf16[128,128], index: 1, kind: input, shape index: {}]   ;;  %s683_s2 = inlined_call_operand.vmem [shape: bf16[32,128], index: 2, kind: output, shape index: {}]  }
   0x1   :  { %s618_s11 = smov 0  }
   0x2 LB: > { %s24_s12 = sadd.s32 1, %s592_s10  ;;  %p471_p0 = scmp.ge.s32.totalorder %s596_s11, 1  ;;  %s596_s11 = sphi %s618_s11, %s12_s11   ;;  %s592_s10 = sphi %s616_s10, %s685_s10   ;;  %s588_s9 = sphi %s614_s9, %s684_s9  }
   0x3   : > { %p26_p1 = scmp.ge.s32.totalorder %s24_s12, 2  ;;  %p135_p2 = scmp.lt.s32.totalorder %s596_s11, 3 }
   0x5   : > { %s687_s12 = smov (%p26_p1, %s24_s12), 0  ;;  %p136_p3 = pnand %p471_p0, %p135_p2 }
   0x6   : > { %p472_p4 = scmp.ne.s32.totalorder (!%p136_p3), %s588_s9, 0 }
   0x7   : > { %139 = sbr.rel (%p136_p3) target bundleno = 253 (0xfd), region = 28 }
   0xc   : > { %182 = sbr.rel (%p472_p4) target bundleno = 207 (0xcf), region = 32 }
  0x11   : > { %v527_v0 = vld [vmem:[%s682_s1 + $0x38] sm:$0xff]  ;;  %v526_v1 = vld [vmem:[%s682_s1 + $0x30] sm:$0xff]  ;;  %v525_v2 = vld [vmem:[%s682_s1 + $0x28] sm:$0xff]  ;;  %v598_v10 = vmov 0.0   ;;  %vm315_vm0 = vcmask 1040384  }
  0x12   : > { %268 = vmatpush.bf16.msra.mxu0 %v527_v0  ;;  %539 = vmatpush.bf16.msra.mxu1 %v527_v0  ;;  %v524_v3 = vld [vmem:[%s682_s1 + $0x20] sm:$0xff]  ;;  %v523_v4 = vld [vmem:[%s682_s1 + $0x18] sm:$0xff]  ;;  %v522_v5 = vld [vmem:[%s682_s1 + $0x10] sm:$0xff]  ;;  %187 = vst [vmem:[#allocation3] sm:$0x3] %v598_v10 }
  0x13   : > { %v521_v6 = vld [vmem:[%s682_s1 + $0x8] sm:$0xff]  ;;  %v520_v7 = vld [vmem:[%s682_s1] sm:$0xff] }
  0x14   : > { %v518_v8 = vld [vmem:[%s681_s0] sm:$0xff]  ;;  %v519_v9 = vld [vmem:[%s681_s0 + $0x8] sm:$0xff] }
  0x16   : > { %269 = vmatpush.bf16.msra.mxu0 %v526_v1  ;;  %540 = vmatpush.bf16.msra.mxu1 %v526_v1 }
  0x19   : > { %v292_v35 = vld [vmem:[#allocation3] sm:$0x3] }
  0x1a   : > { %270 = vmatpush.bf16.msra.mxu0 %v525_v2  ;;  %541 = vmatpush.bf16.msra.mxu1 %v525_v2 }
  0x1e   : > { %271 = vmatpush.bf16.msra.mxu0 %v524_v3  ;;  %542 = vmatpush.bf16.msra.mxu1 %v524_v3 }
  0x22   : > { %272 = vmatpush.bf16.msra.mxu0 %v523_v4  ;;  %543 = vmatpush.bf16.msra.mxu1 %v523_v4 }
  0x26   : > { %273 = vmatpush.bf16.msra.mxu0 %v522_v5  ;;  %544 = vmatpush.bf16.msra.mxu1 %v522_v5 }
  0x2a   : > { %274 = vmatpush.bf16.msra.mxu0 %v521_v6  ;;  %545 = vmatpush.bf16.msra.mxu1 %v521_v6 }
  0x2e   : > { %275 = vmatpush.bf16.msra.mxu0 %v520_v7  ;;  %546 = vmatpush.bf16.msra.mxu1 %v520_v7 }
  0x31   : > { %276 = vmatmul.bf16.vlgmr.msra.gmra.mxu0 %v518_v8  ;;  %281 = vmatmul.bf16.vlgmr.msra.gmra.mxu1 %v519_v9 }
  0xae   : > { %v277_v11 = vpop.f32.mrf.mxu0  ;;  %v282_v12 = vpop.f32.mrf.mxu1 }
  0xaf   : > { %288 = vst [vmem:[#allocation2 + $0x10] sm:$0xff] %v277_v11  ;;  %v302_v15 = vmul.f32 %v277_v11, %v277_v11  ;;  %v304_v18 = vmul.f32 %v282_v12, %v282_v12 }
  0xb0   : > { %290 = vst [vmem:[#allocation2 + $0x18] sm:$0xff] %v282_v12 }
  0xb6   : > { %v279_v13 = vpop.f32.mrf.mxu0  ;;  %v284_v14 = vpop.f32.mrf.mxu1 }
  0xb7   : > { %289 = vst [vmem:[#allocation2] sm:$0xff] %v279_v13  ;;  %v293_v16 = vadd.f32 %v279_v13, %v277_v11  ;;  %v303_v17 = vmul.f32 %v279_v13, %v279_v13  ;;  %v305_v22 = vmul.f32 %v284_v14, %v284_v14 }
  0xb8   : > { %291 = vst [vmem:[#allocation2 + $0x8] sm:$0xff] %v284_v14 }
  0xb9   : > { %v306_v19 = vadd.f32 %v303_v17, %v302_v15  ;;  %v294_v20 = vadd.f32 %v293_v16, %v282_v12 }
  0xbb   : > { %v295_v21 = vadd.f32 %v294_v20, %v284_v14  ;;  %v307_v23 = vadd.f32 %v306_v19, %v304_v18 }
  0xbd   : > { %v296_v24 = vrot.slane %v295_v21, 4  ;;  %v308_v25 = vadd.f32 %v307_v23, %v305_v22 }
  0xbf   : > { %v297_v26 = vadd.f32 %v296_v24, %v295_v21  ;;  %v309_v27 = vrot.slane %v308_v25, 4 }
  0xc1   : > { %v298_v28 = vrot.slane %v297_v26, 2  ;;  %v310_v29 = vadd.f32 %v309_v27, %v308_v25 }
  0xc3   : > { %v299_v30 = vadd.f32 %v298_v28, %v297_v26  ;;  %v311_v31 = vrot.slane %v310_v29, 2 }
  0xc5   : > { %v300_v32 = vrot.slane %v299_v30, 1  ;;  %v312_v33 = vadd.f32 %v311_v31, %v310_v29 }
  0xc7   : > { %v313_v34 = vrot.slane %v312_v33, 1  ;;  %v301_v36 = vadd.f32 %v300_v32, %v299_v30 }
  0xc9   : > { %v314_v37 = vadd.f32 %v313_v34, %v312_v33 }
  0xcb   : > { %v316_v38 = vsel %vm315_vm0, %v301_v36, %v314_v37 }
  0xcc   : > { %v317_v39 = vadd.f32 %v316_v38, %v292_v35 }
  0xce   : > { %318 = vst [vmem:[#allocation3] sm:$0x3] %v317_v39 }
  0xcf PF: > { %p513_p5 = scmp.ne.s32.totalorder %s588_s9, 1 }
  0xd1   : > { %322 = sbr.rel (%p513_p5) target bundleno = 253 (0xfd), region = 40 }
  0xd6   : > { %v328_v40 = vld [vmem:[#allocation3] sm:$0x1]  ;;  %v330_v42 = vld [vmem:[#allocation3 + $0x1] sm:$0x1]  ;;  %v324_v52 = vld [vmem:[#allocation2 + $0x10] sm:$0xff] }
  0xd7   : > { %v329_v41 = vmul.f32 0.03125, %v328_v40  ;;  %v331_v43 = vmul.f32 0.03125, %v330_v42  ;;  %v325_v54 = vld [vmem:[#allocation2] sm:$0xff]  ;;  %v326_v56 = vld [vmem:[#allocation2 + $0x18] sm:$0xff]  ;;  %v327_v57 = vld [vmem:[#allocation2 + $0x8] sm:$0xff] }
  0xd9   : > { %v332_v44 = vmul.f32 %v329_v41, %v329_v41  ;;  %v335_v53 = vperm.slane %v329_v41, 0 }
  0xdb   : > { %v333_v45 = vsub.f32 %v331_v43, %v332_v44  ;;  %v336_v59 = vsub.f32 %v324_v52, %v335_v53  ;;  %v337_v60 = vsub.f32 %v325_v54, %v335_v53  ;;  %v338_v61 = vsub.f32 %v326_v56, %v335_v53 }
  0xdc   : > { %v339_v62 = vsub.f32 %v327_v57, %v335_v53 }
  0xdd   : > { %v334_v46 = vmax.f32 %v333_v45, 0.0 }
  0xdf   : > { %v340_v47 = vadd.f32 1e-05, %v334_v46 }
  0xe1   : > { %572 = vrsqrt.f32 %v340_v47  ;;  %vm347_vm1 = vweird.f32 %v340_v47 }
  0xe7   : > { %v573_v48 = vpop.eup %572 }
  0xe8   : > { %v342_v49 = vmul.f32 %v573_v48, %v340_v47  ;;  %vm348_vm2 = vweird.f32 %v573_v48 }
  0xe9   : > { %vm349_vm3 = vmor %vm347_vm1, %vm348_vm2 }
  0xea   : > { %v343_v50 = vmul.f32 %v573_v48, %v342_v49 }
  0xec   : > { %v344_v51 = vmul.f32 0.5, %v343_v50 }
  0xee   : > { %v345_v55 = vsub.f32 1.5, %v344_v51 }
  0xf0   : > { %v346_v58 = vmul.f32 %v573_v48, %v345_v55 }
  0xf2   : > { %v350_v63 = vsel %vm349_vm3, %v573_v48, %v346_v58 }
  0xf3   : > { %v351_v0 = vperm.slane %v350_v63, 0 }
  0xf5   : > { %v352_v1 = vmul.f32 %v351_v0, %v336_v59  ;;  %v353_v2 = vmul.f32 %v351_v0, %v337_v60  ;;  %v354_v3 = vmul.f32 %v351_v0, %v338_v61  ;;  %v355_v4 = vmul.f32 %v351_v0, %v339_v62 }
  0xf7   : > { %v356_v5 = vmax.f32 %v352_v1, 0.0  ;;  %v357_v6 = vmax.f32 %v353_v2, 0.0  ;;  %v358_v7 = vmax.f32 %v354_v3, 0.0  ;;  %v359_v8 = vmax.f32 %v355_v4, 0.0 }
  0xf9   : > { %v531_v9 = vpack.c.bf16 %v357_v6, %v356_v5  ;;  %v536_v10 = vpack.c.bf16 %v359_v8, %v358_v7 }
  0xfb   : > { %532 = vst [vmem:[%s683_s2] sm:$0xff] %v531_v9  }
  0xfc   : > { %538 = vst [vmem:[%s683_s2 + $0x8] sm:$0xff] %v536_v10  }
  0xfd PF: > { %s12_s11 = sadd.s32 1, %s596_s11   ;;  %s684_s9 = smov %s592_s10 }
  0xfe   : > { %p9_p6 = scmp.ge.s32.totalorder %s12_s11, 4   ;;  %s685_s10 = smov %s687_s12 }
 0x100   :  { %11 = sbr.rel (!%p9_p6) target bundleno = 2 (0x2), region = 72 }

// kernel: _lambda_.27
= control target key start
LH: loop header
LB: loop body
LE: loop exit
PB: predicated region body
PF: predicated region fallthrough
CT: control target
= control target key end

     0   :  { %s675_s9 = smov 0   ;;  %s677_s10 = smov 0   ;;  %s765_s0 = inlined_call_operand.vmem [shape: bf16[32,144], index: 0, kind: input, shape index: {}]   ;;  %s766_s1 = inlined_call_operand.vmem [shape: bf16[144,128], index: 1, kind: input, shape index: {}]   ;;  %s767_s2 = inlined_call_operand.vmem [shape: bf16[32,128], index: 2, kind: output, shape index: {}]  }
   0x1   :  { %s679_s11 = smov 0  }
   0x2 LB: > { %s24_s12 = sadd.s32 1, %s653_s10  ;;  %p515_p0 = scmp.ge.s32.totalorder %s657_s11, 1  ;;  %s657_s11 = sphi %s679_s11, %s12_s11   ;;  %s653_s10 = sphi %s677_s10, %s769_s10   ;;  %s649_s9 = sphi %s675_s9, %s768_s9  }
   0x3   : > { %p26_p1 = scmp.ge.s32.totalorder %s24_s12, 2  ;;  %p136_p2 = scmp.lt.s32.totalorder %s657_s11, 3 }
   0x5   : > { %s771_s12 = smov (%p26_p1, %s24_s12), 0  ;;  %p137_p3 = pnand %p515_p0, %p136_p2 }
   0x6   : > { %p516_p4 = scmp.ne.s32.totalorder (!%p137_p3), %s649_s9, 0 }
   0x7   : > { %140 = sbr.rel (%p137_p3) target bundleno = 257 (0x101), region = 28 }
   0xc   : > { %186 = sbr.rel (%p516_p4) target bundleno = 211 (0xd3), region = 32 }
  0x11   : > { %v587_v0 = vld [vmem:[%s766_s1 + $0x38] sm:$0xff]  ;;  %v588_v1 = vld [vmem:[%s766_s1 + $0x40] sm:$0xff]  ;;  %v586_v3 = vld [vmem:[%s766_s1 + $0x30] sm:$0xff]  ;;  %vm286_vm0 = vcmask 130048   ;;  %v659_v21 = vmov 0.0   ;;  %vm359_vm1 = vcmask 1040384  }
  0x12   : > { %v576_v2 = vld [vmem:[%s765_s0 + $0x4] sm:$0xf]  ;;  %293 = vmatpush.bf16.msra.mxu0 %v587_v0  ;;  %600 = vmatpush.bf16.msra.mxu2 %v587_v0  ;;  %v521_v4 = vld [vmem:[%s765_s0 + $0x8] sm:$0xf0]  ;;  %v583_v8 = vld [vmem:[%s766_s1 + $0x18] sm:$0xff] }
  0x13   : > { %319 = vmatpush.bf16.msra.mxu1 %v588_v1  ;;  %v524_v5 = vor.u32 %v576_v2, %v521_v4  ;;  %v585_v6 = vld [vmem:[%s766_s1 + $0x28] sm:$0xff]  ;;  %v584_v7 = vld [vmem:[%s766_s1 + $0x20] sm:$0xff]  ;;  %v578_v9 = vld [vmem:[%s765_s0 + $0x14] sm:$0xf]  ;;  %191 = vst [vmem:[#allocation3] sm:$0x3] %v659_v21 }
  0x14   : > { %v529_v10 = vld [vmem:[%s765_s0 + $0x18] sm:$0xf0]  ;;  %v582_v11 = vld [vmem:[%s766_s1 + $0x10] sm:$0xff]  ;;  %v581_v13 = vld [vmem:[%s766_s1 + $0x8] sm:$0xff] }
  0x15   : > { %v532_v12 = vor.u32 %v578_v9, %v529_v10  ;;  %v580_v14 = vld [vmem:[%s766_s1] sm:$0xff]  ;;  %v577_v16 = vld [vmem:[%s765_s0 + $0x4] sm:$0xf0]  ;;  %v527_v17 = vld [vmem:[%s765_s0 + $0x10] sm:$0xf] }
  0x16   : > { %294 = vmatpush.bf16.msra.mxu0 %v586_v3  ;;  %601 = vmatpush.bf16.msra.mxu2 %v586_v3  ;;  %v519_v15 = vld [vmem:[%s765_s0] sm:$0xf]  ;;  %v579_v18 = vld [vmem:[%s765_s0 + $0x14] sm:$0xf0] }
  0x17   : > { %569 = vmatmul.msk.bf16.vlgmr.msra.gmra.mxu1 %vm286_vm0, %v524_v5  ;;  %v520_v19 = vor.u32 %v577_v16, %v519_v15  ;;  %v528_v20 = vor.u32 %v579_v18, %v527_v17 }
  0x1a   : > { %295 = vmatpush.bf16.msra.mxu0 %v585_v6  ;;  %602 = vmatpush.bf16.msra.mxu2 %v585_v6  ;;  %v336_v54 = vld [vmem:[#allocation3] sm:$0x3] }
  0x1e   : > { %296 = vmatpush.bf16.msra.mxu0 %v584_v7  ;;  %603 = vmatpush.bf16.msra.mxu2 %v584_v7 }
  0x22   : > { %297 = vmatpush.bf16.msra.mxu0 %v583_v8  ;;  %604 = vmatpush.bf16.msra.mxu2 %v583_v8 }
  0x26   : > { %298 = vmatpush.bf16.msra.mxu0 %v582_v11  ;;  %605 = vmatpush.bf16.msra.mxu2 %v582_v11 }
  0x27   : > { %570 = vmatmul.msk.bf16.gmra.mxu1 %vm286_vm0, %v532_v12 }
  0x2a   : > { %299 = vmatpush.bf16.msra.mxu0 %v581_v13  ;;  %606 = vmatpush.bf16.msra.mxu2 %v581_v13 }
  0x2e   : > { %300 = vmatpush.bf16.msra.mxu0 %v580_v14  ;;  %607 = vmatpush.bf16.msra.mxu2 %v580_v14 }
  0x31   : > { %301 = vmatmul.bf16.vlgmr.msra.gmra.mxu0 %v520_v19  ;;  %306 = vmatmul.bf16.vlgmr.msra.gmra.mxu2 %v528_v20 }
  0x94   : > { %v321_v22 = vpop.f32.mrf.mxu1 }
  0x9c   : > { %v323_v23 = vpop.f32.mrf.mxu1 }
  0xa4   : > { %v326_v26 = vpop.f32.mrf.mxu1 }
  0xac   : > { %v328_v35 = vpop.f32.mrf.mxu1 }
  0xae   : > { %v302_v24 = vpop.f32.mrf.mxu0 }
  0xaf   : > { %v322_v25 = vadd.f32 %v321_v22, %v302_v24 }
  0xb1   : > { %332 = vst [vmem:[#allocation2 + $0x10] sm:$0xff] %v322_v25  ;;  %v346_v31 = vmul.f32 %v322_v25, %v322_v25 }
  0xb4   : > { %v307_v27 = vpop.f32.mrf.mxu2 }
  0xb5   : > { %v327_v28 = vadd.f32 %v326_v26, %v307_v27 }
  0xb6   : > { %v304_v29 = vpop.f32.mrf.mxu0 }
  0xb7   : > { %334 = vst [vmem:[#allocation2 + $0x18] sm:$0xff] %v327_v28  ;;  %v324_v30 = vadd.f32 %v323_v23, %v304_v29  ;;  %v348_v37 = vmul.f32 %v327_v28, %v327_v28 }
  0xb9   : > { %333 = vst [vmem:[#allocation2] sm:$0xff] %v324_v30  ;;  %v337_v32 = vadd.f32 %v324_v30, %v322_v25  ;;  %v347_v33 = vmul.f32 %v324_v30, %v324_v30 }
  0xbb   : > { %v350_v34 = vadd.f32 %v347_v33, %v346_v31  ;;  %v338_v39 = vadd.f32 %v337_v32, %v327_v28 }
  0xbc   : > { %v309_v36 = vpop.f32.mrf.mxu2 }
  0xbd   : > { %v329_v38 = vadd.f32 %v328_v35, %v309_v36  ;;  %v351_v42 = vadd.f32 %v350_v34, %v348_v37 }
  0xbf   : > { %335 = vst [vmem:[#allocation2 + $0x8] sm:$0xff] %v329_v38  ;;  %v339_v40 = vadd.f32 %v338_v39, %v329_v38  ;;  %v349_v41 = vmul.f32 %v329_v38, %v329_v38 }
  0xc1   : > { %v340_v43 = vrot.slane %v339_v40, 4  ;;  %v352_v44 = vadd.f32 %v351_v42, %v349_v41 }
  0xc3   : > { %v341_v45 = vadd.f32 %v340_v43, %v339_v40  ;;  %v353_v46 = vrot.slane %v352_v44, 4 }
  0xc5   : > { %v342_v47 = vrot.slane %v341_v45, 2  ;;  %v354_v48 = vadd.f32 %v353_v46, %v352_v44 }
  0xc7   : > { %v343_v49 = vadd.f32 %v342_v47, %v341_v45  ;;  %v355_v50 = vrot.slane %v354_v48, 2 }
  0xc9   : > { %v344_v51 = vrot.slane %v343_v49, 1  ;;  %v356_v52 = vadd.f32 %v355_v50, %v354_v48 }
  0xcb   : > { %v357_v53 = vrot.slane %v356_v52, 1  ;;  %v345_v55 = vadd.f32 %v344_v51, %v343_v49 }
  0xcd   : > { %v358_v56 = vadd.f32 %v357_v53, %v356_v52 }
  0xcf   : > { %v360_v57 = vsel %vm359_vm1, %v345_v55, %v358_v56 }
  0xd0   : > { %v361_v58 = vadd.f32 %v360_v57, %v336_v54 }
  0xd2   : > { %362 = vst [vmem:[#allocation3] sm:$0x3] %v361_v58 }
  0xd3 PF: > { %p571_p5 = scmp.ne.s32.totalorder %s649_s9, 1 }
  0xd5   : > { %366 = sbr.rel (%p571_p5) target bundleno = 257 (0x101), region = 40 }
  0xda   : > { %v372_v59 = vld [vmem:[#allocation3] sm:$0x1]  ;;  %v374_v61 = vld [vmem:[#allocation3 + $0x1] sm:$0x1]  ;;  %v368_v7 = vld [vmem:[#allocation2 + $0x10] sm:$0xff] }
  0xdb   : > { %v373_v60 = vmul.f32 0.03125, %v372_v59  ;;  %v375_v62 = vmul.f32 0.03125, %v374_v61  ;;  %v369_v9 = vld [vmem:[#allocation2] sm:$0xff]  ;;  %v370_v11 = vld [vmem:[#allocation2 + $0x18] sm:$0xff]  ;;  %v371_v12 = vld [vmem:[#allocation2 + $0x8] sm:$0xff] }
  0xdd   : > { %v376_v63 = vmul.f32 %v373_v60, %v373_v60  ;;  %v379_v8 = vperm.slane %v373_v60, 0 }
  0xdf   : > { %v377_v0 = vsub.f32 %v375_v62, %v376_v63  ;;  %v380_v14 = vsub.f32 %v368_v7, %v379_v8  ;;  %v381_v15 = vsub.f32 %v369_v9, %v379_v8  ;;  %v382_v16 = vsub.f32 %v370_v11, %v379_v8 }
  0xe0   : > { %v383_v17 = vsub.f32 %v371_v12, %v379_v8 }
  0xe1   : > { %v378_v1 = vmax.f32 %v377_v0, 0.0 }
  0xe3   : > { %v384_v2 = vadd.f32 1e-05, %v378_v1 }
  0xe5   : > { %633 = vrsqrt.f32 %v384_v2  ;;  %vm391_vm2 = vweird.f32 %v384_v2 }
  0xeb   : > { %v634_v3 = vpop.eup %633 }
  0xec   : > { %v386_v4 = vmul.f32 %v634_v3, %v384_v2  ;;  %vm392_vm3 = vweird.f32 %v634_v3 }
  0xed   : > { %vm393_vm4 = vmor %vm391_vm2, %vm392_vm3 }
  0xee   : > { %v387_v5 = vmul.f32 %v634_v3, %v386_v4 }
  0xf0   : > { %v388_v6 = vmul.f32 0.5, %v387_v5 }
  0xf2   : > { %v389_v10 = vsub.f32 1.5, %v388_v6 }
  0xf4   : > { %v390_v13 = vmul.f32 %v634_v3, %v389_v10 }
  0xf6   : > { %v394_v18 = vsel %vm393_vm4, %v634_v3, %v390_v13 }
  0xf7   : > { %v395_v19 = vperm.slane %v394_v18, 0 }
  0xf9   : > { %v396_v20 = vmul.f32 %v395_v19, %v380_v14  ;;  %v397_v21 = vmul.f32 %v395_v19, %v381_v15  ;;  %v398_v22 = vmul.f32 %v395_v19, %v382_v16  ;;  %v399_v23 = vmul.f32 %v395_v19, %v383_v17 }
  0xfb   : > { %v400_v24 = vmax.f32 %v396_v20, 0.0  ;;  %v401_v25 = vmax.f32 %v397_v21, 0.0  ;;  %v402_v26 = vmax.f32 %v398_v22, 0.0  ;;  %v403_v27 = vmax.f32 %v399_v23, 0.0 }
  0xfd   : > { %v592_v28 = vpack.c.bf16 %v401_v25, %v400_v24  ;;  %v597_v29 = vpack.c.bf16 %v403_v27, %v402_v26 }
  0xff   : > { %593 = vst [vmem:[%s767_s2] sm:$0xff] %v592_v28  }
 0x100   : > { %599 = vst [vmem:[%s767_s2 + $0x8] sm:$0xff] %v597_v29  }
 0x101 PF: > { %s12_s11 = sadd.s32 1, %s657_s11   ;;  %s768_s9 = smov %s653_s10 }
 0x102   : > { %p9_p6 = scmp.ge.s32.totalorder %s12_s11, 4   ;;  %s769_s10 = smov %s771_s12 }
 0x104   :  { %11 = sbr.rel (!%p9_p6) target bundleno = 2 (0x2), region = 72 }

// kernel: _lambda_.31
= control target key start
LH: loop header
LB: loop body
LE: loop exit
PB: predicated region body
PF: predicated region fallthrough
CT: control target
= control target key end

     0   :  { %s713_s12 = smov 0   ;;  %s715_s13 = smov 0   ;;  %s786_s0 = inlined_call_operand.vmem [shape: bf16[32,128], index: 0, kind: input, shape index: {}]   ;;  %s787_s1 = inlined_call_operand.vmem [shape: bf16[128,128], index: 1, kind: input, shape index: {}]   ;;  %s788_s2 = inlined_call_operand.vmem [shape: bf16[32,128], index: 2, kind: input, shape index: {}]   ;;  %s789_s3 = inlined_call_operand.vmem [shape: bf16[32,128], index: 3, kind: output, shape index: {}]  }
   0x1   :  { %s717_s14 = smov 0  }
   0x2 LB: > { %s25_s15 = sadd.s32 1, %s686_s13  ;;  %p556_p0 = scmp.ge.s32.totalorder %s690_s14, 1  ;;  %s690_s14 = sphi %s717_s14, %s13_s14   ;;  %s686_s13 = sphi %s715_s13, %s791_s13   ;;  %s682_s12 = sphi %s713_s12, %s790_s12  }
   0x3   : > { %p27_p1 = scmp.ge.s32.totalorder %s25_s15, 2  ;;  %p175_p2 = scmp.lt.s32.totalorder %s690_s14, 3 }
   0x5   : > { %s793_s15 = smov (%p27_p1, %s25_s15), 0  ;;  %p176_p3 = pnand %p556_p0, %p175_p2 }
   0x6   : > { %p557_p4 = scmp.ne.s32.totalorder (!%p176_p3), %s682_s12, 0 }
   0x7   : > { %179 = sbr.rel (%p176_p3) target bundleno = 257 (0x101), region = 32 }
   0xc   : > { %238 = sbr.rel (%p557_p4) target bundleno = 207 (0xcf), region = 36 }
  0x11   : > { %v612_v0 = vld [vmem:[%s787_s1 + $0x38] sm:$0xff]  ;;  %v611_v1 = vld [vmem:[%s787_s1 + $0x30] sm:$0xff]  ;;  %v610_v2 = vld [vmem:[%s787_s1 + $0x28] sm:$0xff]  ;;  %v692_v10 = vmov 0.0   ;;  %vm371_vm0 = vcmask 1040384  }
  0x12   : > { %324 = vmatpush.bf16.msra.mxu0 %v612_v0  ;;  %633 = vmatpush.bf16.msra.mxu1 %v612_v0  ;;  %v609_v3 = vld [vmem:[%s787_s1 + $0x20] sm:$0xff]  ;;  %v608_v4 = vld [vmem:[%s787_s1 + $0x18] sm:$0xff]  ;;  %v607_v5 = vld [vmem:[%s787_s1 + $0x10] sm:$0xff]  ;;  %243 = vst [vmem:[#allocation3] sm:$0x3] %v692_v10 }
  0x13   : > { %v606_v6 = vld [vmem:[%s787_s1 + $0x8] sm:$0xff]  ;;  %v605_v7 = vld [vmem:[%s787_s1] sm:$0xff] }
  0x14   : > { %v603_v8 = vld [vmem:[%s786_s0] sm:$0xff]  ;;  %v604_v9 = vld [vmem:[%s786_s0 + $0x8] sm:$0xff] }
  0x16   : > { %325 = vmatpush.bf16.msra.mxu0 %v611_v1  ;;  %634 = vmatpush.bf16.msra.mxu1 %v611_v1 }
  0x19   : > { %v348_v35 = vld [vmem:[#allocation3] sm:$0x3] }
  0x1a   : > { %326 = vmatpush.bf16.msra.mxu0 %v610_v2  ;;  %635 = vmatpush.bf16.msra.mxu1 %v610_v2 }
  0x1e   : > { %327 = vmatpush.bf16.msra.mxu0 %v609_v3  ;;  %636 = vmatpush.bf16.msra.mxu1 %v609_v3 }
  0x22   : > { %328 = vmatpush.bf16.msra.mxu0 %v608_v4  ;;  %637 = vmatpush.bf16.msra.mxu1 %v608_v4 }
  0x26   : > { %329 = vmatpush.bf16.msra.mxu0 %v607_v5  ;;  %638 = vmatpush.bf16.msra.mxu1 %v607_v5 }
  0x2a   : > { %330 = vmatpush.bf16.msra.mxu0 %v606_v6  ;;  %639 = vmatpush.bf16.msra.mxu1 %v606_v6 }
  0x2e   : > { %331 = vmatpush.bf16.msra.mxu0 %v605_v7  ;;  %640 = vmatpush.bf16.msra.mxu1 %v605_v7 }
  0x31   : > { %332 = vmatmul.bf16.vlgmr.msra.gmra.mxu0 %v603_v8  ;;  %337 = vmatmul.bf16.vlgmr.msra.gmra.mxu1 %v604_v9 }
  0xae   : > { %v333_v11 = vpop.f32.mrf.mxu0  ;;  %v338_v12 = vpop.f32.mrf.mxu1 }
  0xaf   : > { %344 = vst [vmem:[#allocation2 + $0x10] sm:$0xff] %v333_v11  ;;  %v358_v15 = vmul.f32 %v333_v11, %v333_v11  ;;  %v360_v18 = vmul.f32 %v338_v12, %v338_v12 }
  0xb0   : > { %346 = vst [vmem:[#allocation2 + $0x18] sm:$0xff] %v338_v12 }
  0xb6   : > { %v335_v13 = vpop.f32.mrf.mxu0  ;;  %v340_v14 = vpop.f32.mrf.mxu1 }
  0xb7   : > { %345 = vst [vmem:[#allocation2] sm:$0xff] %v335_v13  ;;  %v349_v16 = vadd.f32 %v335_v13, %v333_v11  ;;  %v359_v17 = vmul.f32 %v335_v13, %v335_v13  ;;  %v361_v22 = vmul.f32 %v340_v14, %v340_v14 }
  0xb8   : > { %347 = vst [vmem:[#allocation2 + $0x8] sm:$0xff] %v340_v14 }
  0xb9   : > { %v362_v19 = vadd.f32 %v359_v17, %v358_v15  ;;  %v350_v20 = vadd.f32 %v349_v16, %v338_v12 }
  0xbb   : > { %v351_v21 = vadd.f32 %v350_v20, %v340_v14  ;;  %v363_v23 = vadd.f32 %v362_v19, %v360_v18 }
  0xbd   : > { %v352_v24 = vrot.slane %v351_v21, 4  ;;  %v364_v25 = vadd.f32 %v363_v23, %v361_v22 }
  0xbf   : > { %v353_v26 = vadd.f32 %v352_v24, %v351_v21  ;;  %v365_v27 = vrot.slane %v364_v25, 4 }
  0xc1   : > { %v354_v28 = vrot.slane %v353_v26, 2  ;;  %v366_v29 = vadd.f32 %v365_v27, %v364_v25 }
  0xc3   : > { %v355_v30 = vadd.f32 %v354_v28, %v353_v26  ;;  %v367_v31 = vrot.slane %v366_v29, 2 }
  0xc5   : > { %v356_v32 = vrot.slane %v355_v30, 1  ;;  %v368_v33 = vadd.f32 %v367_v31, %v366_v29 }
  0xc7   : > { %v369_v34 = vrot.slane %v368_v33, 1  ;;  %v357_v36 = vadd.f32 %v356_v32, %v355_v30 }
  0xc9   : > { %v370_v37 = vadd.f32 %v369_v34, %v368_v33 }
  0xcb   : > { %v372_v38 = vsel %vm371_vm0, %v357_v36, %v370_v37 }
  0xcc   : > { %v373_v39 = vadd.f32 %v372_v38, %v348_v35 }
  0xce   : > { %374 = vst [vmem:[#allocation3] sm:$0x3] %v373_v39 }
  0xcf PF: > { %p598_p5 = scmp.ne.s32.totalorder %s682_s12, 1 }
  0xd1   : > { %378 = sbr.rel (%p598_p5) target bundleno = 257 (0x101), region = 44 }
  0xd6   : > { %v384_v40 = vld [vmem:[#allocation3] sm:$0x1]  ;;  %v386_v42 = vld [vmem:[#allocation3 + $0x1] sm:$0x1]  ;;  %v380_v52 = vld [vmem:[#allocation2 + $0x10] sm:$0xff] }
  0xd7   : > { %v385_v41 = vmul.f32 0.03125, %v384_v40  ;;  %v387_v43 = vmul.f32 0.03125, %v386_v42  ;;  %v381_v54 = vld [vmem:[#allocation2] sm:$0xff]  ;;  %v382_v56 = vld [vmem:[#allocation2 + $0x18] sm:$0xff]  ;;  %v383_v57 = vld [vmem:[#allocation2 + $0x8] sm:$0xff] }
  0xd8   : > { %v614_v61 = vld [vmem:[%s788_s2] sm:$0xff]   ;;  %v631_v0 = vld [vmem:[%s788_s2 + $0x8] sm:$0xff]  }
  0xd9   : > { %v388_v44 = vmul.f32 %v385_v41, %v385_v41  ;;  %v391_v53 = vperm.slane %v385_v41, 0  ;;  %v615_v3 = vunpack.c.l.bf16 %v614_v61  ;;  %v616_v4 = vunpack.c.h.bf16 %v614_v61 }
  0xda   : > { %v619_v5 = vunpack.c.l.bf16 %v631_v0  ;;  %v620_v6 = vunpack.c.h.bf16 %v631_v0 }
  0xdb   : > { %v389_v45 = vsub.f32 %v387_v43, %v388_v44  ;;  %v392_v59 = vsub.f32 %v380_v52, %v391_v53  ;;  %v393_v60 = vsub.f32 %v381_v54, %v391_v53  ;;  %v394_v62 = vsub.f32 %v382_v56, %v391_v53 }
  0xdc   : > { %v395_v63 = vsub.f32 %v383_v57, %v391_v53 }
  0xdd   : > { %v390_v46 = vmax.f32 %v389_v45, 0.0 }
  0xdf   : > { %v396_v47 = vadd.f32 1e-05, %v390_v46 }
  0xe1   : > { %666 = vrsqrt.f32 %v396_v47  ;;  %vm403_vm1 = vweird.f32 %v396_v47 }
  0xe7   : > { %v667_v48 = vpop.eup %666 }
  0xe8   : > { %v398_v49 = vmul.f32 %v667_v48, %v396_v47  ;;  %vm404_vm2 = vweird.f32 %v667_v48 }
  0xe9   : > { %vm405_vm3 = vmor %vm403_vm1, %vm404_vm2 }
  0xea   : > { %v399_v50 = vmul.f32 %v667_v48, %v398_v49 }
  0xec   : > { %v400_v51 = vmul.f32 0.5, %v399_v50 }
  0xee   : > { %v401_v55 = vsub.f32 1.5, %v400_v51 }
  0xf0   : > { %v402_v58 = vmul.f32 %v667_v48, %v401_v55 }
  0xf2   : > { %v406_v1 = vsel %vm405_vm3, %v667_v48, %v402_v58 }
  0xf3   : > { %v407_v2 = vperm.slane %v406_v1, 0 }
  0xf5   : > { %v408_v7 = vmul.f32 %v407_v2, %v392_v59  ;;  %v409_v8 = vmul.f32 %v407_v2, %v393_v60  ;;  %v410_v9 = vmul.f32 %v407_v2, %v394_v62  ;;  %v411_v10 = vmul.f32 %v407_v2, %v395_v63 }
  0xf7   : > { %v412_v11 = vmax.f32 %v408_v7, 0.0  ;;  %v413_v12 = vmax.f32 %v409_v8, 0.0  ;;  %v414_v13 = vmax.f32 %v410_v9, 0.0  ;;  %v415_v14 = vmax.f32 %v411_v10, 0.0 }
  0xf9   : > { %v424_v15 = vadd.f32 %v615_v3, %v412_v11  ;;  %v425_v16 = vadd.f32 %v616_v4, %v413_v12  ;;  %v426_v17 = vadd.f32 %v619_v5, %v414_v13  ;;  %v427_v18 = vadd.f32 %v620_v6, %v415_v14 }
  0xfb   : > { %v428_v19 = vmax.f32 %v424_v15, 0.0  ;;  %v429_v20 = vmax.f32 %v425_v16, 0.0  ;;  %v430_v21 = vmax.f32 %v426_v17, 0.0  ;;  %v431_v22 = vmax.f32 %v427_v18, 0.0 }
  0xfd   : > { %v624_v23 = vpack.c.bf16 %v429_v20, %v428_v19  ;;  %v629_v24 = vpack.c.bf16 %v431_v22, %v430_v21 }
  0xff   : > { %625 = vst [vmem:[%s789_s3] sm:$0xff] %v624_v23  }
 0x100   : > { %632 = vst [vmem:[%s789_s3 + $0x8] sm:$0xff] %v629_v24  }
 0x101 PF: > { %s13_s14 = sadd.s32 1, %s690_s14   ;;  %s790_s12 = smov %s686_s13 }
 0x102   : > { %p10_p6 = scmp.ge.s32.totalorder %s13_s14, 4   ;;  %s791_s13 = smov %s793_s15 }
 0x104   :  { %12 = sbr.rel (!%p10_p6) target bundleno = 2 (0x2), region = 79 }

// kernel: _lambda_.34
= control target key start
LH: loop header
LB: loop body
LE: loop exit
PB: predicated region body
PF: predicated region fallthrough
CT: control target
= control target key end

     0   :  { %s783_s15 = smov 0   ;;  %s785_s16 = smov 0   ;;  %s871_s0 = inlined_call_operand.vmem [shape: bf16[8,128], index: 0, kind: input, shape index: {}]   ;;  %s872_s1 = inlined_call_operand.vmem [shape: bf16[128,128], index: 1, kind: input, shape index: {}]   ;;  %s873_s2 = inlined_call_operand.vmem [shape: bf16[8,128], index: 2, kind: input, shape index: {}]   ;;  %s874_s3 = inlined_call_operand.vmem [shape: bf16[128,128], index: 3, kind: input, shape index: {}]   ;;  %s875_s4 = inlined_call_operand.vmem [shape: bf16[8,128], index: 4, kind: output, shape index: {}]  }
   0x1   :  { %s787_s17 = smov 0  }
   0x2 LB: > { %s26_s18 = sadd.s32 1, %s751_s16  ;;  %p617_p0 = scmp.ge.s32.totalorder %s755_s17, 1  ;;  %s755_s17 = sphi %s787_s17, %s14_s17   ;;  %s751_s16 = sphi %s785_s16, %s877_s16   ;;  %s747_s15 = sphi %s783_s15, %s876_s15  }
   0x3   : > { %p28_p1 = scmp.ge.s32.totalorder %s26_s18, 2  ;;  %p200_p2 = scmp.lt.s32.totalorder %s755_s17, 3 }
   0x5   : > { %s879_s18 = smov (%p28_p1, %s26_s18), 0  ;;  %p201_p3 = pnand %p617_p0, %p200_p2 }
   0x6   : > { %p618_p4 = scmp.ne.s32.totalorder (!%p201_p3), %s747_s15, 0 }
   0x7   : > { %204 = sbr.rel (%p201_p3) target bundleno = 243 (0xf3), region = 36 }
   0xc   : > { %259 = sbr.rel (%p618_p4) target bundleno = 194 (0xc2), region = 40 }
  0x11   : > { %v695_v0 = vld [vmem:[%s872_s1 + $0x38] sm:$0xff]  ;;  %v694_v2 = vld [vmem:[%s872_s1 + $0x30] sm:$0xff]  ;;  %v757_v4 = vmov 0.0   ;;  %v693_v5 = vld [vmem:[%s872_s1 + $0x28] sm:$0xff]  ;;  %vm360_vm0 = vcmask 1040384  }
  0x12   : > { %v703_v1 = vld [vmem:[%s874_s3 + $0x38] sm:$0xff]  ;;  %331 = vmatpush.bf16.msra.mxu0 %v695_v0  ;;  %v702_v3 = vld [vmem:[%s874_s3 + $0x30] sm:$0xff]  ;;  %264 = vst [vmem:[#allocation3] sm:$0x3] %v757_v4  ;;  %v701_v6 = vld [vmem:[%s874_s3 + $0x28] sm:$0xff] }
  0x13   : > { %429 = vmatpush.bf16.msra.mxu1 %v703_v1  ;;  %265 = vst [vmem:[#allocation5] sm:$0x3] %v757_v4  ;;  %v692_v7 = vld [vmem:[%s872_s1 + $0x20] sm:$0xff]  ;;  %v691_v9 = vld [vmem:[%s872_s1 + $0x18] sm:$0xff]  ;;  %v690_v11 = vld [vmem:[%s872_s1 + $0x10] sm:$0xff] }
  0x14   : > { %v700_v8 = vld [vmem:[%s874_s3 + $0x20] sm:$0xff]  ;;  %v699_v10 = vld [vmem:[%s874_s3 + $0x18] sm:$0xff]  ;;  %v698_v12 = vld [vmem:[%s874_s3 + $0x10] sm:$0xff] }
  0x15   : > { %v689_v13 = vld [vmem:[%s872_s1 + $0x8] sm:$0xff]  ;;  %v688_v15 = vld [vmem:[%s872_s1] sm:$0xff] }
  0x16   : > { %332 = vmatpush.bf16.msra.mxu0 %v694_v2  ;;  %v697_v14 = vld [vmem:[%s874_s3 + $0x8] sm:$0xff]  ;;  %v696_v16 = vld [vmem:[%s874_s3] sm:$0xff] }
  0x17   : > { %430 = vmatpush.bf16.msra.mxu1 %v702_v3  ;;  %v266_v17 = vld [vmem:[%s871_s0] sm:$0xf] }
  0x18   : > { %v364_v18 = vld [vmem:[%s873_s2] sm:$0xf] }
  0x19   : > { %v346_v45 = vld [vmem:[#allocation3] sm:$0x3] }
  0x1a   : > { %333 = vmatpush.bf16.msra.mxu0 %v693_v5  ;;  %v444_v48 = vld [vmem:[#allocation5] sm:$0x3] }
  0x1b   : > { %431 = vmatpush.bf16.msra.mxu1 %v701_v6 }
  0x1e   : > { %334 = vmatpush.bf16.msra.mxu0 %v692_v7 }
  0x1f   : > { %432 = vmatpush.bf16.msra.mxu1 %v700_v8 }
  0x22   : > { %335 = vmatpush.bf16.msra.mxu0 %v691_v9 }
  0x23   : > { %433 = vmatpush.bf16.msra.mxu1 %v699_v10 }
  0x26   : > { %336 = vmatpush.bf16.msra.mxu0 %v690_v11 }
  0x27   : > { %434 = vmatpush.bf16.msra.mxu1 %v698_v12 }
  0x2a   : > { %337 = vmatpush.bf16.msra.mxu0 %v689_v13 }
  0x2b   : > { %435 = vmatpush.bf16.msra.mxu1 %v697_v14 }
  0x2e   : > { %338 = vmatpush.bf16.msra.mxu0 %v688_v15 }
  0x2f   : > { %436 = vmatpush.bf16.msra.mxu1 %v696_v16 }
  0x31   : > { %339 = vmatmul.bf16.vlgmr.msra.gmra.mxu0 %v266_v17 }
  0x32   : > { %437 = vmatmul.bf16.vlgmr.msra.gmra.mxu1 %v364_v18 }
  0xae   : > { %v340_v19 = vpop.f32.mrf.mxu0 }
  0xaf   : > { %v438_v20 = vpop.f32.mrf.mxu1  ;;  %345 = vst [vmem:[#allocation2] sm:$0xff] %v340_v19  ;;  %v347_v21 = vrot.slane %v340_v19, 4  ;;  %v353_v22 = vmul.f32 %v340_v19, %v340_v19 }
  0xb0   : > { %v445_v23 = vrot.slane %v438_v20, 4  ;;  %v451_v24 = vmul.f32 %v438_v20, %v438_v20  ;;  %443 = vst [vmem:[#allocation4] sm:$0xff] %v438_v20 }
  0xb1   : > { %v348_v25 = vadd.f32 %v347_v21, %v340_v19  ;;  %v354_v26 = vrot.slane %v353_v22, 4 }
  0xb2   : > { %v446_v27 = vadd.f32 %v445_v23, %v438_v20  ;;  %v452_v28 = vrot.slane %v451_v24, 4 }
  0xb3   : > { %v349_v29 = vrot.slane %v348_v25, 2  ;;  %v355_v30 = vadd.f32 %v354_v26, %v353_v22 }
  0xb4   : > { %v447_v31 = vrot.slane %v446_v27, 2  ;;  %v453_v32 = vadd.f32 %v452_v28, %v451_v24 }
  0xb5   : > { %v350_v33 = vadd.f32 %v349_v29, %v348_v25  ;;  %v356_v34 = vrot.slane %v355_v30, 2 }
  0xb6   : > { %v448_v35 = vadd.f32 %v447_v31, %v446_v27  ;;  %v454_v36 = vrot.slane %v453_v32, 2  ;;  %v342_v37 = vpop.f32.mrf.mxu0 }
  0xb7   : > { %v440_v38 = vpop.f32.mrf.mxu1  ;;  %v351_v39 = vrot.slane %v350_v33, 1  ;;  %v357_v40 = vadd.f32 %v356_v34, %v355_v30 }
  0xb8   : > { %v449_v41 = vrot.slane %v448_v35, 1  ;;  %v455_v42 = vadd.f32 %v454_v36, %v453_v32 }
  0xb9   : > { %v358_v43 = vrot.slane %v357_v40, 1  ;;  %v352_v46 = vadd.f32 %v351_v39, %v350_v33 }
  0xba   : > { %v456_v44 = vrot.slane %v455_v42, 1  ;;  %v450_v49 = vadd.f32 %v449_v41, %v448_v35 }
  0xbb   : > { %v359_v47 = vadd.f32 %v358_v43, %v357_v40 }
  0xbc   : > { %v457_v50 = vadd.f32 %v456_v44, %v455_v42 }
  0xbd   : > { %v361_v51 = vsel %vm360_vm0, %v352_v46, %v359_v47 }
  0xbe   : > { %v458_v52 = vsel %vm360_vm0, %v450_v49, %v457_v50  ;;  %v362_v53 = vadd.f32 %v361_v51, %v346_v45 }
  0xbf   : > { %v459_v54 = vadd.f32 %v458_v52, %v444_v48 }
  0xc0   : > { %363 = vst [vmem:[#allocation3] sm:$0x3] %v362_v53 }
  0xc1   : > { %460 = vst [vmem:[#allocation5] sm:$0x3] %v459_v54 }
  0xc2 PF: > { %p683_p5 = scmp.ne.s32.totalorder %s747_s15, 1 }
  0xc4   : > { %464 = sbr.rel (%p683_p5) target bundleno = 243 (0xf3), region = 48 }
  0xc9   : > { %v467_v55 = vld [vmem:[#allocation3] sm:$0x1]  ;;  %v469_v56 = vld [vmem:[#allocation3 + $0x1] sm:$0x1]  ;;  %v492_v59 = vld [vmem:[#allocation5] sm:$0x1] }
  0xca   : > { %v468_v57 = vmul.f32 0.125, %v467_v55  ;;  %v470_v58 = vmul.f32 0.125, %v469_v56  ;;  %v493_v60 = vmul.f32 0.125, %v492_v59  ;;  %v494_v61 = vld [vmem:[#allocation5 + $0x1] sm:$0x1]  ;;  %v466_v16 = vld [vmem:[#allocation2] sm:$0xff] }
  0xcb   : > { %v495_v63 = vmul.f32 0.125, %v494_v61  ;;  %v491_v19 = vld [vmem:[#allocation4] sm:$0xff] }
  0xcc   : > { %v471_v62 = vmul.f32 %v468_v57, %v468_v57  ;;  %v496_v0 = vmul.f32 %v493_v60, %v493_v60  ;;  %v474_v14 = vperm.slane %v468_v57, 0  ;;  %v499_v18 = vperm.slane %v493_v60, 0 }
  0xce   : > { %v472_v1 = vsub.f32 %v470_v58, %v471_v62  ;;  %v497_v2 = vsub.f32 %v495_v63, %v496_v0  ;;  %v475_v22 = vsub.f32 %v466_v16, %v474_v14  ;;  %v500_v25 = vsub.f32 %v491_v19, %v499_v18 }
  0xd0   : > { %v473_v3 = vmax.f32 %v472_v1, 0.0  ;;  %v498_v4 = vmax.f32 %v497_v2, 0.0 }
  0xd2   : > { %v476_v5 = vadd.f32 1e-05, %v473_v3  ;;  %v501_v6 = vadd.f32 1e-05, %v498_v4 }
  0xd4   : > { %729 = vrsqrt.f32 %v476_v5  ;;  %vm483_vm1 = vweird.f32 %v476_v5  ;;  %vm508_vm3 = vweird.f32 %v501_v6 }
  0xd5   : > { %731 = vrsqrt.f32 %v501_v6 }
  0xda   : > { %v730_v7 = vpop.eup %729 }
  0xdb   : > { %v732_v8 = vpop.eup %731  ;;  %v478_v9 = vmul.f32 %v730_v7, %v476_v5  ;;  %vm484_vm2 = vweird.f32 %v730_v7 }
  0xdc   : > { %v503_v10 = vmul.f32 %v732_v8, %v501_v6  ;;  %vm509_vm4 = vweird.f32 %v732_v8  ;;  %vm485_vm5 = vmor %vm483_vm1, %vm484_vm2 }
  0xdd   : > { %v479_v11 = vmul.f32 %v730_v7, %v478_v9  ;;  %vm510_vm6 = vmor %vm508_vm3, %vm509_vm4 }
  0xde   : > { %v504_v12 = vmul.f32 %v732_v8, %v503_v10 }
  0xdf   : > { %v480_v13 = vmul.f32 0.5, %v479_v11 }
  0xe0   : > { %v505_v15 = vmul.f32 0.5, %v504_v12 }
  0xe1   : > { %v481_v17 = vsub.f32 1.5, %v480_v13 }
  0xe2   : > { %v506_v20 = vsub.f32 1.5, %v505_v15 }
  0xe3   : > { %v482_v21 = vmul.f32 %v730_v7, %v481_v17 }
  0xe4   : > { %v507_v23 = vmul.f32 %v732_v8, %v506_v20 }
  0xe5   : > { %v486_v24 = vsel %vm485_vm5, %v730_v7, %v482_v21 }
  0xe6   : > { %v487_v26 = vperm.slane %v486_v24, 0  ;;  %v511_v27 = vsel %vm510_vm6, %v732_v8, %v507_v23 }
  0xe7   : > { %v512_v28 = vperm.slane %v511_v27, 0 }
  0xe8   : > { %v488_v29 = vmul.f32 %v487_v26, %v475_v22 }
  0xe9   : > { %v513_v30 = vmul.f32 %v512_v28, %v500_v25 }
  0xea   : > { %v489_v31 = vmax.f32 %v488_v29, 0.0 }
  0xec   : > { %v514_v32 = vadd.f32 %v513_v30, %v489_v31 }
  0xee   : > { %v515_v33 = vmax.f32 %v514_v32, 0.0 }
  0xf0   : > { %v524_v34 = vpack.c.bf16 %v515_v33, %v515_v33 }
  0xf2   : > { %525 = vst [vmem:[%s875_s4] sm:$0xf] %v524_v34 }
  0xf3 PF: > { %s14_s17 = sadd.s32 1, %s755_s17   ;;  %s876_s15 = smov %s751_s16 }
  0xf4   : > { %p11_p6 = scmp.ge.s32.totalorder %s14_s17, 4   ;;  %s877_s16 = smov %s879_s18 }
  0xf6   :  { %13 = sbr.rel (!%p11_p6) target bundleno = 2 (0x2), region = 85 }

// kernel: _lambda_.33
= control target key start
LH: loop header
LB: loop body
LE: loop exit
PB: predicated region body
PF: predicated region fallthrough
CT: control target
= control target key end

     0   :  { %s606_s9 = smov 0   ;;  %s608_s10 = smov 0   ;;  %s685_s0 = inlined_call_operand.vmem [shape: bf16[8,216], index: 0, kind: input, shape index: {}]   ;;  %s686_s1 = inlined_call_operand.vmem [shape: bf16[216,128], index: 1, kind: input, shape index: {}]   ;;  %s687_s2 = inlined_call_operand.vmem [shape: bf16[8,128], index: 2, kind: output, shape index: {}]  }
   0x1   :  { %s610_s11 = smov 0  }
   0x2 LB: > { %s24_s12 = sadd.s32 1, %s584_s10  ;;  %p466_p0 = scmp.ge.s32.totalorder %s588_s11, 1  ;;  %s588_s11 = sphi %s610_s11, %s12_s11   ;;  %s584_s10 = sphi %s608_s10, %s689_s10   ;;  %s580_s9 = sphi %s606_s9, %s688_s9  }
   0x3   : > { %p26_p1 = scmp.ge.s32.totalorder %s24_s12, 2  ;;  %p134_p2 = scmp.lt.s32.totalorder %s588_s11, 3 }
   0x5   : > { %s691_s12 = smov (%p26_p1, %s24_s12), 0  ;;  %p135_p3 = pnand %p466_p0, %p134_p2 }
   0x6   : > { %p467_p4 = scmp.ne.s32.totalorder (!%p135_p3), %s580_s9, 0 }
   0x7   : > { %138 = sbr.rel (%p135_p3) target bundleno = 240 (0xf0), region = 28 }
   0xc   : > { %178 = sbr.rel (%p467_p4) target bundleno = 195 (0xc3), region = 32 }
  0x11   : > { %v533_v0 = vld [vmem:[%s686_s1 + $0x38] sm:$0xff]  ;;  %v211_v1 = vld [vmem:[%s686_s1 + $0x68] sm:$0xf]  ;;  %vm303_vm0 = vcmask 1043456   ;;  %v532_v3 = vld [vmem:[%s686_s1 + $0x30] sm:$0xff]  ;;  %vm299_vm1 = vcmask 719872  }
  0x12   : > { %v271_v2 = vunpack.c.l.b16 %v211_v1  ;;  %307 = vmatpush.bf16.msra.mxu0 %v533_v0  ;;  %v538_v6 = vld [vmem:[%s686_s1 + $0x60] sm:$0xff]  ;;  %v531_v7 = vld [vmem:[%s686_s1 + $0x28] sm:$0xff]  ;;  %v537_v8 = vld [vmem:[%s686_s1 + $0x58] sm:$0xff]  ;;  %v590_v22 = vmov 0.0   ;;  %vm349_vm2 = vcmask 1040384  }
  0x13   : > { %v530_v9 = vld [vmem:[%s686_s1 + $0x20] sm:$0xff]  ;;  %v536_v10 = vld [vmem:[%s686_s1 + $0x50] sm:$0xff]  ;;  %v529_v11 = vld [vmem:[%s686_s1 + $0x18] sm:$0xff]  ;;  %183 = vst [vmem:[#allocation3] sm:$0x3] %v590_v22 }
  0x14   : > { %v285_v4 = vpack.c.b16 %v271_v2, %v271_v2  ;;  %v535_v12 = vld [vmem:[%s686_s1 + $0x48] sm:$0xff]  ;;  %v528_v13 = vld [vmem:[%s686_s1 + $0x10] sm:$0xff]  ;;  %v184_v14 = vld [vmem:[%s685_s0] sm:$0xff] }
  0x15   : > { %v214_v15 = vunpack.c.h.b16 %v184_v14  ;;  %v534_v16 = vld [vmem:[%s686_s1 + $0x40] sm:$0xff]  ;;  %v527_v17 = vld [vmem:[%s686_s1 + $0x8] sm:$0xff]  ;;  %v213_v19 = vunpack.c.l.b16 %v184_v14 }
  0x16   : > { %v305_v5 = vsel %vm303_vm0, %v285_v4, 0  ;;  %308 = vmatpush.bf16.msra.mxu0 %v532_v3  ;;  %v526_v20 = vld [vmem:[%s686_s1] sm:$0xff] }
  0x17   : > { %322 = vmatpush.bf16.msra.mxu1 %v305_v5  ;;  %v216_v18 = vpack.c.b16 %v214_v15, %v214_v15  ;;  %v215_v21 = vpack.c.b16 %v213_v19, %v213_v19 }
  0x1a   : > { %309 = vmatpush.bf16.msra.mxu0 %v531_v7  ;;  %v335_v39 = vld [vmem:[#allocation3] sm:$0x3] }
  0x1b   : > { %323 = vmatpush.bf16.msra.mxu1 %v538_v6 }
  0x1e   : > { %310 = vmatpush.bf16.msra.mxu0 %v530_v9 }
  0x1f   : > { %324 = vmatpush.bf16.msra.mxu1 %v537_v8 }
  0x22   : > { %311 = vmatpush.bf16.msra.mxu0 %v529_v11 }
  0x23   : > { %325 = vmatpush.bf16.msra.mxu1 %v536_v10 }
  0x26   : > { %312 = vmatpush.bf16.msra.mxu0 %v528_v13 }
  0x27   : > { %326 = vmatpush.bf16.msra.mxu1 %v535_v12 }
  0x2a   : > { %313 = vmatpush.bf16.msra.mxu0 %v527_v17 }
  0x2b   : > { %327 = vmatpush.bf16.msra.mxu1 %v534_v16 }
  0x2e   : > { %520 = vmatmul.msk.bf16.vlgmr.msra.gmra.mxu1 %vm299_vm1, %v216_v18  ;;  %314 = vmatpush.bf16.msra.mxu0 %v526_v20 }
  0x31   : > { %315 = vmatmul.bf16.vlgmr.msra.gmra.mxu0 %v215_v21 }
  0xab   : > { %v329_v23 = vpop.f32.mrf.mxu1 }
  0xae   : > { %v316_v24 = vpop.f32.mrf.mxu0 }
  0xaf   : > { %v330_v25 = vadd.f32 %v329_v23, %v316_v24 }
  0xb1   : > { %334 = vst [vmem:[#allocation2] sm:$0xff] %v330_v25  ;;  %v336_v26 = vrot.slane %v330_v25, 4  ;;  %v342_v27 = vmul.f32 %v330_v25, %v330_v25 }
  0xb3   : > { %v331_v28 = vpop.f32.mrf.mxu1  ;;  %v337_v29 = vadd.f32 %v336_v26, %v330_v25  ;;  %v343_v30 = vrot.slane %v342_v27, 4 }
  0xb5   : > { %v338_v31 = vrot.slane %v337_v29, 2  ;;  %v344_v32 = vadd.f32 %v343_v30, %v342_v27 }
  0xb6   : > { %v318_v33 = vpop.f32.mrf.mxu0 }
  0xb7   : > { %v339_v34 = vadd.f32 %v338_v31, %v337_v29  ;;  %v345_v35 = vrot.slane %v344_v32, 2 }
  0xb9   : > { %v340_v36 = vrot.slane %v339_v34, 1  ;;  %v346_v37 = vadd.f32 %v345_v35, %v344_v32 }
  0xbb   : > { %v347_v38 = vrot.slane %v346_v37, 1  ;;  %v341_v40 = vadd.f32 %v340_v36, %v339_v34 }
  0xbd   : > { %v348_v41 = vadd.f32 %v347_v38, %v346_v37 }
  0xbf   : > { %v350_v42 = vsel %vm349_vm2, %v341_v40, %v348_v41 }
  0xc0   : > { %v351_v43 = vadd.f32 %v350_v42, %v335_v39 }
  0xc2   : > { %352 = vst [vmem:[#allocation3] sm:$0x3] %v351_v43 }
  0xc3 PF: > { %p521_p5 = scmp.ne.s32.totalorder %s580_s9, 1 }
  0xc5   : > { %356 = sbr.rel (%p521_p5) target bundleno = 240 (0xf0), region = 40 }
  0xca   : > { %v359_v44 = vld [vmem:[#allocation3] sm:$0x1]  ;;  %v361_v45 = vld [vmem:[#allocation3 + $0x1] sm:$0x1]  ;;  %v358_v57 = vld [vmem:[#allocation2] sm:$0xff] }
  0xcb   : > { %v360_v46 = vmul.f32 0.125, %v359_v44  ;;  %v362_v47 = vmul.f32 0.125, %v361_v45 }
  0xcd   : > { %v363_v48 = vmul.f32 %v360_v46, %v360_v46  ;;  %v366_v56 = vperm.slane %v360_v46, 0 }
  0xcf   : > { %v364_v49 = vsub.f32 %v362_v47, %v363_v48  ;;  %v367_v60 = vsub.f32 %v358_v57, %v366_v56 }
  0xd1   : > { %v365_v50 = vmax.f32 %v364_v49, 0.0 }
  0xd3   : > { %v368_v51 = vadd.f32 1e-05, %v365_v50 }
  0xd5   : > { %564 = vrsqrt.f32 %v368_v51  ;;  %vm375_vm3 = vweird.f32 %v368_v51 }
  0xdb   : > { %v565_v52 = vpop.eup %564 }
  0xdc   : > { %v370_v53 = vmul.f32 %v565_v52, %v368_v51  ;;  %vm376_vm4 = vweird.f32 %v565_v52 }
  0xdd   : > { %vm377_vm5 = vmor %vm375_vm3, %vm376_vm4 }
  0xde   : > { %v371_v54 = vmul.f32 %v565_v52, %v370_v53 }
  0xe0   : > { %v372_v55 = vmul.f32 0.5, %v371_v54 }
  0xe2   : > { %v373_v58 = vsub.f32 1.5, %v372_v55 }
  0xe4   : > { %v374_v59 = vmul.f32 %v565_v52, %v373_v58 }
  0xe6   : > { %v378_v61 = vsel %vm377_vm5, %v565_v52, %v374_v59 }
  0xe7   : > { %v379_v62 = vperm.slane %v378_v61, 0 }
  0xe9   : > { %v380_v63 = vmul.f32 %v379_v62, %v367_v60 }
  0xeb   : > { %v381_v0 = vmax.f32 %v380_v63, 0.0 }
  0xed   : > { %v390_v1 = vpack.c.bf16 %v381_v0, %v381_v0 }
  0xef   : > { %391 = vst [vmem:[%s687_s2] sm:$0xf] %v390_v1 }
  0xf0 PF: > { %s12_s11 = sadd.s32 1, %s588_s11   ;;  %s688_s9 = smov %s584_s10 }
  0xf1   : > { %p9_p6 = scmp.ge.s32.totalorder %s12_s11, 4   ;;  %s689_s10 = smov %s691_s12 }
  0xf3   :  { %11 = sbr.rel (!%p9_p6) target bundleno = 2 (0x2), region = 72 }

// kernel: _lambda_.35
= control target key start
LH: loop header
LB: loop body
LE: loop exit
PB: predicated region body
PF: predicated region fallthrough
CT: control target
= control target key end

     0   :  { %s505_s9 = smov 0   ;;  %s507_s10 = smov 0   ;;  %s566_s0 = inlined_call_operand.vmem [shape: bf16[8,128], index: 0, kind: input, shape index: {}]   ;;  %s567_s1 = inlined_call_operand.vmem [shape: bf16[128,128], index: 1, kind: input, shape index: {}]   ;;  %s568_s2 = inlined_call_operand.vmem [shape: bf16[8,128], index: 2, kind: output, shape index: {}]  }
   0x1   :  { %s509_s11 = smov 0  }
   0x2 LB: > { %s24_s12 = sadd.s32 1, %s483_s10  ;;  %p391_p0 = scmp.ge.s32.totalorder %s487_s11, 1  ;;  %s487_s11 = sphi %s509_s11, %s12_s11   ;;  %s483_s10 = sphi %s507_s10, %s570_s10   ;;  %s479_s9 = sphi %s505_s9, %s569_s9  }
   0x3   : > { %p26_p1 = scmp.ge.s32.totalorder %s24_s12, 2  ;;  %p133_p2 = scmp.lt.s32.totalorder %s487_s11, 3 }
   0x5   : > { %s572_s12 = smov (%p26_p1, %s24_s12), 0  ;;  %p134_p3 = pnand %p391_p0, %p133_p2 }
   0x6   : > { %p392_p4 = scmp.ne.s32.totalorder (!%p134_p3), %s479_s9, 0 }
   0x7   : > { %137 = sbr.rel (%p134_p3) target bundleno = 238 (0xee), region = 28 }
   0xc   : > { %174 = sbr.rel (%p392_p4) target bundleno = 193 (0xc1), region = 32 }
  0x11   : > { %v437_v0 = vld [vmem:[%s567_s1 + $0x38] sm:$0xff]  ;;  %v436_v1 = vld [vmem:[%s567_s1 + $0x30] sm:$0xff]  ;;  %v489_v2 = vmov 0.0   ;;  %v435_v3 = vld [vmem:[%s567_s1 + $0x28] sm:$0xff]  ;;  %vm274_vm0 = vcmask 1040384  }
  0x12   : > { %245 = vmatpush.bf16.msra.mxu0 %v437_v0  ;;  %179 = vst [vmem:[#allocation3] sm:$0x3] %v489_v2  ;;  %v434_v4 = vld [vmem:[%s567_s1 + $0x20] sm:$0xff]  ;;  %v433_v5 = vld [vmem:[%s567_s1 + $0x18] sm:$0xff]  ;;  %v432_v6 = vld [vmem:[%s567_s1 + $0x10] sm:$0xff] }
  0x13   : > { %v431_v7 = vld [vmem:[%s567_s1 + $0x8] sm:$0xff]  ;;  %v430_v8 = vld [vmem:[%s567_s1] sm:$0xff] }
  0x14   : > { %v180_v9 = vld [vmem:[%s566_s0] sm:$0xf] }
  0x16   : > { %246 = vmatpush.bf16.msra.mxu0 %v436_v1 }
  0x19   : > { %v260_v23 = vld [vmem:[#allocation3] sm:$0x3] }
  0x1a   : > { %247 = vmatpush.bf16.msra.mxu0 %v435_v3 }
  0x1e   : > { %248 = vmatpush.bf16.msra.mxu0 %v434_v4 }
  0x22   : > { %249 = vmatpush.bf16.msra.mxu0 %v433_v5 }
  0x26   : > { %250 = vmatpush.bf16.msra.mxu0 %v432_v6 }
  0x2a   : > { %251 = vmatpush.bf16.msra.mxu0 %v431_v7 }
  0x2e   : > { %252 = vmatpush.bf16.msra.mxu0 %v430_v8 }
  0x31   : > { %253 = vmatmul.bf16.vlgmr.msra.gmra.mxu0 %v180_v9 }
  0xae   : > { %v254_v10 = vpop.f32.mrf.mxu0 }
  0xaf   : > { %259 = vst [vmem:[#allocation2] sm:$0xff] %v254_v10  ;;  %v261_v11 = vrot.slane %v254_v10, 4  ;;  %v267_v12 = vmul.f32 %v254_v10, %v254_v10 }
  0xb1   : > { %v262_v13 = vadd.f32 %v261_v11, %v254_v10  ;;  %v268_v14 = vrot.slane %v267_v12, 4 }
  0xb3   : > { %v263_v15 = vrot.slane %v262_v13, 2  ;;  %v269_v16 = vadd.f32 %v268_v14, %v267_v12 }
  0xb5   : > { %v264_v17 = vadd.f32 %v263_v15, %v262_v13  ;;  %v270_v18 = vrot.slane %v269_v16, 2 }
  0xb6   : > { %v256_v19 = vpop.f32.mrf.mxu0 }
  0xb7   : > { %v265_v20 = vrot.slane %v264_v17, 1  ;;  %v271_v21 = vadd.f32 %v270_v18, %v269_v16 }
  0xb9   : > { %v272_v22 = vrot.slane %v271_v21, 1  ;;  %v266_v24 = vadd.f32 %v265_v20, %v264_v17 }
  0xbb   : > { %v273_v25 = vadd.f32 %v272_v22, %v271_v21 }
  0xbd   : > { %v275_v26 = vsel %vm274_vm0, %v266_v24, %v273_v25 }
  0xbe   : > { %v276_v27 = vadd.f32 %v275_v26, %v260_v23 }
  0xc0   : > { %277 = vst [vmem:[#allocation3] sm:$0x3] %v276_v27 }
  0xc1 PF: > { %p425_p5 = scmp.ne.s32.totalorder %s479_s9, 1 }
  0xc3   : > { %281 = sbr.rel (%p425_p5) target bundleno = 238 (0xee), region = 40 }
  0xc8   : > { %v284_v28 = vld [vmem:[#allocation3] sm:$0x1]  ;;  %v286_v29 = vld [vmem:[#allocation3 + $0x1] sm:$0x1]  ;;  %v283_v41 = vld [vmem:[#allocation2] sm:$0xff] }
  0xc9   : > { %v285_v30 = vmul.f32 0.125, %v284_v28  ;;  %v287_v31 = vmul.f32 0.125, %v286_v29 }
  0xcb   : > { %v288_v32 = vmul.f32 %v285_v30, %v285_v30  ;;  %v291_v40 = vperm.slane %v285_v30, 0 }
  0xcd   : > { %v289_v33 = vsub.f32 %v287_v31, %v288_v32  ;;  %v292_v44 = vsub.f32 %v283_v41, %v291_v40 }
  0xcf   : > { %v290_v34 = vmax.f32 %v289_v33, 0.0 }
  0xd1   : > { %v293_v35 = vadd.f32 1e-05, %v290_v34 }
  0xd3   : > { %463 = vrsqrt.f32 %v293_v35  ;;  %vm300_vm1 = vweird.f32 %v293_v35 }
  0xd9   : > { %v464_v36 = vpop.eup %463 }
  0xda   : > { %v295_v37 = vmul.f32 %v464_v36, %v293_v35  ;;  %vm301_vm2 = vweird.f32 %v464_v36 }
  0xdb   : > { %vm302_vm3 = vmor %vm300_vm1, %vm301_vm2 }
  0xdc   : > { %v296_v38 = vmul.f32 %v464_v36, %v295_v37 }
  0xde   : > { %v297_v39 = vmul.f32 0.5, %v296_v38 }
  0xe0   : > { %v298_v42 = vsub.f32 1.5, %v297_v39 }
  0xe2   : > { %v299_v43 = vmul.f32 %v464_v36, %v298_v42 }
  0xe4   : > { %v303_v45 = vsel %vm302_vm3, %v464_v36, %v299_v43 }
  0xe5   : > { %v304_v46 = vperm.slane %v303_v45, 0 }
  0xe7   : > { %v305_v47 = vmul.f32 %v304_v46, %v292_v44 }
  0xe9   : > { %v306_v48 = vmax.f32 %v305_v47, 0.0 }
  0xeb   : > { %v315_v49 = vpack.c.bf16 %v306_v48, %v306_v48 }
  0xed   : > { %316 = vst [vmem:[%s568_s2] sm:$0xf] %v315_v49 }
  0xee PF: > { %s12_s11 = sadd.s32 1, %s487_s11   ;;  %s569_s9 = smov %s483_s10 }
  0xef   : > { %p9_p6 = scmp.ge.s32.totalorder %s12_s11, 4   ;;  %s570_s10 = smov %s572_s12 }
  0xf1   :  { %11 = sbr.rel (!%p9_p6) target bundleno = 2 (0x2), region = 72 }

// kernel: _lambda_.37
= control target key start
LH: loop header
LB: loop body
LE: loop exit
PB: predicated region body
PF: predicated region fallthrough
CT: control target
= control target key end

     0   :  { %s578_s12 = smov 0   ;;  %s580_s13 = smov 0   ;;  %s642_s0 = inlined_call_operand.vmem [shape: bf16[8,128], index: 0, kind: input, shape index: {}]   ;;  %s643_s1 = inlined_call_operand.vmem [shape: bf16[128,128], index: 1, kind: input, shape index: {}]   ;;  %s644_s2 = inlined_call_operand.vmem [shape: bf16[8,128], index: 2, kind: input, shape index: {}]   ;;  %s645_s3 = inlined_call_operand.vmem [shape: bf16[8,128], index: 3, kind: output, shape index: {}]  }
   0x1   :  { %s582_s14 = smov 0  }
   0x2 LB: > { %s25_s15 = sadd.s32 1, %s551_s13  ;;  %p459_p0 = scmp.ge.s32.totalorder %s555_s14, 1  ;;  %s555_s14 = sphi %s582_s14, %s13_s14   ;;  %s551_s13 = sphi %s580_s13, %s647_s13   ;;  %s547_s12 = sphi %s578_s12, %s646_s12  }
   0x3   : > { %p27_p1 = scmp.ge.s32.totalorder %s25_s15, 2  ;;  %p171_p2 = scmp.lt.s32.totalorder %s555_s14, 3 }
   0x5   : > { %s649_s15 = smov (%p27_p1, %s25_s15), 0  ;;  %p172_p3 = pnand %p459_p0, %p171_p2 }
   0x6   : > { %p460_p4 = scmp.ne.s32.totalorder (!%p172_p3), %s547_s12, 0 }
   0x7   : > { %175 = sbr.rel (%p172_p3) target bundleno = 242 (0xf2), region = 32 }
   0xc   : > { %225 = sbr.rel (%p460_p4) target bundleno = 193 (0xc1), region = 36 }
  0x11   : > { %v505_v0 = vld [vmem:[%s643_s1 + $0x38] sm:$0xff]  ;;  %v504_v1 = vld [vmem:[%s643_s1 + $0x30] sm:$0xff]  ;;  %v557_v2 = vmov 0.0   ;;  %v503_v3 = vld [vmem:[%s643_s1 + $0x28] sm:$0xff]  ;;  %vm325_vm0 = vcmask 1040384  }
  0x12   : > { %296 = vmatpush.bf16.msra.mxu0 %v505_v0  ;;  %230 = vst [vmem:[#allocation3] sm:$0x3] %v557_v2  ;;  %v502_v4 = vld [vmem:[%s643_s1 + $0x20] sm:$0xff]  ;;  %v501_v5 = vld [vmem:[%s643_s1 + $0x18] sm:$0xff]  ;;  %v500_v6 = vld [vmem:[%s643_s1 + $0x10] sm:$0xff] }
  0x13   : > { %v499_v7 = vld [vmem:[%s643_s1 + $0x8] sm:$0xff]  ;;  %v498_v8 = vld [vmem:[%s643_s1] sm:$0xff] }
  0x14   : > { %v231_v9 = vld [vmem:[%s642_s0] sm:$0xf] }
  0x16   : > { %297 = vmatpush.bf16.msra.mxu0 %v504_v1 }
  0x19   : > { %v311_v23 = vld [vmem:[#allocation3] sm:$0x3] }
  0x1a   : > { %298 = vmatpush.bf16.msra.mxu0 %v503_v3 }
  0x1e   : > { %299 = vmatpush.bf16.msra.mxu0 %v502_v4 }
  0x22   : > { %300 = vmatpush.bf16.msra.mxu0 %v501_v5 }
  0x26   : > { %301 = vmatpush.bf16.msra.mxu0 %v500_v6 }
  0x2a   : > { %302 = vmatpush.bf16.msra.mxu0 %v499_v7 }
  0x2e   : > { %303 = vmatpush.bf16.msra.mxu0 %v498_v8 }
  0x31   : > { %304 = vmatmul.bf16.vlgmr.msra.gmra.mxu0 %v231_v9 }
  0xae   : > { %v305_v10 = vpop.f32.mrf.mxu0 }
  0xaf   : > { %310 = vst [vmem:[#allocation2] sm:$0xff] %v305_v10  ;;  %v312_v11 = vrot.slane %v305_v10, 4  ;;  %v318_v12 = vmul.f32 %v305_v10, %v305_v10 }
  0xb1   : > { %v313_v13 = vadd.f32 %v312_v11, %v305_v10  ;;  %v319_v14 = vrot.slane %v318_v12, 4 }
  0xb3   : > { %v314_v15 = vrot.slane %v313_v13, 2  ;;  %v320_v16 = vadd.f32 %v319_v14, %v318_v12 }
  0xb5   : > { %v315_v17 = vadd.f32 %v314_v15, %v313_v13  ;;  %v321_v18 = vrot.slane %v320_v16, 2 }
  0xb6   : > { %v307_v19 = vpop.f32.mrf.mxu0 }
  0xb7   : > { %v316_v20 = vrot.slane %v315_v17, 1  ;;  %v322_v21 = vadd.f32 %v321_v18, %v320_v16 }
  0xb9   : > { %v323_v22 = vrot.slane %v322_v21, 1  ;;  %v317_v24 = vadd.f32 %v316_v20, %v315_v17 }
  0xbb   : > { %v324_v25 = vadd.f32 %v323_v22, %v322_v21 }
  0xbd   : > { %v326_v26 = vsel %vm325_vm0, %v317_v24, %v324_v25 }
  0xbe   : > { %v327_v27 = vadd.f32 %v326_v26, %v311_v23 }
  0xc0   : > { %328 = vst [vmem:[#allocation3] sm:$0x3] %v327_v27 }
  0xc1 PF: > { %p493_p5 = scmp.ne.s32.totalorder %s547_s12, 1 }
  0xc3   : > { %332 = sbr.rel (%p493_p5) target bundleno = 242 (0xf2), region = 44 }
  0xc8   : > { %v335_v28 = vld [vmem:[#allocation3] sm:$0x1]  ;;  %v337_v29 = vld [vmem:[#allocation3 + $0x1] sm:$0x1]  ;;  %v334_v41 = vld [vmem:[#allocation2] sm:$0xff] }
  0xc9   : > { %v336_v30 = vmul.f32 0.125, %v335_v28  ;;  %v338_v31 = vmul.f32 0.125, %v337_v29  ;;  %v358_v46 = vld [vmem:[%s644_s2] sm:$0xf] }
  0xca   : > { %v359_v49 = vunpack.c.l.bf16 %v358_v46 }
  0xcb   : > { %v339_v32 = vmul.f32 %v336_v30, %v336_v30  ;;  %v342_v40 = vperm.slane %v336_v30, 0 }
  0xcd   : > { %v340_v33 = vsub.f32 %v338_v31, %v339_v32  ;;  %v343_v44 = vsub.f32 %v334_v41, %v342_v40 }
  0xcf   : > { %v341_v34 = vmax.f32 %v340_v33, 0.0 }
  0xd1   : > { %v344_v35 = vadd.f32 1e-05, %v341_v34 }
  0xd3   : > { %531 = vrsqrt.f32 %v344_v35  ;;  %vm351_vm1 = vweird.f32 %v344_v35 }
  0xd9   : > { %v532_v36 = vpop.eup %531 }
  0xda   : > { %v346_v37 = vmul.f32 %v532_v36, %v344_v35  ;;  %vm352_vm2 = vweird.f32 %v532_v36 }
  0xdb   : > { %vm353_vm3 = vmor %vm351_vm1, %vm352_vm2 }
  0xdc   : > { %v347_v38 = vmul.f32 %v532_v36, %v346_v37 }
  0xde   : > { %v348_v39 = vmul.f32 0.5, %v347_v38 }
  0xe0   : > { %v349_v42 = vsub.f32 1.5, %v348_v39 }
  0xe2   : > { %v350_v43 = vmul.f32 %v532_v36, %v349_v42 }
  0xe4   : > { %v354_v45 = vsel %vm353_vm3, %v532_v36, %v350_v43 }
  0xe5   : > { %v355_v47 = vperm.slane %v354_v45, 0 }
  0xe7   : > { %v356_v48 = vmul.f32 %v355_v47, %v343_v44 }
  0xe9   : > { %v357_v50 = vmax.f32 %v356_v48, 0.0 }
  0xeb   : > { %v360_v51 = vadd.f32 %v359_v49, %v357_v50 }
  0xed   : > { %v361_v52 = vmax.f32 %v360_v51, 0.0 }
  0xef   : > { %v370_v53 = vpack.c.bf16 %v361_v52, %v361_v52 }
  0xf1   : > { %371 = vst [vmem:[%s645_s3] sm:$0xf] %v370_v53 }
  0xf2 PF: > { %s13_s14 = sadd.s32 1, %s555_s14   ;;  %s646_s12 = smov %s551_s13 }
  0xf3   : > { %p10_p6 = scmp.ge.s32.totalorder %s13_s14, 4   ;;  %s647_s13 = smov %s649_s15 }
  0xf5   :  { %12 = sbr.rel (!%p10_p6) target bundleno = 2 (0x2), region = 79 }

</bundles_post_ra>
